<compile_context>
chip_gen: v5e
topology: v5e:2x2
jax: 0.10.0
libtpu: 0.0.40
codegen_flags: <defaults>
</compile_context>

<pallas_src>
import jax
import jax.numpy as jnp
import numpy as np
from jax import lax
from jax.experimental import pallas as pl
from jax.experimental.pallas import tpu as pltpu

EPS = 1e-5


# --------------------------------- kernel ----------------------------------- #

def _down_fused_kernel(x_ref, w1_ref, w2_ref, gb1_ref, gb2_ref, out_ref,
                       pad1, pad2, y1_buf, y2_buf, sb1, sb2):
    # x_ref:   (B, H, Wo, 2*Cin)  NHWC image block with W-pairs folded into channels
    # w1_ref:  (9*Cin, Cmid)      im2col-layout conv1 weights (tap-major, cin inner)
    # w2_ref:  (9*Cmid, Cout)
    # gb1/gb2: (2, C)             rows = [gamma; beta]
    # out_ref: (B, Cout, Ho*Wo)   channel-major output block
    # scratch: pad1/pad2 zero-padded activations, y1_buf/y2_buf raw conv outputs
    #          for ALL image blocks (VMEM-resident), sb1/sb2 folded BN scale/bias.
    p = pl.program_id(0)          # phase: 0 pool+conv1, 1 bn1+relu+conv2, 2 bn2+relu+store
    nb = pl.program_id(1)         # image-block index
    nblocks = pl.num_programs(1)

    B, H, Wo, C2 = x_ref.shape
    Cin = C2 // 2
    Ho = H // 2
    M = Ho * Wo
    BM = B * M
    Cmid = w1_ref.shape[1]

    def conv3x3(pad_ref, w_ref):
        """3x3 'same' conv as ONE MXU dot with K = 9*C (im2col held in vregs)."""
        C = pad_ref.shape[-1]
        taps = []
        for di in range(3):
            for dj in range(3):
                t = pad_ref[:, di:di + Ho, dj:dj + Wo, :]      # (B, Ho, Wo, C)
                taps.append(t.reshape(BM, C))
        col = jnp.concatenate(taps, axis=1)                     # (BM, 9*C)
        return jnp.dot(col, w_ref[...], preferred_element_type=jnp.float32)

    def fold_bn(y_buf, gb_ref, sb_ref):
        """Two-pass train-mode BN over all N*Ho*Wo samples -> folded scale/bias
        kept in VMEM scratch (stats never written to HBM)."""
        y = y_buf[...]                                          # (NB, BM, C)
        cnt = y.shape[0] * y.shape[1]
        s = jnp.sum(jnp.sum(y, axis=1, keepdims=True), axis=0, keepdims=True)
        mean = s / cnt                                          # (1, 1, C)
        d = y - mean
        var = jnp.sum(jnp.sum(d * d, axis=1, keepdims=True), axis=0,
                      keepdims=True) / cnt                      # (1, 1, C) biased
        scale = gb_ref[0:1, :] * lax.rsqrt(var[0] + EPS)        # (1, C)
        bias = gb_ref[1:2, :] - mean[0] * scale                 # (1, C)
        sb_ref[0:1, :] = scale
        sb_ref[1:2, :] = bias

    # One-time zeroing of the conv halo scratch: interiors are fully rewritten
    # every step, the 1-pixel halo stays zero for the rest of the grid.
    @pl.when((p == 0) & (nb == 0))
    def _init():
        pad1[...] = jnp.zeros(pad1.shape, pad1.dtype)
        pad2[...] = jnp.zeros(pad2.shape, pad2.dtype)

    # -------- phase 0: fused 2x2 max-pool + conv1 (raw) ----------------------
    @pl.when(p == 0)
    def _phase0():
        x = x_ref[...]                                          # (B, H, Wo, 2*Cin)
        xw = jnp.maximum(x[..., :Cin], x[..., Cin:])            # pool along W
        xr = xw.reshape(B, Ho, 2, Wo, Cin)
        pooled = jnp.maximum(xr[:, :, 0], xr[:, :, 1])          # pool along H
        pad1[:, 1:Ho + 1, 1:Wo + 1, :] = pooled                 # VMEM-only intermediate
        y1_buf[nb] = conv3x3(pad1, w1_ref)                      # (BM, Cmid)

        @pl.when(nb == nblocks - 1)
        def _():
            fold_bn(y1_buf, gb1_ref, sb1)

    # -------- phase 1: folded BN1 (one FMA) + ReLU + conv2 (raw) -------------
    @pl.when(p == 1)
    def _phase1():
        a = jnp.maximum(y1_buf[nb] * sb1[0:1, :] + sb1[1:2, :], 0.0)   # (BM, Cmid)
        pad2[:, 1:Ho + 1, 1:Wo + 1, :] = a.reshape(B, Ho, Wo, Cmid)
        y2_buf[nb] = conv3x3(pad2, w2_ref)                              # (BM, Cout)

        @pl.when(nb == nblocks - 1)
        def _():
            fold_bn(y2_buf, gb2_ref, sb2)

    # -------- phase 2: folded BN2 + ReLU, channel-major store ----------------
    @pl.when(p == 2)
    def _phase2():
        o = jnp.maximum(y2_buf[nb] * sb2[0:1, :] + sb2[1:2, :], 0.0)    # (BM, Cout)
        for b in range(B):      # static unroll: one (Cout, M) tile per image
            out_ref[b] = o[b * M:(b + 1) * M, :].T


# -------------------------------- wrapper ------------------------------------ #

def down_forward(x_nchw, params, *, images_per_block=None):
    N, Cin, H, W = x_nchw.shape
    assert H % 2 == 0 and W % 2 == 0
    Ho, Wo = H // 2, W // 2
    M = Ho * Wo
    Cmid = params["w1"].shape[0]
    Cout = params["w2"].shape[0]

    # Images per grid step: enough that the matmul M-dimension (B*Ho*Wo) reaches
    # a 128-lane multiple (amortizes per-step overhead, feeds the MXU a taller M).
    if images_per_block is None:
        B = min(N, max(1, -(-128 // M)))
        while N % B:
            B -= 1
    else:
        B = images_per_block
    NB = N // B
    BM = B * M

    # Single cheap input relayout (NHWC with W-pairs folded into channels) so the
    # in-kernel pool uses only contiguous-lane slices + leading-dim reshapes.
    # NOTE: with Cin=4..8 the input's lane dim stays narrow; this is the one
    # remaining lane-sparse access and affects only the single input read.
    x_nhwc = jnp.transpose(x_nchw, (0, 2, 3, 1)).astype(jnp.float32)
    x_pairs = x_nhwc.reshape(N, H, Wo, 2 * Cin)

    # Conv weights (Cout, Cin, 3, 3) -> im2col layout (9*Cin, Cout), tap-major,
    # so each conv is a single K=9*Cin MXU dot.
    w1 = jnp.transpose(params["w1"], (2, 3, 1, 0)).reshape(9 * Cin, Cmid).astype(jnp.float32)
    w2 = jnp.transpose(params["w2"], (2, 3, 1, 0)).reshape(9 * Cmid, Cout).astype(jnp.float32)

    gb1 = jnp.stack([params["g1"], params["b1"]]).astype(jnp.float32)   # (2, Cmid)
    gb2 = jnp.stack([params["g2"], params["b2"]]).astype(jnp.float32)   # (2, Cout)

    # Both grid axes are "arbitrary": the BN fold needs global (all-image) stats
    # before the next phase, so the grid must run sequentially on one core.
    # TODO(synk): using both v7x TensorCores would need a cross-core stats
    # reduction (VMEM_SHARED/CMEM + core_barrier); single-core is fine here.
    out = pl.pallas_call(
        _down_fused_kernel,
        grid=(3, NB),
        in_specs=[
            pl.BlockSpec((B, H, Wo, 2 * Cin),
                         lambda p, nb: (jnp.where(p == 0, nb, 0), 0, 0, 0)),
            pl.BlockSpec((9 * Cin, Cmid), lambda p, nb: (0, 0)),
            pl.BlockSpec((9 * Cmid, Cout), lambda p, nb: (0, 0)),
            pl.BlockSpec((2, Cmid), lambda p, nb: (0, 0)),
            pl.BlockSpec((2, Cout), lambda p, nb: (0, 0)),
        ],
        out_specs=pl.BlockSpec((B, Cout, M),
                               lambda p, nb: (jnp.where(p == 2, nb, 0), 0, 0)),
        out_shape=jax.ShapeDtypeStruct((N, Cout, M), jnp.float32),
        scratch_shapes=[
            pltpu.VMEM((B, Ho + 2, Wo + 2, Cin), jnp.float32),    # pad1 (halo zeroed once)
            pltpu.VMEM((B, Ho + 2, Wo + 2, Cmid), jnp.float32),   # pad2 (halo zeroed once)
            pltpu.VMEM((NB, BM, Cmid), jnp.float32),              # y1: never touches HBM
            pltpu.VMEM((NB, BM, Cout), jnp.float32),              # y2: never touches HBM
            pltpu.VMEM((2, Cmid), jnp.float32),                   # folded BN1 scale/bias
            pltpu.VMEM((2, Cout), jnp.float32),                   # folded BN2 scale/bias
        ],
        compiler_params=pltpu.CompilerParams(
            dimension_semantics=("arbitrary", "arbitrary")),
        cost_estimate=pl.CostEstimate(
            flops=2 * N * M * 9 * (Cin * Cmid + Cmid * Cout),
            transcendentals=2 * (Cmid + Cout),
            bytes_accessed=4 * (N * H * W * Cin
                                + 9 * (Cin * Cmid + Cmid * Cout)
                                + N * Cout * M)),
    )(x_pairs, w1, w2, gb1, gb2)

    # channel-major (N, Cout, Ho*Wo) -> NCHW is a free reshape (no transpose)
    return out.reshape(N, Cout, Ho, Wo)


# ----------------------------- pure-JAX reference ---------------------------- #

def down_reference(x_nchw, params):
    x = jnp.transpose(x_nchw, (0, 2, 3, 1)).astype(jnp.float32)
    x = lax.reduce_window(x, -jnp.inf, lax.max, (1, 2, 2, 1), (1, 2, 2, 1), "VALID")

    def conv_bn_relu(x, w, g, b):
        w_hwio = jnp.transpose(w, (2, 3, 1, 0))
        y = lax.conv_general_dilated(x, w_hwio, (1, 1), "SAME",
                                     dimension_numbers=("NHWC", "HWIO", "NHWC"))
        mean = jnp.mean(y, axis=(0, 1, 2), keepdims=True)
        var = jnp.mean((y - mean) ** 2, axis=(0, 1, 2), keepdims=True)
        yn = (y - mean) * lax.rsqrt(var + EPS)
        return jnp.maximum(yn * g + b, 0.0)

    x = conv_bn_relu(x, params["w1"], params["g1"], params["b1"])
    x = conv_bn_relu(x, params["w2"], params["g2"], params["b2"])
    return jnp.transpose(x, (0, 3, 1, 2))


# ----------------------------------- main ------------------------------------ #

if __name__ == "__main__":
    key = jax.random.PRNGKey(0)
    N, Cin, H, W = 2, 4, 16, 16
    Cmid = Cout = 8  # Down(in_channels=4, out_channels=8)

    k1, k2, kx = jax.random.split(key, 3)
    params = {
        # Conv2d weights (Cout, Cin, 3, 3), no bias; deterministic init.
        "w1": jax.random.normal(k1, (Cmid, Cin, 3, 3), jnp.float32) * (1.0 / (9 * Cin)) ** 0.5,
        "g1": jnp.ones((Cmid,), jnp.float32),   # BatchNorm default gamma
        "b1": jnp.zeros((Cmid,), jnp.float32),  # BatchNorm default beta
        "w2": jax.random.normal(k2, (Cout, Cmid, 3, 3), jnp.float32) * (1.0 / (9 * Cmid)) ** 0.5,
        "g2": jnp.ones((Cout,), jnp.float32),
        "b2": jnp.zeros((Cout,), jnp.float32),
    }
    # TODO(synk): BatchNorm running-stats updates (a training-time side effect)
    # are not modeled; only the forward output is reproduced.

    x = jax.random.normal(kx, (N, Cin, H, W), jnp.float32)

    out = jax.jit(down_forward)(x, params)
    out = jax.block_until_ready(out)

    assert out.shape == (N, Cout, H // 2, W // 2)
    ref = down_reference(x, params)
    np.testing.assert_allclose(np.asarray(out), np.asarray(ref), atol=1e-4, rtol=1e-4)

    print("KERNEL_OK")
</pallas_src>

<mosaic_0001>
module attributes {stable_mosaic.version = 11 : i64} {
  func.func @_down_fused_kernel(%arg0: i32, %arg1: i32, %arg2: memref<2x16x8x8xf32, #tpu.memory_space<vmem>>, %arg3: memref<36x8xf32, #tpu.memory_space<vmem>>, %arg4: memref<72x8xf32, #tpu.memory_space<vmem>>, %arg5: memref<2x8xf32, #tpu.memory_space<vmem>>, %arg6: memref<2x8xf32, #tpu.memory_space<vmem>>, %arg7: memref<2x8x64xf32, #tpu.memory_space<vmem>>, %arg8: memref<2x10x10x4xf32, #tpu.memory_space<vmem>>, %arg9: memref<2x10x10x8xf32, #tpu.memory_space<vmem>>, %arg10: memref<1x128x8xf32, #tpu.memory_space<vmem>>, %arg11: memref<1x128x8xf32, #tpu.memory_space<vmem>>, %arg12: memref<2x8xf32, #tpu.memory_space<vmem>>, %arg13: memref<2x8xf32, #tpu.memory_space<vmem>>) attributes {dimension_semantics = [#tpu.dimension_semantics<arbitrary>, #tpu.dimension_semantics<arbitrary>], iteration_bounds = array<i64: 3, 1>, scalar_prefetch = 0 : i64, scratch_operands = 6 : i64, tpu.core_type = #tpu.core_type<tc>, window_params = [{transform_indices = @transform_0, window_bounds = array<i64: 2, 16, 8, 8>}, {pipeline_mode = #tpu.pipeline_mode<synchronous>, transform_indices = @transform_1, window_bounds = array<i64: 36, 8>}, {pipeline_mode = #tpu.pipeline_mode<synchronous>, transform_indices = @transform_2, window_bounds = array<i64: 72, 8>}, {pipeline_mode = #tpu.pipeline_mode<synchronous>, transform_indices = @transform_3, window_bounds = array<i64: 2, 8>}, {pipeline_mode = #tpu.pipeline_mode<synchronous>, transform_indices = @transform_4, window_bounds = array<i64: 2, 8>}, {transform_indices = @transform_5, window_bounds = array<i64: 2, 8, 64>}]} {
    %c0_i32 = arith.constant 0 : i32
    %0 = arith.cmpi eq, %arg0, %c0_i32 : i32
    %c0_i32_0 = arith.constant 0 : i32
    %1 = arith.cmpi eq, %arg1, %c0_i32_0 : i32
    %2 = arith.andi %0, %1 : i1
    %3 = arith.extui %2 : i1 to i32
    %c0_i32_1 = arith.constant 0 : i32
    %4 = arith.cmpi ne, %3, %c0_i32_1 : i32
    scf.if %4 {
      %cst = arith.constant 0.000000e+00 : f32
      %14 = vector.broadcast %cst : f32 to vector<2x10x10x4xf32>
      %c0 = arith.constant 0 : index
      %c0_6 = arith.constant 0 : index
      %c0_7 = arith.constant 0 : index
      %c0_8 = arith.constant 0 : index
      %15 = vector.load %arg8[%c0, %c0_6, %c0_7, %c0_8] : memref<2x10x10x4xf32, #tpu.memory_space<vmem>>, vector<2x10x10x4xf32>
      tpu.vector_store %arg8[%c0, %c0_6, %c0_7, %c0_8], %14 {strides = array<i32>} : memref<2x10x10x4xf32, #tpu.memory_space<vmem>>, vector<2x10x10x4xf32>,
      %cst_9 = arith.constant 0.000000e+00 : f32
      %16 = vector.broadcast %cst_9 : f32 to vector<2x10x10x8xf32>
      %c0_10 = arith.constant 0 : index
      %c0_11 = arith.constant 0 : index
      %c0_12 = arith.constant 0 : index
      %c0_13 = arith.constant 0 : index
      %17 = vector.load %arg9[%c0_10, %c0_11, %c0_12, %c0_13] : memref<2x10x10x8xf32, #tpu.memory_space<vmem>>, vector<2x10x10x8xf32>
      tpu.vector_store %arg9[%c0_10, %c0_11, %c0_12, %c0_13], %16 {strides = array<i32>} : memref<2x10x10x8xf32, #tpu.memory_space<vmem>>, vector<2x10x10x8xf32>,
    } else {
    }
    %c0_i32_2 = arith.constant 0 : i32
    %5 = arith.cmpi eq, %arg0, %c0_i32_2 : i32
    %6 = arith.extui %5 : i1 to i32
    %c0_i32_3 = arith.constant 0 : i32
    %7 = arith.cmpi ne, %6, %c0_i32_3 : i32
    scf.if %7 {
      %c0 = arith.constant 0 : index
      %c0_6 = arith.constant 0 : index
      %c0_7 = arith.constant 0 : index
      %c0_8 = arith.constant 0 : index
      %14 = vector.load %arg2[%c0, %c0_6, %c0_7, %c0_8] : memref<2x16x8x8xf32, #tpu.memory_space<vmem>>, vector<2x16x8x8xf32>
      %15 = vector.extract_strided_slice %14 {offsets = [0, 0, 0, 0], sizes = [2, 16, 8, 4], strides = [1, 1, 1, 1]} : vector<2x16x8x8xf32> to vector<2x16x8x4xf32>
      %16 = vector.extract_strided_slice %14 {offsets = [0, 0, 0, 4], sizes = [2, 16, 8, 4], strides = [1, 1, 1, 1]} : vector<2x16x8x8xf32> to vector<2x16x8x4xf32>
      %17 = arith.maximumf %15, %16 : vector<2x16x8x4xf32>
      %18 = vector.shape_cast %17 : vector<2x16x8x4xf32> to vector<2x8x2x8x4xf32>
      %19 = vector.extract_strided_slice %18 {offsets = [0, 0, 0, 0, 0], sizes = [2, 8, 1, 8, 4], strides = [1, 1, 1, 1, 1]} : vector<2x8x2x8x4xf32> to vector<2x8x1x8x4xf32>
      %20 = vector.shape_cast %19 : vector<2x8x1x8x4xf32> to vector<2x8x8x4xf32>
      %21 = vector.extract_strided_slice %18 {offsets = [0, 0, 1, 0, 0], sizes = [2, 8, 1, 8, 4], strides = [1, 1, 1, 1, 1]} : vector<2x8x2x8x4xf32> to vector<2x8x1x8x4xf32>
      %22 = vector.shape_cast %21 : vector<2x8x1x8x4xf32> to vector<2x8x8x4xf32>
      %23 = arith.maximumf %20, %22 : vector<2x8x8x4xf32>
      %c0_9 = arith.constant 0 : index
      %c1 = arith.constant 1 : index
      %c1_10 = arith.constant 1 : index
      %c0_11 = arith.constant 0 : index
      %24 = vector.load %arg8[%c0_9, %c1, %c1_10, %c0_11] : memref<2x10x10x4xf32, #tpu.memory_space<vmem>>, vector<2x8x8x4xf32>
      tpu.vector_store %arg8[%c0_9, %c1, %c1_10, %c0_11], %23 {strides = array<i32>} : memref<2x10x10x4xf32, #tpu.memory_space<vmem>>, vector<2x8x8x4xf32>,
      %c0_12 = arith.constant 0 : index
      %c0_13 = arith.constant 0 : index
      %c0_14 = arith.constant 0 : index
      %c0_15 = arith.constant 0 : index
      %25 = vector.load %arg8[%c0_12, %c0_13, %c0_14, %c0_15] : memref<2x10x10x4xf32, #tpu.memory_space<vmem>>, vector<2x8x8x4xf32>
      %26 = vector.shape_cast %25 : vector<2x8x8x4xf32> to vector<128x4xf32>
      %c0_16 = arith.constant 0 : index
      %c0_17 = arith.constant 0 : index
      %c1_18 = arith.constant 1 : index
      %c0_19 = arith.constant 0 : index
      %27 = vector.load %arg8[%c0_16, %c0_17, %c1_18, %c0_19] : memref<2x10x10x4xf32, #tpu.memory_space<vmem>>, vector<2x8x8x4xf32>
      %28 = vector.shape_cast %27 : vector<2x8x8x4xf32> to vector<128x4xf32>
      %c0_20 = arith.constant 0 : index
      %c0_21 = arith.constant 0 : index
      %c2 = arith.constant 2 : index
      %c0_22 = arith.constant 0 : index
      %29 = vector.load %arg8[%c0_20, %c0_21, %c2, %c0_22] : memref<2x10x10x4xf32, #tpu.memory_space<vmem>>, vector<2x8x8x4xf32>
      %30 = vector.shape_cast %29 : vector<2x8x8x4xf32> to vector<128x4xf32>
      %c0_23 = arith.constant 0 : index
      %c1_24 = arith.constant 1 : index
      %c0_25 = arith.constant 0 : index
      %c0_26 = arith.constant 0 : index
      %31 = vector.load %arg8[%c0_23, %c1_24, %c0_25, %c0_26] : memref<2x10x10x4xf32, #tpu.memory_space<vmem>>, vector<2x8x8x4xf32>
      %32 = vector.shape_cast %31 : vector<2x8x8x4xf32> to vector<128x4xf32>
      %c0_27 = arith.constant 0 : index
      %c1_28 = arith.constant 1 : index
      %c1_29 = arith.constant 1 : index
      %c0_30 = arith.constant 0 : index
      %33 = vector.load %arg8[%c0_27, %c1_28, %c1_29, %c0_30] : memref<2x10x10x4xf32, #tpu.memory_space<vmem>>, vector<2x8x8x4xf32>
      %34 = vector.shape_cast %33 : vector<2x8x8x4xf32> to vector<128x4xf32>
      %c0_31 = arith.constant 0 : index
      %c1_32 = arith.constant 1 : index
      %c2_33 = arith.constant 2 : index
      %c0_34 = arith.constant 0 : index
      %35 = vector.load %arg8[%c0_31, %c1_32, %c2_33, %c0_34] : memref<2x10x10x4xf32, #tpu.memory_space<vmem>>, vector<2x8x8x4xf32>
      %36 = vector.shape_cast %35 : vector<2x8x8x4xf32> to vector<128x4xf32>
      %c0_35 = arith.constant 0 : index
      %c2_36 = arith.constant 2 : index
      %c0_37 = arith.constant 0 : index
      %c0_38 = arith.constant 0 : index
      %37 = vector.load %arg8[%c0_35, %c2_36, %c0_37, %c0_38] : memref<2x10x10x4xf32, #tpu.memory_space<vmem>>, vector<2x8x8x4xf32>
      %38 = vector.shape_cast %37 : vector<2x8x8x4xf32> to vector<128x4xf32>
      %c0_39 = arith.constant 0 : index
      %c2_40 = arith.constant 2 : index
      %c1_41 = arith.constant 1 : index
      %c0_42 = arith.constant 0 : index
      %39 = vector.load %arg8[%c0_39, %c2_40, %c1_41, %c0_42] : memref<2x10x10x4xf32, #tpu.memory_space<vmem>>, vector<2x8x8x4xf32>
      %40 = vector.shape_cast %39 : vector<2x8x8x4xf32> to vector<128x4xf32>
      %c0_43 = arith.constant 0 : index
      %c2_44 = arith.constant 2 : index
      %c2_45 = arith.constant 2 : index
      %c0_46 = arith.constant 0 : index
      %41 = vector.load %arg8[%c0_43, %c2_44, %c2_45, %c0_46] : memref<2x10x10x4xf32, #tpu.memory_space<vmem>>, vector<2x8x8x4xf32>
      %42 = vector.shape_cast %41 : vector<2x8x8x4xf32> to vector<128x4xf32>
      %43 = tpu.concatenate %26, %28, %30, %32, %34, %36, %38, %40, %42 in 1 : vector<128x4xf32>, vector<128x4xf32>, vector<128x4xf32>, vector<128x4xf32>, vector<128x4xf32>, vector<128x4xf32>, vector<128x4xf32>, vector<128x4xf32>, vector<128x4xf32> -> vector<128x36xf32>
      %c0_47 = arith.constant 0 : index
      %c0_48 = arith.constant 0 : index
      %44 = vector.load %arg3[%c0_47, %c0_48] : memref<36x8xf32, #tpu.memory_space<vmem>>, vector<36x8xf32>
      %cst = arith.constant dense<0.000000e+00> : vector<128x8xf32>
      %45 = tpu.matmul %43, %44, %cst {dimension_numbers = #tpu.dot_dimension_numbers<[1], [0], [0], [1], [0, 0, 1, 1], [], []>} : vector<128x36xf32>, vector<36x8xf32>, vector<128x8xf32> -> vector<128x8xf32>
      %46 = arith.index_cast %arg1 : i32 to index
      %c0_49 = arith.constant 0 : index
      %c0_50 = arith.constant 0 : index
      %47 = vector.load %arg10[%46, %c0_49, %c0_50] : memref<1x128x8xf32, #tpu.memory_space<vmem>>, vector<1x128x8xf32>
      %48 = vector.shape_cast %47 : vector<1x128x8xf32> to vector<128x8xf32>
      %49 = vector.shape_cast %45 : vector<128x8xf32> to vector<1x128x8xf32>
      tpu.vector_store %arg10[%46, %c0_49, %c0_50], %49 {strides = array<i32>} : memref<1x128x8xf32, #tpu.memory_space<vmem>>, vector<1x128x8xf32>,
      %c0_i32_51 = arith.constant 0 : i32
      %50 = arith.cmpi eq, %arg1, %c0_i32_51 : i32
      %51 = arith.extui %50 : i1 to i32
      %c0_i32_52 = arith.constant 0 : i32
      %52 = arith.cmpi ne, %51, %c0_i32_52 : i32
      scf.if %52 {
        %c0_53 = arith.constant 0 : index
        %c0_54 = arith.constant 0 : index
        %c0_55 = arith.constant 0 : index
        %53 = vector.load %arg10[%c0_53, %c0_54, %c0_55] : memref<1x128x8xf32, #tpu.memory_space<vmem>>, vector<1x128x8xf32>
        %cst_56 = arith.constant dense<0.000000e+00> : vector<1x8xf32>
        %54 = vector.multi_reduction <add>, %53, %cst_56 [1] : vector<1x128x8xf32> to vector<1x8xf32>
        %55 = vector.shape_cast %54 : vector<1x8xf32> to vector<1x1x8xf32>
        %cst_57 = arith.constant dense<0.000000e+00> : vector<1x8xf32>
        %56 = vector.multi_reduction <add>, %55, %cst_57 [0] : vector<1x1x8xf32> to vector<1x8xf32>
        %57 = vector.shape_cast %56 : vector<1x8xf32> to vector<1x1x8xf32>
        %cst_58 = arith.constant 1.280000e+02 : f32
        %58 = vector.broadcast %cst_58 : f32 to vector<1x1x8xf32>
        %59 = arith.divf %57, %58 : vector<1x1x8xf32>
        %60 = vector.broadcast %59 : vector<1x1x8xf32> to vector<1x128x8xf32>
        %61 = arith.subf %53, %60 : vector<1x128x8xf32>
        %62 = arith.mulf %61, %61 : vector<1x128x8xf32>
        %cst_59 = arith.constant dense<0.000000e+00> : vector<1x8xf32>
        %63 = vector.multi_reduction <add>, %62, %cst_59 [1] : vector<1x128x8xf32> to vector<1x8xf32>
        %64 = vector.shape_cast %63 : vector<1x8xf32> to vector<1x1x8xf32>
        %cst_60 = arith.constant dense<0.000000e+00> : vector<1x8xf32>
        %65 = vector.multi_reduction <add>, %64, %cst_60 [0] : vector<1x1x8xf32> to vector<1x8xf32>
        %66 = vector.shape_cast %65 : vector<1x8xf32> to vector<1x1x8xf32>
        %cst_61 = arith.constant 1.280000e+02 : f32
        %67 = vector.broadcast %cst_61 : f32 to vector<1x1x8xf32>
        %68 = arith.divf %66, %67 : vector<1x1x8xf32>
        %c0_62 = arith.constant 0 : index
        %c0_63 = arith.constant 0 : index
        %69 = vector.load %arg5[%c0_62, %c0_63] : memref<2x8xf32, #tpu.memory_space<vmem>>, vector<1x8xf32>
        %70 = vector.shape_cast %68 : vector<1x1x8xf32> to vector<1x8xf32>
        %cst_64 = arith.constant 9.99999974E-6 : f32
        %71 = vector.broadcast %cst_64 : f32 to vector<1x8xf32>
        %72 = arith.addf %70, %71 : vector<1x8xf32>
        %73 = math.rsqrt %72 : vector<1x8xf32>
        %74 = arith.mulf %69, %73 : vector<1x8xf32>
        %c1_65 = arith.constant 1 : index
        %c0_66 = arith.constant 0 : index
        %75 = vector.load %arg5[%c1_65, %c0_66] : memref<2x8xf32, #tpu.memory_space<vmem>>, vector<1x8xf32>
        %76 = vector.shape_cast %59 : vector<1x1x8xf32> to vector<1x8xf32>
        %77 = arith.mulf %76, %74 : vector<1x8xf32>
        %78 = arith.subf %75, %77 : vector<1x8xf32>
        %c0_67 = arith.constant 0 : index
        %c0_68 = arith.constant 0 : index
        %79 = vector.load %arg12[%c0_67, %c0_68] : memref<2x8xf32, #tpu.memory_space<vmem>>, vector<1x8xf32>
        tpu.vector_store %arg12[%c0_67, %c0_68], %74 {strides = array<i32>} : memref<2x8xf32, #tpu.memory_space<vmem>>, vector<1x8xf32>,
        %c1_69 = arith.constant 1 : index
        %c0_70 = arith.constant 0 : index
        %80 = vector.load %arg12[%c1_69, %c0_70] : memref<2x8xf32, #tpu.memory_space<vmem>>, vector<1x8xf32>
        tpu.vector_store %arg12[%c1_69, %c0_70], %78 {strides = array<i32>} : memref<2x8xf32, #tpu.memory_space<vmem>>, vector<1x8xf32>,
      } else {
      }
    } else {
    }
    %c1_i32 = arith.constant 1 : i32
    %8 = arith.cmpi eq, %arg0, %c1_i32 : i32
    %9 = arith.extui %8 : i1 to i32
    %c0_i32_4 = arith.constant 0 : i32
    %10 = arith.cmpi ne, %9, %c0_i32_4 : i32
    scf.if %10 {
      %14 = arith.index_cast %arg1 : i32 to index
      %c0 = arith.constant 0 : index
      %c0_6 = arith.constant 0 : index
      %15 = vector.load %arg10[%14, %c0, %c0_6] : memref<1x128x8xf32, #tpu.memory_space<vmem>>, vector<1x128x8xf32>
      %16 = vector.shape_cast %15 : vector<1x128x8xf32> to vector<128x8xf32>
      %c0_7 = arith.constant 0 : index
      %c0_8 = arith.constant 0 : index
      %17 = vector.load %arg12[%c0_7, %c0_8] : memref<2x8xf32, #tpu.memory_space<vmem>>, vector<1x8xf32>
      %18 = vector.broadcast %17 : vector<1x8xf32> to vector<128x8xf32>
      %19 = arith.mulf %16, %18 : vector<128x8xf32>
      %c1 = arith.constant 1 : index
      %c0_9 = arith.constant 0 : index
      %20 = vector.load %arg12[%c1, %c0_9] : memref<2x8xf32, #tpu.memory_space<vmem>>, vector<1x8xf32>
      %21 = vector.broadcast %20 : vector<1x8xf32> to vector<128x8xf32>
      %22 = arith.addf %19, %21 : vector<128x8xf32>
      %cst = arith.constant 0.000000e+00 : f32
      %23 = vector.broadcast %cst : f32 to vector<128x8xf32>
      %24 = arith.maximumf %22, %23 : vector<128x8xf32>
      %25 = vector.shape_cast %24 : vector<128x8xf32> to vector<2x8x8x8xf32>
      %c0_10 = arith.constant 0 : index
      %c1_11 = arith.constant 1 : index
      %c1_12 = arith.constant 1 : index
      %c0_13 = arith.constant 0 : index
      %26 = vector.load %arg9[%c0_10, %c1_11, %c1_12, %c0_13] : memref<2x10x10x8xf32, #tpu.memory_space<vmem>>, vector<2x8x8x8xf32>
      tpu.vector_store %arg9[%c0_10, %c1_11, %c1_12, %c0_13], %25 {strides = array<i32>} : memref<2x10x10x8xf32, #tpu.memory_space<vmem>>, vector<2x8x8x8xf32>,
      %c0_14 = arith.constant 0 : index
      %c0_15 = arith.constant 0 : index
      %c0_16 = arith.constant 0 : index
      %c0_17 = arith.constant 0 : index
      %27 = vector.load %arg9[%c0_14, %c0_15, %c0_16, %c0_17] : memref<2x10x10x8xf32, #tpu.memory_space<vmem>>, vector<2x8x8x8xf32>
      %28 = vector.shape_cast %27 : vector<2x8x8x8xf32> to vector<128x8xf32>
      %c0_18 = arith.constant 0 : index
      %c0_19 = arith.constant 0 : index
      %c1_20 = arith.constant 1 : index
      %c0_21 = arith.constant 0 : index
      %29 = vector.load %arg9[%c0_18, %c0_19, %c1_20, %c0_21] : memref<2x10x10x8xf32, #tpu.memory_space<vmem>>, vector<2x8x8x8xf32>
      %30 = vector.shape_cast %29 : vector<2x8x8x8xf32> to vector<128x8xf32>
      %c0_22 = arith.constant 0 : index
      %c0_23 = arith.constant 0 : index
      %c2 = arith.constant 2 : index
      %c0_24 = arith.constant 0 : index
      %31 = vector.load %arg9[%c0_22, %c0_23, %c2, %c0_24] : memref<2x10x10x8xf32, #tpu.memory_space<vmem>>, vector<2x8x8x8xf32>
      %32 = vector.shape_cast %31 : vector<2x8x8x8xf32> to vector<128x8xf32>
      %c0_25 = arith.constant 0 : index
      %c1_26 = arith.constant 1 : index
      %c0_27 = arith.constant 0 : index
      %c0_28 = arith.constant 0 : index
      %33 = vector.load %arg9[%c0_25, %c1_26, %c0_27, %c0_28] : memref<2x10x10x8xf32, #tpu.memory_space<vmem>>, vector<2x8x8x8xf32>
      %34 = vector.shape_cast %33 : vector<2x8x8x8xf32> to vector<128x8xf32>
      %c0_29 = arith.constant 0 : index
      %c1_30 = arith.constant 1 : index
      %c1_31 = arith.constant 1 : index
      %c0_32 = arith.constant 0 : index
      %35 = vector.load %arg9[%c0_29, %c1_30, %c1_31, %c0_32] : memref<2x10x10x8xf32, #tpu.memory_space<vmem>>, vector<2x8x8x8xf32>
      %36 = vector.shape_cast %35 : vector<2x8x8x8xf32> to vector<128x8xf32>
      %c0_33 = arith.constant 0 : index
      %c1_34 = arith.constant 1 : index
      %c2_35 = arith.constant 2 : index
      %c0_36 = arith.constant 0 : index
      %37 = vector.load %arg9[%c0_33, %c1_34, %c2_35, %c0_36] : memref<2x10x10x8xf32, #tpu.memory_space<vmem>>, vector<2x8x8x8xf32>
      %38 = vector.shape_cast %37 : vector<2x8x8x8xf32> to vector<128x8xf32>
      %c0_37 = arith.constant 0 : index
      %c2_38 = arith.constant 2 : index
      %c0_39 = arith.constant 0 : index
      %c0_40 = arith.constant 0 : index
      %39 = vector.load %arg9[%c0_37, %c2_38, %c0_39, %c0_40] : memref<2x10x10x8xf32, #tpu.memory_space<vmem>>, vector<2x8x8x8xf32>
      %40 = vector.shape_cast %39 : vector<2x8x8x8xf32> to vector<128x8xf32>
      %c0_41 = arith.constant 0 : index
      %c2_42 = arith.constant 2 : index
      %c1_43 = arith.constant 1 : index
      %c0_44 = arith.constant 0 : index
      %41 = vector.load %arg9[%c0_41, %c2_42, %c1_43, %c0_44] : memref<2x10x10x8xf32, #tpu.memory_space<vmem>>, vector<2x8x8x8xf32>
      %42 = vector.shape_cast %41 : vector<2x8x8x8xf32> to vector<128x8xf32>
      %c0_45 = arith.constant 0 : index
      %c2_46 = arith.constant 2 : index
      %c2_47 = arith.constant 2 : index
      %c0_48 = arith.constant 0 : index
      %43 = vector.load %arg9[%c0_45, %c2_46, %c2_47, %c0_48] : memref<2x10x10x8xf32, #tpu.memory_space<vmem>>, vector<2x8x8x8xf32>
      %44 = vector.shape_cast %43 : vector<2x8x8x8xf32> to vector<128x8xf32>
      %45 = tpu.concatenate %28, %30, %32, %34, %36, %38, %40, %42, %44 in 1 : vector<128x8xf32>, vector<128x8xf32>, vector<128x8xf32>, vector<128x8xf32>, vector<128x8xf32>, vector<128x8xf32>, vector<128x8xf32>, vector<128x8xf32>, vector<128x8xf32> -> vector<128x72xf32>
      %c0_49 = arith.constant 0 : index
      %c0_50 = arith.constant 0 : index
      %46 = vector.load %arg4[%c0_49, %c0_50] : memref<72x8xf32, #tpu.memory_space<vmem>>, vector<72x8xf32>
      %cst_51 = arith.constant dense<0.000000e+00> : vector<128x8xf32>
      %47 = tpu.matmul %45, %46, %cst_51 {dimension_numbers = #tpu.dot_dimension_numbers<[1], [0], [0], [1], [0, 0, 1, 1], [], []>} : vector<128x72xf32>, vector<72x8xf32>, vector<128x8xf32> -> vector<128x8xf32>
      %48 = arith.index_cast %arg1 : i32 to index
      %c0_52 = arith.constant 0 : index
      %c0_53 = arith.constant 0 : index
      %49 = vector.load %arg11[%48, %c0_52, %c0_53] : memref<1x128x8xf32, #tpu.memory_space<vmem>>, vector<1x128x8xf32>
      %50 = vector.shape_cast %49 : vector<1x128x8xf32> to vector<128x8xf32>
      %51 = vector.shape_cast %47 : vector<128x8xf32> to vector<1x128x8xf32>
      tpu.vector_store %arg11[%48, %c0_52, %c0_53], %51 {strides = array<i32>} : memref<1x128x8xf32, #tpu.memory_space<vmem>>, vector<1x128x8xf32>,
      %c0_i32_54 = arith.constant 0 : i32
      %52 = arith.cmpi eq, %arg1, %c0_i32_54 : i32
      %53 = arith.extui %52 : i1 to i32
      %c0_i32_55 = arith.constant 0 : i32
      %54 = arith.cmpi ne, %53, %c0_i32_55 : i32
      scf.if %54 {
        %c0_56 = arith.constant 0 : index
        %c0_57 = arith.constant 0 : index
        %c0_58 = arith.constant 0 : index
        %55 = vector.load %arg11[%c0_56, %c0_57, %c0_58] : memref<1x128x8xf32, #tpu.memory_space<vmem>>, vector<1x128x8xf32>
        %cst_59 = arith.constant dense<0.000000e+00> : vector<1x8xf32>
        %56 = vector.multi_reduction <add>, %55, %cst_59 [1] : vector<1x128x8xf32> to vector<1x8xf32>
        %57 = vector.shape_cast %56 : vector<1x8xf32> to vector<1x1x8xf32>
        %cst_60 = arith.constant dense<0.000000e+00> : vector<1x8xf32>
        %58 = vector.multi_reduction <add>, %57, %cst_60 [0] : vector<1x1x8xf32> to vector<1x8xf32>
        %59 = vector.shape_cast %58 : vector<1x8xf32> to vector<1x1x8xf32>
        %cst_61 = arith.constant 1.280000e+02 : f32
        %60 = vector.broadcast %cst_61 : f32 to vector<1x1x8xf32>
        %61 = arith.divf %59, %60 : vector<1x1x8xf32>
        %62 = vector.broadcast %61 : vector<1x1x8xf32> to vector<1x128x8xf32>
        %63 = arith.subf %55, %62 : vector<1x128x8xf32>
        %64 = arith.mulf %63, %63 : vector<1x128x8xf32>
        %cst_62 = arith.constant dense<0.000000e+00> : vector<1x8xf32>
        %65 = vector.multi_reduction <add>, %64, %cst_62 [1] : vector<1x128x8xf32> to vector<1x8xf32>
        %66 = vector.shape_cast %65 : vector<1x8xf32> to vector<1x1x8xf32>
        %cst_63 = arith.constant dense<0.000000e+00> : vector<1x8xf32>
        %67 = vector.multi_reduction <add>, %66, %cst_63 [0] : vector<1x1x8xf32> to vector<1x8xf32>
        %68 = vector.shape_cast %67 : vector<1x8xf32> to vector<1x1x8xf32>
        %cst_64 = arith.constant 1.280000e+02 : f32
        %69 = vector.broadcast %cst_64 : f32 to vector<1x1x8xf32>
        %70 = arith.divf %68, %69 : vector<1x1x8xf32>
        %c0_65 = arith.constant 0 : index
        %c0_66 = arith.constant 0 : index
        %71 = vector.load %arg6[%c0_65, %c0_66] : memref<2x8xf32, #tpu.memory_space<vmem>>, vector<1x8xf32>
        %72 = vector.shape_cast %70 : vector<1x1x8xf32> to vector<1x8xf32>
        %cst_67 = arith.constant 9.99999974E-6 : f32
        %73 = vector.broadcast %cst_67 : f32 to vector<1x8xf32>
        %74 = arith.addf %72, %73 : vector<1x8xf32>
        %75 = math.rsqrt %74 : vector<1x8xf32>
        %76 = arith.mulf %71, %75 : vector<1x8xf32>
        %c1_68 = arith.constant 1 : index
        %c0_69 = arith.constant 0 : index
        %77 = vector.load %arg6[%c1_68, %c0_69] : memref<2x8xf32, #tpu.memory_space<vmem>>, vector<1x8xf32>
        %78 = vector.shape_cast %61 : vector<1x1x8xf32> to vector<1x8xf32>
        %79 = arith.mulf %78, %76 : vector<1x8xf32>
        %80 = arith.subf %77, %79 : vector<1x8xf32>
        %c0_70 = arith.constant 0 : index
        %c0_71 = arith.constant 0 : index
        %81 = vector.load %arg13[%c0_70, %c0_71] : memref<2x8xf32, #tpu.memory_space<vmem>>, vector<1x8xf32>
        tpu.vector_store %arg13[%c0_70, %c0_71], %76 {strides = array<i32>} : memref<2x8xf32, #tpu.memory_space<vmem>>, vector<1x8xf32>,
        %c1_72 = arith.constant 1 : index
        %c0_73 = arith.constant 0 : index
        %82 = vector.load %arg13[%c1_72, %c0_73] : memref<2x8xf32, #tpu.memory_space<vmem>>, vector<1x8xf32>
        tpu.vector_store %arg13[%c1_72, %c0_73], %80 {strides = array<i32>} : memref<2x8xf32, #tpu.memory_space<vmem>>, vector<1x8xf32>,
      } else {
      }
    } else {
    }
    %c2_i32 = arith.constant 2 : i32
    %11 = arith.cmpi eq, %arg0, %c2_i32 : i32
    %12 = arith.extui %11 : i1 to i32
    %c0_i32_5 = arith.constant 0 : i32
    %13 = arith.cmpi ne, %12, %c0_i32_5 : i32
    scf.if %13 {
      %14 = arith.index_cast %arg1 : i32 to index
      %c0 = arith.constant 0 : index
      %c0_6 = arith.constant 0 : index
      %15 = vector.load %arg11[%14, %c0, %c0_6] : memref<1x128x8xf32, #tpu.memory_space<vmem>>, vector<1x128x8xf32>
      %16 = vector.shape_cast %15 : vector<1x128x8xf32> to vector<128x8xf32>
      %c0_7 = arith.constant 0 : index
      %c0_8 = arith.constant 0 : index
      %17 = vector.load %arg13[%c0_7, %c0_8] : memref<2x8xf32, #tpu.memory_space<vmem>>, vector<1x8xf32>
      %18 = vector.broadcast %17 : vector<1x8xf32> to vector<128x8xf32>
      %19 = arith.mulf %16, %18 : vector<128x8xf32>
      %c1 = arith.constant 1 : index
      %c0_9 = arith.constant 0 : index
      %20 = vector.load %arg13[%c1, %c0_9] : memref<2x8xf32, #tpu.memory_space<vmem>>, vector<1x8xf32>
      %21 = vector.broadcast %20 : vector<1x8xf32> to vector<128x8xf32>
      %22 = arith.addf %19, %21 : vector<128x8xf32>
      %cst = arith.constant 0.000000e+00 : f32
      %23 = vector.broadcast %cst : f32 to vector<128x8xf32>
      %24 = arith.maximumf %22, %23 : vector<128x8xf32>
      %25 = vector.extract_strided_slice %24 {offsets = [0, 0], sizes = [64, 8], strides = [1, 1]} : vector<128x8xf32> to vector<64x8xf32>
      %26 = tpu.transpose %25, [1, 0] : vector<64x8xf32> -> vector<8x64xf32>
      %c0_10 = arith.constant 0 : index
      %c0_11 = arith.constant 0 : index
      %c0_12 = arith.constant 0 : index
      %27 = vector.load %arg7[%c0_10, %c0_11, %c0_12] : memref<2x8x64xf32, #tpu.memory_space<vmem>>, vector<1x8x64xf32>
      %28 = vector.shape_cast %27 : vector<1x8x64xf32> to vector<8x64xf32>
      %29 = vector.shape_cast %26 : vector<8x64xf32> to vector<1x8x64xf32>
      tpu.vector_store %arg7[%c0_10, %c0_11, %c0_12], %29 {strides = array<i32>} : memref<2x8x64xf32, #tpu.memory_space<vmem>>, vector<1x8x64xf32>,
      %30 = vector.extract_strided_slice %24 {offsets = [64, 0], sizes = [64, 8], strides = [1, 1]} : vector<128x8xf32> to vector<64x8xf32>
      %31 = tpu.transpose %30, [1, 0] : vector<64x8xf32> -> vector<8x64xf32>
      %c1_13 = arith.constant 1 : index
      %c0_14 = arith.constant 0 : index
      %c0_15 = arith.constant 0 : index
      %32 = vector.load %arg7[%c1_13, %c0_14, %c0_15] : memref<2x8x64xf32, #tpu.memory_space<vmem>>, vector<1x8x64xf32>
      %33 = vector.shape_cast %32 : vector<1x8x64xf32> to vector<8x64xf32>
      %34 = vector.shape_cast %31 : vector<8x64xf32> to vector<1x8x64xf32>
      tpu.vector_store %arg7[%c1_13, %c0_14, %c0_15], %34 {strides = array<i32>} : memref<2x8x64xf32, #tpu.memory_space<vmem>>, vector<1x8x64xf32>,
    } else {
    }
    return
  }
  func.func @transform_0(%arg0: i32, %arg1: i32) -> (i32, i32, i32, i32) {
    %c0_i32 = arith.constant 0 : i32
    %0 = arith.cmpi eq, %arg0, %c0_i32 : i32
    %c0_i32_0 = arith.constant 0 : i32
    %1 = arith.select %0, %arg1, %c0_i32_0 : i32
    %c0_i32_1 = arith.constant 0 : i32
    %c0_i32_2 = arith.constant 0 : i32
    %c0_i32_3 = arith.constant 0 : i32
    %c0_i32_4 = arith.constant 0 : i32
    return %1, %c0_i32_1, %c0_i32_2, %c0_i32_3 : i32, i32, i32, i32
  }
  func.func @transform_1(%arg0: i32, %arg1: i32) -> (i32, i32) {
    %c0_i32 = arith.constant 0 : i32
    %c0_i32_0 = arith.constant 0 : i32
    %c0_i32_1 = arith.constant 0 : i32
    return %c0_i32, %c0_i32_0 : i32, i32
  }
  func.func @transform_2(%arg0: i32, %arg1: i32) -> (i32, i32) {
    %c0_i32 = arith.constant 0 : i32
    %c0_i32_0 = arith.constant 0 : i32
    %c0_i32_1 = arith.constant 0 : i32
    return %c0_i32, %c0_i32_0 : i32, i32
  }
  func.func @transform_3(%arg0: i32, %arg1: i32) -> (i32, i32) {
    %c0_i32 = arith.constant 0 : i32
    %c0_i32_0 = arith.constant 0 : i32
    %c0_i32_1 = arith.constant 0 : i32
    return %c0_i32, %c0_i32_0 : i32, i32
  }
  func.func @transform_4(%arg0: i32, %arg1: i32) -> (i32, i32) {
    %c0_i32 = arith.constant 0 : i32
    %c0_i32_0 = arith.constant 0 : i32
    %c0_i32_1 = arith.constant 0 : i32
    return %c0_i32, %c0_i32_0 : i32, i32
  }
  func.func @transform_5(%arg0: i32, %arg1: i32) -> (i32, i32, i32) {
    %c2_i32 = arith.constant 2 : i32
    %0 = arith.cmpi eq, %arg0, %c2_i32 : i32
    %c0_i32 = arith.constant 0 : i32
    %1 = arith.select %0, %arg1, %c0_i32 : i32
    %c0_i32_0 = arith.constant 0 : i32
    %c0_i32_1 = arith.constant 0 : i32
    %c0_i32_2 = arith.constant 0 : i32
    return %1, %c0_i32_0, %c0_i32_1 : i32, i32, i32
  }
}

</mosaic_0001>

<bundles_post_ra>
// kernel: down_forward.1
= control target key start
LH: loop header
LB: loop body
LE: loop exit
PB: predicated region body
PF: predicated region fallthrough
CT: control target
= control target key end

     0   :  { %s3296_s18 = smov 0   ;;  %s3298_s19 = smov 0   ;;  %s5210_s0 = inlined_call_operand.vmem [shape: f32[2,16,8,8], index: 0, kind: input, shape index: {}]   ;;  %s5211_s1 = inlined_call_operand.vmem [shape: f32[36,8], index: 1, kind: input, shape index: {}]   ;;  %s5212_s2 = inlined_call_operand.vmem [shape: f32[72,8], index: 2, kind: input, shape index: {}]   ;;  %s5213_s3 = inlined_call_operand.vmem [shape: f32[2,8], index: 3, kind: input, shape index: {}]   ;;  %s5214_s4 = inlined_call_operand.vmem [shape: f32[2,8], index: 4, kind: input, shape index: {}]   ;;  %s5215_s5 = inlined_call_operand.vmem [shape: f32[2,8,64], index: 5, kind: output, shape index: {}]  }
   0x1   :  { %s3300_s20 = smov 0  }
   0x2 LB: > { %s27_s21 = sadd.s32 1, %s3240_s19  ;;  %p3079_p0 = scmp.ge.s32.totalorder %s3244_s20, 1  ;;  %s3244_s20 = sphi %s3300_s20, %s15_s20   ;;  %s3240_s19 = sphi %s3298_s19, %s5217_s19   ;;  %s3236_s18 = sphi %s3296_s18, %s5216_s18  }
   0x3   : > { %p29_p1 = scmp.ge.s32.totalorder %s27_s21, 3  ;;  %p213_p2 = scmp.lt.s32.totalorder %s3244_s20, 4 }
   0x5   : > { %s5219_s21 = smov (%p29_p1, %s27_s21), 0  ;;  %p214_p3 = pnand %p3079_p0, %p213_p2 }
   0x6   : > { %p267_p4 = scmp.eq.s32.totalorder (!%p214_p3), %s3236_s18, 0 }
   0x7   : > { %217 = sbr.rel (%p214_p3) target bundleno = 1839 (0x72f), region = 40 }
   0xc   : > { %272 = sbr.rel (!%p267_p4) target bundleno = 93 (0x5d), region = 44  ;;  %vm273_vm0 = vcmask (%p267_p4), 31744   ;;  %v3246_v0 = vmov (%p267_p4), 0.0   ;;  %vm275_vm1 = vcmask (%p267_p4), 25600   ;;  %vm315_vm2 = vcmask (%p267_p4), 64512  }
   0xd   : > { %274 = vst.msk [vmem:[#allocation2] sm:$0xff] (%p267_p4), %vm273_vm0, %v3246_v0  ;;  %vm317_vm3 = vcmask (%p267_p4), 58368  }
   0xe   : > { %277 = vst.msk [vmem:[#allocation2 + $0x10] sm:$0xff] (%p267_p4), %vm273_vm0, %v3246_v0 }
   0xf   : > { %279 = vst.msk [vmem:[#allocation2 + $0x20] sm:$0xff] (%p267_p4), %vm273_vm0, %v3246_v0 }
  0x10   : > { %281 = vst.msk [vmem:[#allocation2 + $0x30] sm:$0xff] (%p267_p4), %vm273_vm0, %v3246_v0 }
  0x11   : > { %283 = vst.msk [vmem:[#allocation2 + $0x40] sm:$0xff] %vm273_vm0, %v3246_v0 }
  0x12   : > { %285 = vst.msk [vmem:[#allocation2 + $0x50] sm:$0xff] %vm273_vm0, %v3246_v0 }
  0x13   : > { %287 = vst.msk [vmem:[#allocation2 + $0x60] sm:$0xff] %vm273_vm0, %v3246_v0 }
  0x14   : > { %289 = vst.msk [vmem:[#allocation2 + $0x70] sm:$0xff] %vm273_vm0, %v3246_v0 }
  0x15   : > { %291 = vst.msk [vmem:[#allocation2 + $0x80] sm:$0xff] %vm273_vm0, %v3246_v0 }
  0x16   : > { %293 = vst.msk [vmem:[#allocation2 + $0x90] sm:$0xff] %vm273_vm0, %v3246_v0 }
  0x17   : > { %295 = vst.msk [vmem:[#allocation2 + $0xa0] sm:$0xff] %vm273_vm0, %v3246_v0 }
  0x18   : > { %297 = vst.msk [vmem:[#allocation2 + $0xb0] sm:$0xff] %vm273_vm0, %v3246_v0 }
  0x19   : > { %299 = vst.msk [vmem:[#allocation2 + $0xc0] sm:$0xff] %vm273_vm0, %v3246_v0 }
  0x1a   : > { %301 = vst.msk [vmem:[#allocation2 + $0xd0] sm:$0xff] %vm273_vm0, %v3246_v0 }
  0x1b   : > { %303 = vst.msk [vmem:[#allocation2 + $0xe0] sm:$0xff] %vm273_vm0, %v3246_v0 }
  0x1c   : > { %305 = vst.msk [vmem:[#allocation2 + $0xf0] sm:$0xff] %vm273_vm0, %v3246_v0 }
  0x1d   : > { %307 = vst.msk [vmem:[#allocation2 + $0x100] sm:$0xff] %vm273_vm0, %v3246_v0 }
  0x1e   : > { %309 = vst.msk [vmem:[#allocation2 + $0x110] sm:$0xff] %vm273_vm0, %v3246_v0 }
  0x1f   : > { %311 = vst.msk [vmem:[#allocation2 + $0x120] sm:$0xff] %vm273_vm0, %v3246_v0 }
  0x20   : > { %313 = vst.msk [vmem:[#allocation2 + $0x130] sm:$0xff] %vm273_vm0, %v3246_v0 }
  0x21   : > { %276 = vst.msk [vmem:[#allocation2 + $0x8] sm:$0x3] %vm275_vm1, %v3246_v0 }
  0x22   : > { %278 = vst.msk [vmem:[#allocation2 + $0x18] sm:$0x3] %vm275_vm1, %v3246_v0 }
  0x23   : > { %280 = vst.msk [vmem:[#allocation2 + $0x28] sm:$0x3] %vm275_vm1, %v3246_v0 }
  0x24   : > { %282 = vst.msk [vmem:[#allocation2 + $0x38] sm:$0x3] %vm275_vm1, %v3246_v0 }
  0x25   : > { %284 = vst.msk [vmem:[#allocation2 + $0x48] sm:$0x3] %vm275_vm1, %v3246_v0 }
  0x26   : > { %286 = vst.msk [vmem:[#allocation2 + $0x58] sm:$0x3] %vm275_vm1, %v3246_v0 }
  0x27   : > { %288 = vst.msk [vmem:[#allocation2 + $0x68] sm:$0x3] %vm275_vm1, %v3246_v0 }
  0x28   : > { %290 = vst.msk [vmem:[#allocation2 + $0x78] sm:$0x3] %vm275_vm1, %v3246_v0 }
  0x29   : > { %292 = vst.msk [vmem:[#allocation2 + $0x88] sm:$0x3] %vm275_vm1, %v3246_v0 }
  0x2a   : > { %294 = vst.msk [vmem:[#allocation2 + $0x98] sm:$0x3] %vm275_vm1, %v3246_v0 }
  0x2b   : > { %296 = vst.msk [vmem:[#allocation2 + $0xa8] sm:$0x3] %vm275_vm1, %v3246_v0 }
  0x2c   : > { %298 = vst.msk [vmem:[#allocation2 + $0xb8] sm:$0x3] %vm275_vm1, %v3246_v0 }
  0x2d   : > { %300 = vst.msk [vmem:[#allocation2 + $0xc8] sm:$0x3] %vm275_vm1, %v3246_v0 }
  0x2e   : > { %302 = vst.msk [vmem:[#allocation2 + $0xd8] sm:$0x3] %vm275_vm1, %v3246_v0 }
  0x2f   : > { %304 = vst.msk [vmem:[#allocation2 + $0xe8] sm:$0x3] %vm275_vm1, %v3246_v0 }
  0x30   : > { %306 = vst.msk [vmem:[#allocation2 + $0xf8] sm:$0x3] %vm275_vm1, %v3246_v0 }
  0x31   : > { %308 = vst.msk [vmem:[#allocation2 + $0x108] sm:$0x3] %vm275_vm1, %v3246_v0 }
  0x32   : > { %310 = vst.msk [vmem:[#allocation2 + $0x118] sm:$0x3] %vm275_vm1, %v3246_v0 }
  0x33   : > { %312 = vst.msk [vmem:[#allocation2 + $0x128] sm:$0x3] %vm275_vm1, %v3246_v0 }
  0x34   : > { %314 = vst.msk [vmem:[#allocation2 + $0x138] sm:$0x3] %vm275_vm1, %v3246_v0 }
  0x35   : > { %316 = vst.msk [vmem:[#allocation3] sm:$0xff] %vm315_vm2, %v3246_v0 }
  0x36   : > { %319 = vst.msk [vmem:[#allocation3 + $0x10] sm:$0xff] %vm315_vm2, %v3246_v0 }
  0x37   : > { %321 = vst.msk [vmem:[#allocation3 + $0x20] sm:$0xff] %vm315_vm2, %v3246_v0 }
  0x38   : > { %323 = vst.msk [vmem:[#allocation3 + $0x30] sm:$0xff] %vm315_vm2, %v3246_v0 }
  0x39   : > { %325 = vst.msk [vmem:[#allocation3 + $0x40] sm:$0xff] %vm315_vm2, %v3246_v0 }
  0x3a   : > { %327 = vst.msk [vmem:[#allocation3 + $0x50] sm:$0xff] %vm315_vm2, %v3246_v0 }
  0x3b   : > { %329 = vst.msk [vmem:[#allocation3 + $0x60] sm:$0xff] %vm315_vm2, %v3246_v0 }
  0x3c   : > { %331 = vst.msk [vmem:[#allocation3 + $0x70] sm:$0xff] %vm315_vm2, %v3246_v0 }
  0x3d   : > { %333 = vst.msk [vmem:[#allocation3 + $0x80] sm:$0xff] %vm315_vm2, %v3246_v0 }
  0x3e   : > { %335 = vst.msk [vmem:[#allocation3 + $0x90] sm:$0xff] %vm315_vm2, %v3246_v0 }
  0x3f   : > { %337 = vst.msk [vmem:[#allocation3 + $0xa0] sm:$0xff] %vm315_vm2, %v3246_v0 }
  0x40   : > { %339 = vst.msk [vmem:[#allocation3 + $0xb0] sm:$0xff] %vm315_vm2, %v3246_v0 }
  0x41   : > { %341 = vst.msk [vmem:[#allocation3 + $0xc0] sm:$0xff] %vm315_vm2, %v3246_v0 }
  0x42   : > { %343 = vst.msk [vmem:[#allocation3 + $0xd0] sm:$0xff] %vm315_vm2, %v3246_v0 }
  0x43   : > { %345 = vst.msk [vmem:[#allocation3 + $0xe0] sm:$0xff] %vm315_vm2, %v3246_v0 }
  0x44   : > { %347 = vst.msk [vmem:[#allocation3 + $0xf0] sm:$0xff] %vm315_vm2, %v3246_v0 }
  0x45   : > { %349 = vst.msk [vmem:[#allocation3 + $0x100] sm:$0xff] %vm315_vm2, %v3246_v0 }
  0x46   : > { %351 = vst.msk [vmem:[#allocation3 + $0x110] sm:$0xff] %vm315_vm2, %v3246_v0 }
  0x47   : > { %353 = vst.msk [vmem:[#allocation3 + $0x120] sm:$0xff] %vm315_vm2, %v3246_v0 }
  0x48   : > { %355 = vst.msk [vmem:[#allocation3 + $0x130] sm:$0xff] %vm315_vm2, %v3246_v0 }
  0x49   : > { %318 = vst.msk [vmem:[#allocation3 + $0x8] sm:$0x3] %vm317_vm3, %v3246_v0 }
  0x4a   : > { %320 = vst.msk [vmem:[#allocation3 + $0x18] sm:$0x3] %vm317_vm3, %v3246_v0 }
  0x4b   : > { %322 = vst.msk [vmem:[#allocation3 + $0x28] sm:$0x3] %vm317_vm3, %v3246_v0 }
  0x4c   : > { %324 = vst.msk [vmem:[#allocation3 + $0x38] sm:$0x3] %vm317_vm3, %v3246_v0 }
  0x4d   : > { %326 = vst.msk [vmem:[#allocation3 + $0x48] sm:$0x3] %vm317_vm3, %v3246_v0 }
  0x4e   : > { %328 = vst.msk [vmem:[#allocation3 + $0x58] sm:$0x3] %vm317_vm3, %v3246_v0 }
  0x4f   : > { %330 = vst.msk [vmem:[#allocation3 + $0x68] sm:$0x3] %vm317_vm3, %v3246_v0 }
  0x50   : > { %332 = vst.msk [vmem:[#allocation3 + $0x78] sm:$0x3] %vm317_vm3, %v3246_v0 }
  0x51   : > { %334 = vst.msk [vmem:[#allocation3 + $0x88] sm:$0x3] %vm317_vm3, %v3246_v0 }
  0x52   : > { %336 = vst.msk [vmem:[#allocation3 + $0x98] sm:$0x3] %vm317_vm3, %v3246_v0 }
  0x53   : > { %338 = vst.msk [vmem:[#allocation3 + $0xa8] sm:$0x3] %vm317_vm3, %v3246_v0 }
  0x54   : > { %340 = vst.msk [vmem:[#allocation3 + $0xb8] sm:$0x3] %vm317_vm3, %v3246_v0 }
  0x55   : > { %342 = vst.msk [vmem:[#allocation3 + $0xc8] sm:$0x3] %vm317_vm3, %v3246_v0 }
  0x56   : > { %344 = vst.msk [vmem:[#allocation3 + $0xd8] sm:$0x3] %vm317_vm3, %v3246_v0 }
  0x57   : > { %346 = vst.msk [vmem:[#allocation3 + $0xe8] sm:$0x3] %vm317_vm3, %v3246_v0 }
  0x58   : > { %348 = vst.msk [vmem:[#allocation3 + $0xf8] sm:$0x3] %vm317_vm3, %v3246_v0 }
  0x59   : > { %350 = vst.msk [vmem:[#allocation3 + $0x108] sm:$0x3] %vm317_vm3, %v3246_v0 }
  0x5a   : > { %352 = vst.msk [vmem:[#allocation3 + $0x118] sm:$0x3] %vm317_vm3, %v3246_v0 }
  0x5b   : > { %354 = vst.msk [vmem:[#allocation3 + $0x128] sm:$0x3] %vm317_vm3, %v3246_v0 }
  0x5c   : > { %356 = vst.msk [vmem:[#allocation3 + $0x138] sm:$0x3] %vm317_vm3, %v3246_v0 }
  0x5d PF: > { %p3081_p5 = scmp.ne.s32.totalorder %s3236_s18, 0 }
  0x5e   : > { %s3247_s28 = smov (!%p3081_p5), 124   ;;  %s3248_s22 = smov (!%p3081_p5), 4  }
  0x5f   : > { %359 = sbr.rel (%p3081_p5) target bundleno = 948 (0x3b4), region = 48  ;;  %s3249_s27 = smov (!%p3081_p5), 8  }
  0x60   : > { %s3251_s29 = smov (!%p3081_p5), 24   ;;  %s3252_s30 = smov (!%p3081_p5), 20  }
  0x61   : > { %s3253_s6 = smov (!%p3081_p5), 16   ;;  %s3254_s7 = smov (!%p3081_p5), 32  }
  0x62   : > { %s3255_s8 = smov (!%p3081_p5), 28  }
  0x64   : > { %v3481_v1 = vld [vmem:[%s5210_s0 + $0x20] sm:$0xff]  ;;  %v3486_v2 = vld [vmem:[%s5210_s0 + $0x10] sm:$0xff]  ;;  %v3502_v4 = vld [vmem:[%s5210_s0 + $0x28] sm:$0xff]  ;;  %vm569_vm4 = vcmask 31744   ;;  %vm1259_vm5 = vcmask 64512   ;;  %vm1432_vm6 = vcmask 1043456  }
  0x65   : > { %v3491_v3 = vld [vmem:[%s5210_s0] sm:$0xff]  ;;  %432 = vrot.lane.b32.xlu2 %v3481_v1, %s3247_s28  ;;  %428 = vrot.lane.b32.xlu1 %v3486_v2, %s3247_s28  ;;  %v3507_v5 = vld [vmem:[%s5210_s0 + $0x18] sm:$0xff]  ;;  %vm1276_vm7 = vcmask 97280   ;;  %vm1293_vm8 = vcmask 130048   ;;  %vm1310_vm9 = vcmask 162816   ;;  %vm1327_vm10 = vcmask 195584  }
  0x66   : > { %424 = vrot.lane.b32.xlu0 %v3491_v3, %s3247_s28  ;;  %v3512_v6 = vld [vmem:[%s5210_s0 + $0x8] sm:$0xff]  ;;  %v3523_v7 = vld [vmem:[%s5210_s0 + $0x38] sm:$0xff]  ;;  %v3528_v8 = vld [vmem:[%s5210_s0 + $0x40] sm:$0xff]  ;;  %vm1344_vm11 = vcmask 228352   ;;  %vm1361_vm12 = vcmask 261120   ;;  %vm1383_vm13 = vcmask 293888  }
  0x67   : > { %v3533_v9 = vld [vmem:[%s5210_s0 + $0x30] sm:$0xff]  ;;  %v3549_v11 = vld [vmem:[%s5210_s0 + $0x58] sm:$0xff]  ;;  %v3554_v12 = vld [vmem:[%s5210_s0 + $0x48] sm:$0xff]  ;;  %vm1671_vm2 = vcmask 57344  }
  0x68   : > { %v3544_v10 = vld [vmem:[%s5210_s0 + $0x50] sm:$0xff]  ;;  %v3565_v13 = vld [vmem:[%s5210_s0 + $0x68] sm:$0xff]  ;;  %v3575_v15 = vld [vmem:[%s5210_s0 + $0x60] sm:$0xff] }
  0x69   : > { %v3570_v14 = vld [vmem:[%s5210_s0 + $0x70] sm:$0xff]  ;;  %v3586_v16 = vld [vmem:[%s5210_s0 + $0x80] sm:$0xff]  ;;  %v3591_v17 = vld [vmem:[%s5210_s0 + $0x88] sm:$0xff] }
  0x6a   : > { %v3596_v18 = vld [vmem:[%s5210_s0 + $0x78] sm:$0xff]  ;;  %v3612_v20 = vld [vmem:[%s5210_s0 + $0xa0] sm:$0xff]  ;;  %v3617_v21 = vld [vmem:[%s5210_s0 + $0x90] sm:$0xff] }
  0x6b   : > { %v3607_v19 = vld [vmem:[%s5210_s0 + $0x98] sm:$0xff]  ;;  %v3628_v22 = vld [vmem:[%s5210_s0 + $0xb0] sm:$0xff]  ;;  %v3638_v24 = vld [vmem:[%s5210_s0 + $0xa8] sm:$0xff] }
  0x6c   : > { %v3633_v23 = vld [vmem:[%s5210_s0 + $0xb8] sm:$0xff]  ;;  %v3649_v25 = vld [vmem:[%s5210_s0 + $0xc8] sm:$0xff]  ;;  %v3654_v26 = vld [vmem:[%s5210_s0 + $0xd0] sm:$0xff] }
  0x6d   : > { %434 = vrot.lane.b32.xlu2 %v3502_v4, %s3247_s28  ;;  %430 = vrot.lane.b32.xlu1 %v3507_v5, %s3247_s28  ;;  %v3659_v27 = vld [vmem:[%s5210_s0 + $0xc0] sm:$0xff]  ;;  %v3675_v29 = vld [vmem:[%s5210_s0 + $0xe8] sm:$0xff] }
  0x6e   : > { %426 = vrot.lane.b32.xlu0 %v3512_v6, %s3247_s28  ;;  %v3670_v28 = vld [vmem:[%s5210_s0 + $0xe0] sm:$0xff]  ;;  %v3680_v30 = vld [vmem:[%s5210_s0 + $0xd8] sm:$0xff]  ;;  %v3697_v33 = vld [vmem:[%s5210_s0 + $0xf0] sm:$0xff] }
  0x6f   : > { %v602_v31 = vld [vmem:[#allocation2 + $0x1] sm:$0xff]  ;;  %v3692_v32 = vld [vmem:[%s5210_s0 + $0xf8] sm:$0xff] }
  0x70   : > { %v610_v35 = vld [vmem:[#allocation2 + $0xa1] sm:$0xff] }
  0x71   : > { %v618_v36 = vld [vmem:[#allocation2 + $0x2] sm:$0xff] }
  0x75   : > { %438 = vrot.lane.b32.xlu1 %v3523_v7, %s3247_s28  ;;  %440 = vrot.lane.b32.xlu2 %v3528_v8, %s3247_s28 }
  0x76   : > { %436 = vrot.lane.b32.xlu0 %v3533_v9, %s3247_s28 }
  0x7d   : > { %444 = vrot.lane.b32.xlu1 %v3544_v10, %s3247_s28  ;;  %446 = vrot.lane.b32.xlu2 %v3549_v11, %s3247_s28 }
  0x7e   : > { %442 = vrot.lane.b32.xlu0 %v3554_v12, %s3247_s28 }
  0x85   : > { %450 = vrot.lane.b32.xlu1 %v3565_v13, %s3247_s28  ;;  %452 = vrot.lane.b32.xlu2 %v3570_v14, %s3247_s28 }
  0x86   : > { %448 = vrot.lane.b32.xlu0 %v3575_v15, %s3247_s28 }
  0x8d   : > { %456 = vrot.lane.b32.xlu1 %v3586_v16, %s3247_s28  ;;  %458 = vrot.lane.b32.xlu2 %v3591_v17, %s3247_s28 }
  0x8e   : > { %454 = vrot.lane.b32.xlu0 %v3596_v18, %s3247_s28 }
  0x95   : > { %462 = vrot.lane.b32.xlu1 %v3607_v19, %s3247_s28  ;;  %464 = vrot.lane.b32.xlu2 %v3612_v20, %s3247_s28 }
  0x96   : > { %460 = vrot.lane.b32.xlu0 %v3617_v21, %s3247_s28 }
  0x9d   : > { %468 = vrot.lane.b32.xlu1 %v3628_v22, %s3247_s28  ;;  %470 = vrot.lane.b32.xlu2 %v3633_v23, %s3247_s28 }
  0x9e   : > { %466 = vrot.lane.b32.xlu0 %v3638_v24, %s3247_s28 }
  0xa5   : > { %474 = vrot.lane.b32.xlu1 %v3649_v25, %s3247_s28  ;;  %476 = vrot.lane.b32.xlu2 %v3654_v26, %s3247_s28 }
  0xa6   : > { %472 = vrot.lane.b32.xlu0 %v3659_v27, %s3247_s28 }
  0xad   : > { %480 = vrot.lane.b32.xlu1 %v3670_v28, %s3247_s28  ;;  %482 = vrot.lane.b32.xlu2 %v3675_v29, %s3247_s28 }
  0xae   : > { %478 = vrot.lane.b32.xlu0 %v3680_v30, %s3247_s28 }
  0xb5   : > { %747 = vrot.lane.b32.xlu2 %v602_v31, %s3248_s22  ;;  %486 = vrot.lane.b32.xlu1 %v3692_v32, %s3247_s28 }
  0xb6   : > { %484 = vrot.lane.b32.xlu0 %v3697_v33, %s3247_s28  ;;  %s3250_s28 = smov 12  }
  0xbd   : > { %763 = vrot.lane.b32.xlu1 %v610_v35, %s3248_s22 }
  0xbe   : > { %811 = vrot.lane.b32.xlu0 %v618_v36, %s3249_s27 }
  0xbf   : > { %v433_v34 = vpop.permute.xlu2 %432 }
  0xc0   : > { %v524_v37 = vmax.f32 %v3481_v1, %v433_v34 }
  0xc7   : > { %v435_v38 = vpop.permute.xlu2 %434 }
  0xc8   : > { %v525_v39 = vmax.f32 %v3502_v4, %v435_v38 }
  0xca   : > { %v554_v40 = vmax.f32 %v524_v37, %v525_v39 }
  0xcc   : > { %572 = vst.msk [vmem:[#allocation2 + $0x31] sm:$0xff] %vm569_vm4, %v554_v40 }
  0xcf   : > { %v441_v42 = vpop.permute.xlu2 %440 }
  0xd0   : > { %v528_v63 = vmax.f32 %v3528_v8, %v441_v42 }
  0xd3   : > { %v3708_v41 = vld [vmem:[#allocation2 + $0x31] sm:$0xff] }
  0xd4   : > { %753 = vrot.lane.b32.xlu2 %v3708_v41, %s3248_s22 }
  0xd7   : > { %v429_v43 = vpop.permute.xlu1 %428  ;;  %v447_v47 = vpop.permute.xlu2 %446 }
  0xd8   : > { %v425_v44 = vpop.permute.xlu0 %424  ;;  %v522_v45 = vmax.f32 %v3486_v2, %v429_v43  ;;  %v531_v62 = vmax.f32 %v3549_v11, %v447_v47 }
  0xd9   : > { %v520_v50 = vmax.f32 %v3491_v3, %v425_v44 }
  0xdf   : > { %v431_v46 = vpop.permute.xlu1 %430  ;;  %v453_v58 = vpop.permute.xlu2 %452 }
  0xe0   : > { %v523_v48 = vmax.f32 %v3507_v5, %v431_v46  ;;  %v427_v49 = vpop.permute.xlu0 %426 }
  0xe1   : > { %v521_v51 = vmax.f32 %v3512_v6, %v427_v49 }
  0xe2   : > { %v553_v52 = vmax.f32 %v522_v45, %v523_v48 }
  0xe3   : > { %v552_v53 = vmax.f32 %v520_v50, %v521_v51 }
  0xe4   : > { %571 = vst.msk [vmem:[#allocation2 + $0x21] sm:$0xff] %vm569_vm4, %v553_v52 }
  0xe5   : > { %570 = vst.msk [vmem:[#allocation2 + $0x11] sm:$0xff] %vm569_vm4, %v552_v53 }
  0xe7   : > { %v439_v54 = vpop.permute.xlu1 %438  ;;  %v459_v6 = vpop.permute.xlu2 %458 }
  0xe8   : > { %v527_v55 = vmax.f32 %v3523_v7, %v439_v54  ;;  %v437_v56 = vpop.permute.xlu0 %436  ;;  %v537_v36 = vmax.f32 %v3591_v17, %v459_v6 }
  0xe9   : > { %v526_v57 = vmax.f32 %v3533_v9, %v437_v56 }
  0xeb   : > { %v555_v59 = vmax.f32 %v526_v57, %v527_v55  ;;  %v3720_v60 = vld [vmem:[#allocation2 + $0x21] sm:$0xff] }
  0xec   : > { %751 = vrot.lane.b32.xlu1 %v3720_v60, %s3248_s22  ;;  %v3724_v61 = vld [vmem:[#allocation2 + $0x11] sm:$0xff] }
  0xed   : > { %573 = vst.msk [vmem:[#allocation2 + $0x41] sm:$0xff] %vm569_vm4, %v555_v59  ;;  %749 = vrot.lane.b32.xlu0 %v3724_v61, %s3248_s22 }
  0xef   : > { %v445_v0 = vpop.permute.xlu1 %444  ;;  %v465_v35 = vpop.permute.xlu2 %464 }
  0xf0   : > { %v530_v1 = vmax.f32 %v3544_v10, %v445_v0  ;;  %v443_v2 = vpop.permute.xlu0 %442  ;;  %v540_v48 = vmax.f32 %v3612_v20, %v465_v35  ;;  %v619_v35 = vld [vmem:[#allocation2 + $0x12] sm:$0xff] }
  0xf1   : > { %v529_v3 = vmax.f32 %v3554_v12, %v443_v2 }
  0xf2   : > { %v557_v4 = vmax.f32 %v530_v1, %v531_v62 }
  0xf3   : > { %v556_v5 = vmax.f32 %v528_v63, %v529_v3 }
  0xf4   : > { %575 = vst.msk [vmem:[#allocation2 + $0x61] sm:$0xff] %vm569_vm4, %v557_v4  ;;  %v3734_v7 = vld [vmem:[#allocation2 + $0x41] sm:$0xff] }
  0xf5   : > { %574 = vst.msk [vmem:[#allocation2 + $0x51] sm:$0xff] %vm569_vm4, %v556_v5  ;;  %755 = vrot.lane.b32.xlu0 %v3734_v7, %s3248_s22 }
  0xf7   : > { %v451_v9 = vpop.permute.xlu1 %450  ;;  %v471_v44 = vpop.permute.xlu2 %470 }
  0xf8   : > { %v533_v8 = vmax.f32 %v3565_v13, %v451_v9  ;;  %v449_v11 = vpop.permute.xlu0 %448  ;;  %v534_v13 = vmax.f32 %v3570_v14, %v453_v58  ;;  %v543_v47 = vmax.f32 %v3633_v23, %v471_v44 }
  0xf9   : > { %v532_v10 = vmax.f32 %v3575_v15, %v449_v11  ;;  %v620_v11 = vld [vmem:[#allocation2 + $0x22] sm:$0xff] }
  0xfb   : > { %v558_v31 = vmax.f32 %v532_v10, %v533_v8  ;;  %v3741_v12 = vld [vmem:[#allocation2 + $0x61] sm:$0xff] }
  0xfc   : > { %759 = vrot.lane.b32.xlu2 %v3741_v12, %s3248_s22  ;;  %v3745_v34 = vld [vmem:[#allocation2 + $0x51] sm:$0xff]  ;;  %v586_v8 = vld [vmem:[#allocation2] sm:$0xff] }
  0xfd   : > { %576 = vst.msk [vmem:[#allocation2 + $0x71] sm:$0xff] %vm569_vm4, %v558_v31  ;;  %757 = vrot.lane.b32.xlu1 %v3745_v34, %s3248_s22  ;;  %v634_v31 = vld [vmem:[#allocation2 + $0x10] sm:$0xff] }
  0xff   : > { %v457_v37 = vpop.permute.xlu1 %456  ;;  %v477_v52 = vpop.permute.xlu2 %476 }
 0x100   : > { %v536_v15 = vmax.f32 %v3586_v16, %v457_v37  ;;  %v455_v38 = vpop.permute.xlu0 %454  ;;  %v683_v37 = vld [vmem:[#allocation2 + $0x20] sm:$0xff] }
 0x101   : > { %v535_v39 = vmax.f32 %v3596_v18, %v455_v38 }
 0x102   : > { %v560_v40 = vmax.f32 %v536_v15, %v537_v36  ;;  %v3824_v15 = vld [vmem:[#allocation2 + $0x42] sm:$0xff] }
 0x103   : > { %v559_v42 = vmax.f32 %v534_v13, %v535_v39  ;;  %v3820_v13 = vld [vmem:[#allocation2 + $0x52] sm:$0xff]  ;;  %v626_v39 = vld [vmem:[#allocation2 + $0xa2] sm:$0xff] }
 0x104   : > { %578 = vst.msk [vmem:[#allocation2 + $0xb1] sm:$0xff] %vm569_vm4, %v560_v40  ;;  %v3755_v43 = vld [vmem:[#allocation2 + $0x71] sm:$0xff] }
 0x105   : > { %577 = vst.msk [vmem:[#allocation2 + $0x81] sm:$0xff] %vm569_vm4, %v559_v42  ;;  %761 = vrot.lane.b32.xlu0 %v3755_v43, %s3248_s22  ;;  %v3841_v40 = vld [vmem:[#allocation2 + $0x50] sm:$0xff] }
 0x107   : > { %v463_v17 = vpop.permute.xlu1 %462  ;;  %v483_v57 = vpop.permute.xlu2 %482 }
 0x108   : > { %v539_v14 = vmax.f32 %v3607_v19, %v463_v17  ;;  %v461_v45 = vpop.permute.xlu0 %460  ;;  %v549_v59 = vmax.f32 %v3675_v29, %v483_v57  ;;  %v592_v17 = vld [vmem:[#allocation2 + $0x60] sm:$0xff] }
 0x109   : > { %v538_v16 = vmax.f32 %v3617_v21, %v461_v45 }
 0x10b   : > { %v561_v46 = vmax.f32 %v538_v16, %v539_v14  ;;  %v3762_v18 = vld [vmem:[#allocation2 + $0xb1] sm:$0xff] }
 0x10c   : > { %765 = vrot.lane.b32.xlu2 %v3762_v18, %s3248_s22  ;;  %v3851_v14 = vld [vmem:[#allocation2 + $0x30] sm:$0xff] }
 0x10d   : > { %579 = vst.msk [vmem:[#allocation2 + $0xc1] sm:$0xff] %vm569_vm4, %v561_v46 }
 0x10f   : > { %v469_v49 = vpop.permute.xlu1 %468  ;;  %v748_v10 = vpop.permute.xlu2 %747 }
 0x110   : > { %v542_v50 = vmax.f32 %v3628_v22, %v469_v49  ;;  %v467_v51 = vpop.permute.xlu0 %466  ;;  %v1243_v36 = vsel %vm569_vm4, %v586_v8, %v748_v10  ;;  %v3965_v10 = vld [vmem:[#allocation2 + $0x70] sm:$0xff] }
 0x111   : > { %v541_v19 = vmax.f32 %v3638_v24, %v467_v51 }
 0x112   : > { %v563_v21 = vmax.f32 %v542_v50, %v543_v47  ;;  %v674_v50 = vld [vmem:[#allocation2 + $0xb2] sm:$0xff] }
 0x113   : > { %v562_v53 = vmax.f32 %v540_v48, %v541_v19 }
 0x114   : > { %581 = vst.msk [vmem:[#allocation2 + $0xe1] sm:$0xff] %vm569_vm4, %v563_v21  ;;  %v3772_v54 = vld [vmem:[#allocation2 + $0xc1] sm:$0xff] }
 0x115   : > { %580 = vst.msk [vmem:[#allocation2 + $0xd1] sm:$0xff] %vm569_vm4, %v562_v53  ;;  %767 = vrot.lane.b32.xlu0 %v3772_v54, %s3248_s22  ;;  %v691_v51 = vld [vmem:[#allocation2 + $0xc0] sm:$0xff] }
 0x117   : > { %v475_v23 = vpop.permute.xlu1 %474 }
 0x118   : > { %v545_v20 = vmax.f32 %v3649_v25, %v475_v23  ;;  %v473_v55 = vpop.permute.xlu0 %472  ;;  %v546_v25 = vmax.f32 %v3654_v26, %v477_v52  ;;  %v3802_v26 = vld [vmem:[#allocation2 + $0x32] sm:$0xff]  ;;  %v3886_v52 = vld [vmem:[#allocation2 + $0x62] sm:$0xff] }
 0x119   : > { %v544_v22 = vmax.f32 %v3659_v27, %v473_v55 }
 0x11b   : > { %v564_v56 = vmax.f32 %v544_v22, %v545_v20  ;;  %v3779_v24 = vld [vmem:[#allocation2 + $0xe1] sm:$0xff] }
 0x11c   : > { %771 = vrot.lane.b32.xlu2 %v3779_v24, %s3248_s22  ;;  %v3783_v58 = vld [vmem:[#allocation2 + $0xd1] sm:$0xff]  ;;  %v3907_v22 = vld [vmem:[#allocation2 + $0xe2] sm:$0xff] }
 0x11d   : > { %582 = vst.msk [vmem:[#allocation2 + $0xf1] sm:$0xff] %vm569_vm4, %v564_v56  ;;  %769 = vrot.lane.b32.xlu1 %v3783_v58, %s3248_s22 }
 0x11f   : > { %v481_v62 = vpop.permute.xlu1 %480 }
 0x120   : > { %v548_v27 = vmax.f32 %v3670_v28, %v481_v62  ;;  %v479_v63 = vpop.permute.xlu0 %478 }
 0x121   : > { %v547_v0 = vmax.f32 %v3680_v30, %v479_v63 }
 0x122   : > { %v566_v1 = vmax.f32 %v548_v27, %v549_v59 }
 0x123   : > { %v565_v2 = vmax.f32 %v546_v25, %v547_v0  ;;  %v1382_v0 = vld [vmem:[%s5211_s1 + $0x20] sm:$0xf] }
 0x124   : > { %584 = vst.msk [vmem:[#allocation2 + $0x111] sm:$0xff] %vm569_vm4, %v566_v1  ;;  %v3793_v3 = vld [vmem:[#allocation2 + $0xf1] sm:$0xff]  ;;  %3082 = vmatpush.msk.msra.mxu0 %vm1432_vm6, %v1382_v0  ;;  %3124 = vmatpush.msk.msra.mxu2 %vm1432_vm6, %v1382_v0 }
 0x125   : > { %583 = vst.msk [vmem:[#allocation2 + $0x101] sm:$0xff] %vm569_vm4, %v565_v2  ;;  %773 = vrot.lane.b32.xlu0 %v3793_v3, %s3248_s22  ;;  %v3916_v59 = vld [vmem:[#allocation2 + $0xf0] sm:$0xff]  ;;  %v1381_v1 = vld [vmem:[%s5211_s1 + $0x18] sm:$0xff]  ;;  %3123 = vmatpush.msk.msra.mxu1 %vm1432_vm6, %v1382_v0 }
 0x126   : > { %3125 = vmatpush.msk.msra.mxu3 %vm1432_vm6, %v1382_v0  ;;  %1448 = vmatpush.msra.mxu0 %v1381_v1  ;;  %v1380_v2 = vld [vmem:[%s5211_s1 + $0x10] sm:$0xff] }
 0x127   : > { %v487_v30 = vpop.permute.xlu1 %486  ;;  %3127 = vmatpush.msra.mxu2 %v1381_v1  ;;  %3126 = vmatpush.msra.mxu1 %v1381_v1  ;;  %v4013_v0 = vld [vmem:[#allocation2 + $0xd2] sm:$0xff] }
 0x128   : > { %v485_v4 = vpop.permute.xlu0 %484  ;;  %v551_v5 = vmax.f32 %v3692_v32, %v487_v30  ;;  %1449 = vmatpush.msra.mxu0 %v1380_v2  ;;  %3128 = vmatpush.msra.mxu3 %v1381_v1 }
 0x129   : > { %v550_v6 = vmax.f32 %v3697_v33, %v485_v4  ;;  %3130 = vmatpush.msra.mxu2 %v1380_v2  ;;  %3129 = vmatpush.msra.mxu1 %v1380_v2 }
 0x12a   : > { %3131 = vmatpush.msra.mxu3 %v1380_v2 }
 0x12b   : > { %v3798_v29 = vld [vmem:[#allocation2 + $0x111] sm:$0xff]  ;;  %v567_v9 = vmax.f32 %v550_v6, %v551_v5 }
 0x12c   : > { %777 = vrot.lane.b32.xlu2 %v3798_v29, %s3248_s22  ;;  %v3804_v28 = vld [vmem:[#allocation2 + $0x101] sm:$0xff] }
 0x12d   : > { %817 = vrot.lane.b32.xlu0 %v3802_v26, %s3249_s27  ;;  %775 = vrot.lane.b32.xlu1 %v3804_v28, %s3248_s22  ;;  %585 = vst.msk [vmem:[#allocation2 + $0x121] sm:$0xff] %vm569_vm4, %v567_v9 }
 0x12e   : > { %v3838_v38 = vpop.permute.xlu2 %753 }
 0x12f   : > { %v3843_v42 = vpop.permute.xlu1 %763  ;;  %v1246_v4 = vsel %vm569_vm4, %v3851_v14, %v3838_v38 }
 0x130   : > { %v812_v32 = vpop.permute.xlu0 %811 }
 0x131   : > { %v3818_v33 = vsel %vm1259_vm5, %v1243_v36, %v812_v32 }
 0x134   : > { %815 = vrot.lane.b32.xlu2 %v620_v11, %s3249_s27 }
 0x135   : > { %875 = vrot.lane.b32.xlu0 %v634_v31, %s3250_s28  ;;  %813 = vrot.lane.b32.xlu1 %v619_v35, %s3249_s27 }
 0x13c   : > { %821 = vrot.lane.b32.xlu2 %v3820_v13, %s3249_s27 }
 0x13d   : > { %1067 = vrot.lane.b32.xlu0 %v683_v37, %s3251_s29  ;;  %819 = vrot.lane.b32.xlu1 %v3824_v15, %s3249_s27 }
 0x144   : > { %1003 = vrot.lane.b32.xlu2 %v619_v35, %s3252_s30 }
 0x145   : > { %877 = vrot.lane.b32.xlu0 %v683_v37, %s3250_s28  ;;  %939 = vrot.lane.b32.xlu1 %v3724_v61, %s3253_s6 }
 0x14c   : > { %1195 = vrot.lane.b32.xlu2 %v620_v11, %s3254_s7 }
 0x14d   : > { %941 = vrot.lane.b32.xlu0 %v3720_v60, %s3253_s6  ;;  %1131 = vrot.lane.b32.xlu1 %v3720_v60, %s3255_s8  ;;  %v642_v60 = vld [vmem:[#allocation2 + $0xb0] sm:$0xff] }
 0x154   : > { %827 = vrot.lane.b32.xlu2 %v626_v39, %s3249_s27 }
 0x155   : > { %1005 = vrot.lane.b32.xlu0 %v620_v11, %s3252_s30  ;;  %883 = vrot.lane.b32.xlu1 %v3841_v40, %s3250_s28  ;;  %v1378_v11 = vld [vmem:[%s5211_s1] sm:$0xff] }
 0x156   : > { %v760_v61 = vpop.permute.xlu2 %759 }
 0x157   : > { %v3849_v44 = vsel %vm569_vm4, %v592_v17, %v760_v61 }
 0x15c   : > { %891 = vrot.lane.b32.xlu2 %v642_v60, %s3250_s28 }
 0x15d   : > { %1069 = vrot.lane.b32.xlu0 %v3851_v14, %s3251_s29  ;;  %947 = vrot.lane.b32.xlu1 %v3745_v34, %s3253_s6 }
 0x15e   : > { %v752_v45 = vpop.permute.xlu1 %751 }
 0x15f   : > { %v1245_v16 = vsel %vm569_vm4, %v683_v37, %v752_v45  ;;  %v750_v46 = vpop.permute.xlu0 %749  ;;  %v3977_v37 = vld [vmem:[#allocation2 + $0xf2] sm:$0xff] }
 0x160   : > { %v3860_v47 = vsel %vm569_vm4, %v634_v31, %v750_v46  ;;  %v3967_v31 = vld [vmem:[#allocation2 + $0x40] sm:$0xff] }
 0x164   : > { %955 = vrot.lane.b32.xlu2 %v3762_v18, %s3253_s6  ;;  %v3876_v18 = vld [vmem:[#allocation2 + $0xc2] sm:$0xff] }
 0x165   : > { %1133 = vrot.lane.b32.xlu0 %v3708_v41, %s3255_s8  ;;  %1011 = vrot.lane.b32.xlu1 %v3820_v13, %s3252_s30 }
 0x166   : > { %v766_v48 = vpop.permute.xlu2 %765 }
 0x167   : > { %v3869_v49 = vsel %vm569_vm4, %v642_v60, %v766_v48  ;;  %v3882_v19 = vpop.permute.xlu0 %755 }
 0x16c   : > { %1019 = vrot.lane.b32.xlu2 %v674_v50, %s3252_s30 }
 0x16d   : > { %1197 = vrot.lane.b32.xlu0 %v3802_v26, %s3254_s7  ;;  %1075 = vrot.lane.b32.xlu1 %v592_v17, %s3251_s29 }
 0x16f   : > { %v758_v56 = vpop.permute.xlu1 %757 }
 0x174   : > { %1083 = vrot.lane.b32.xlu2 %v691_v51, %s3251_s29 }
 0x175   : > { %1211 = vrot.lane.b32.xlu0 %v3876_v18, %s3254_s7  ;;  %1139 = vrot.lane.b32.xlu1 %v3741_v12, %s3255_s8 }
 0x176   : > { %v3891_v21 = vpop.permute.xlu2 %771 }
 0x177   : > { %v3893_v53 = vpop.permute.xlu0 %761 }
 0x17c   : > { %1147 = vrot.lane.b32.xlu2 %v3772_v54, %s3255_s8 }
 0x17d   : > { %829 = vrot.lane.b32.xlu0 %v674_v50, %s3249_s27  ;;  %1203 = vrot.lane.b32.xlu1 %v3886_v52, %s3254_s7  ;;  %v3999_v50 = vld [vmem:[#allocation2 + $0x102] sm:$0xff] }
 0x184   : > { %885 = vrot.lane.b32.xlu2 %v592_v17, %s3250_s28  ;;  %v3987_v17 = vld [vmem:[#allocation2 + $0xd0] sm:$0xff] }
 0x185   : > { %949 = vrot.lane.b32.xlu0 %v3741_v12, %s3253_s6  ;;  %879 = vrot.lane.b32.xlu1 %v3851_v14, %s3250_s28 }
 0x186   : > { %v3900_v23 = vpop.permute.xlu2 %777 }
 0x187   : > { %v768_v20 = vpop.permute.xlu0 %767 }
 0x188   : > { %v3903_v55 = vsel %vm569_vm4, %v691_v51, %v768_v20 }
 0x18c   : > { %943 = vrot.lane.b32.xlu2 %v3708_v41, %s3253_s6  ;;  %v1248_v41 = vsel %vm569_vm4, %v3841_v40, %v758_v56 }
 0x18d   : > { %1007 = vrot.lane.b32.xlu0 %v3802_v26, %s3252_s30  ;;  %835 = vrot.lane.b32.xlu1 %v3907_v22, %s3249_s27  ;;  %v1379_v26 = vld [vmem:[%s5211_s1 + $0x8] sm:$0xff] }
 0x18e   : > { %v816_v12 = vpop.permute.xlu2 %815  ;;  %1450 = vmatpush.msra.mxu0 %v1379_v26  ;;  %3133 = vmatpush.msra.mxu2 %v1379_v26 }
 0x18f   : > { %v3914_v57 = vsel %vm1259_vm5, %v1245_v16, %v816_v12  ;;  %v3925_v62 = vpop.permute.xlu1 %769  ;;  %3132 = vmatpush.msra.mxu1 %v1379_v26  ;;  %3134 = vmatpush.msra.mxu3 %v1379_v26 }
 0x190   : > { %1451 = vmatpush.msra.mxu0 %v1378_v11  ;;  %3136 = vmatpush.msra.mxu2 %v1378_v11 }
 0x191   : > { %3135 = vmatpush.msra.mxu1 %v1378_v11  ;;  %3137 = vmatpush.msra.mxu3 %v1378_v11 }
 0x194   : > { %899 = vrot.lane.b32.xlu2 %v3916_v59, %s3250_s28 }
 0x195   : > { %963 = vrot.lane.b32.xlu0 %v3793_v3, %s3253_s6  ;;  %893 = vrot.lane.b32.xlu1 %v691_v51, %s3250_s28  ;;  %v4003_v51 = vld [vmem:[#allocation2 + $0x72] sm:$0xff] }
 0x196   : > { %v822_v25 = vpop.permute.xlu2 %821 }
 0x197   : > { %v3928_v27 = vsel %vm1259_vm5, %v1248_v41, %v822_v25  ;;  %v3930_v63 = vpop.permute.xlu0 %773 }
 0x19c   : > { %957 = vrot.lane.b32.xlu2 %v3772_v54, %s3253_s6  ;;  %v3953_v54 = vld [vmem:[#allocation2 + $0x100] sm:$0xff] }
 0x19d   : > { %1021 = vrot.lane.b32.xlu0 %v3876_v18, %s3252_s30  ;;  %1013 = vrot.lane.b32.xlu1 %v3886_v52, %s3252_s30 }
 0x19e   : > { %v1004_v30 = vpop.permute.xlu2 %1003 }
 0x19f   : > { %v776_v5 = vpop.permute.xlu1 %775  ;;  %v818_v6 = vpop.permute.xlu0 %817 }
 0x1a0   : > { %v3957_v9 = vsel %vm569_vm4, %v3953_v54, %v776_v5  ;;  %v3960_v8 = vsel %vm1259_vm5, %v1246_v4, %v818_v6 }
 0x1a4   : > { %1077 = vrot.lane.b32.xlu2 %v3965_v10, %s3251_s29 }
 0x1a5   : > { %1141 = vrot.lane.b32.xlu0 %v3755_v43, %s3255_s8  ;;  %1071 = vrot.lane.b32.xlu1 %v3967_v31, %s3251_s29 }
 0x1a6   : > { %v1196_v35 = vpop.permute.xlu2 %1195 }
 0x1a7   : > { %v814_v36 = vpop.permute.xlu1 %813  ;;  %v876_v32 = vpop.permute.xlu0 %875 }
 0x1a8   : > { %v1277_v16 = vsel %vm1276_vm7, %v3818_v33, %v876_v32 }
 0x1ac   : > { %1135 = vrot.lane.b32.xlu2 %v3734_v7, %s3255_s8 }
 0x1ad   : > { %1199 = vrot.lane.b32.xlu0 %v3824_v15, %s3254_s7  ;;  %1027 = vrot.lane.b32.xlu1 %v3977_v37, %s3252_s30 }
 0x1ae   : > { %v3983_v38 = vpop.permute.xlu2 %827 }
 0x1af   : > { %v3985_v39 = vpop.permute.xlu1 %819  ;;  %v1068_v61 = vpop.permute.xlu0 %1067 }
 0x1b4   : > { %1091 = vrot.lane.b32.xlu2 %v3953_v54, %s3251_s29 }
 0x1b5   : > { %1155 = vrot.lane.b32.xlu0 %v3804_v28, %s3255_s8  ;;  %1085 = vrot.lane.b32.xlu1 %v3987_v17, %s3251_s29 }
 0x1b6   : > { %v892_v60 = vpop.permute.xlu2 %891 }
 0x1b7   : > { %v940_v14 = vpop.permute.xlu1 %939  ;;  %v878_v45 = vpop.permute.xlu0 %877 }
 0x1b8   : > { %v1294_v46 = vsel %vm1293_vm8, %v1277_v16, %v940_v14 }
 0x1b9   : > { %v1311_v48 = vsel %vm1310_vm9, %v1294_v46, %v1004_v30 }
 0x1ba   : > { %v1328_v12 = vsel %vm1327_vm10, %v1311_v48, %v1068_v61 }
 0x1bc   : > { %1149 = vrot.lane.b32.xlu2 %v3783_v58, %s3255_s8 }
 0x1bd   : > { %1219 = vrot.lane.b32.xlu0 %v3999_v50, %s3254_s7  ;;  %1205 = vrot.lane.b32.xlu1 %v4003_v51, %s3254_s7 }
 0x1be   : > { %v956_v33 = vpop.permute.xlu2 %955 }
 0x1bf   : > { %v1132_v20 = vpop.permute.xlu1 %1131  ;;  %v942_v56 = vpop.permute.xlu0 %941 }
 0x1c0   : > { %v1345_v41 = vsel %vm1344_vm11, %v1328_v12, %v1132_v20 }
 0x1c1   : > { %v1362_v25 = vsel %vm1361_vm12, %v1345_v41, %v1196_v35 }
 0x1c2   : > { %3083 = vmatmul.msk.f32.vlgmr.msra.gmra.mxu0 %vm1383_vm13, %v1362_v25  ;;  %v689_v25 = vld [vmem:[#allocation2 + $0x80] sm:$0xff] }
 0x1c4   : > { %1213 = vrot.lane.b32.xlu2 %v4013_v0, %s3254_s7 }
 0x1c5   : > { %831 = vrot.lane.b32.xlu0 %v3876_v18, %s3249_s27  ;;  %823 = vrot.lane.b32.xlu1 %v3886_v52, %s3249_s27 }
 0x1c6   : > { %v1020_v1 = vpop.permute.xlu2 %1019 }
 0x1c7   : > { %v884_v2 = vpop.permute.xlu1 %883  ;;  %v1006_v26 = vpop.permute.xlu0 %1005 }
 0x1cc   : > { %887 = vrot.lane.b32.xlu2 %v3965_v10, %s3250_s28 }
 0x1cd   : > { %951 = vrot.lane.b32.xlu0 %v3755_v43, %s3253_s6  ;;  %881 = vrot.lane.b32.xlu1 %v3967_v31, %s3250_s28  ;;  %v1261_v43 = vsel %vm1259_vm5, %v3860_v47, %v814_v36 }
 0x1ce   : > { %v1084_v30 = vpop.permute.xlu2 %1083  ;;  %v1278_v11 = vsel %vm1276_vm7, %v1261_v43, %v878_v45  ;;  %v598_v43 = vld [vmem:[#allocation2 + $0xe0] sm:$0xff] }
 0x1cf   : > { %v948_v4 = vpop.permute.xlu1 %947  ;;  %v1070_v5 = vpop.permute.xlu0 %1069  ;;  %v1295_v35 = vsel %vm1293_vm8, %v1278_v11, %v942_v56 }
 0x1d4   : > { %945 = vrot.lane.b32.xlu2 %v3734_v7, %s3253_s6  ;;  %v1312_v7 = vsel %vm1310_vm9, %v1295_v35, %v1006_v26  ;;  %v705_v26 = vld [vmem:[#allocation2 + $0x81] sm:$0xff]  ;;  %v4102_v35 = vld [vmem:[#allocation2 + $0x112] sm:$0xff] }
 0x1d5   : > { %1009 = vrot.lane.b32.xlu0 %v3824_v15, %s3252_s30  ;;  %837 = vrot.lane.b32.xlu1 %v3977_v37, %s3249_s27  ;;  %v594_v15 = vld [vmem:[#allocation2 + $0xa0] sm:$0xff]  ;;  %v1329_v32 = vsel %vm1327_vm10, %v1312_v7, %v1070_v5 }
 0x1d6   : > { %v1148_v18 = vpop.permute.xlu2 %1147  ;;  %v721_v7 = vld [vmem:[#allocation2 + $0x82] sm:$0xff] }
 0x1d7   : > { %v1012_v52 = vpop.permute.xlu1 %1011  ;;  %v1134_v6 = vpop.permute.xlu0 %1133 }
 0x1d8   : > { %v1346_v47 = vsel %vm1344_vm11, %v1329_v32, %v1134_v6  ;;  %v4093_v6 = vld [vmem:[#allocation2 + $0x110] sm:$0xff] }
 0x1dc   : > { %901 = vrot.lane.b32.xlu2 %v3953_v54, %s3250_s28 }
 0x1dd   : > { %965 = vrot.lane.b32.xlu0 %v3804_v28, %s3253_s6  ;;  %895 = vrot.lane.b32.xlu1 %v3987_v17, %s3250_s28  ;;  %v1251_v28 = vsel %vm569_vm4, %v594_v15, %v3843_v42 }
 0x1de   : > { %v886_v61 = vpop.permute.xlu2 %885  ;;  %v1268_v16 = vsel %vm1259_vm5, %v1251_v28, %v3983_v38 }
 0x1df   : > { %v4048_v36 = vsel %vm1276_vm7, %v3928_v27, %v886_v61  ;;  %v1076_v14 = vpop.permute.xlu1 %1075  ;;  %v1198_v54 = vpop.permute.xlu0 %1197  ;;  %v1285_v46 = vsel %vm1276_vm7, %v1268_v16, %v892_v60 }
 0x1e0   : > { %v1363_v45 = vsel %vm1361_vm12, %v1346_v47, %v1198_v54  ;;  %v1302_v48 = vsel %vm1293_vm8, %v1285_v46, %v956_v33 }
 0x1e1   : > { %3084 = vmatmul.msk.f32.gmra.mxu0 %vm1383_vm13, %v1363_v45  ;;  %v1319_v27 = vsel %vm1310_vm9, %v1302_v48, %v1020_v1 }
 0x1e2   : > { %v1336_v42 = vsel %vm1327_vm10, %v1319_v27, %v1084_v30 }
 0x1e3   : > { %v1353_v38 = vsel %vm1344_vm11, %v1336_v42, %v1148_v18 }
 0x1e4   : > { %959 = vrot.lane.b32.xlu2 %v3783_v58, %s3253_s6  ;;  %v1247_v58 = vsel %vm569_vm4, %v3967_v31, %v3882_v19 }
 0x1e5   : > { %1023 = vrot.lane.b32.xlu0 %v4013_v0, %s3252_s30  ;;  %1015 = vrot.lane.b32.xlu1 %v4003_v51, %s3252_s30  ;;  %v1264_v56 = vsel %vm1259_vm5, %v1247_v58, %v3985_v39 }
 0x1e6   : > { %v944_v20 = vpop.permute.xlu2 %943  ;;  %v1281_v41 = vsel %vm1276_vm7, %v1264_v56, %v884_v2 }
 0x1e7   : > { %v1140_v12 = vpop.permute.xlu1 %1139  ;;  %v1212_v60 = vpop.permute.xlu0 %1211  ;;  %v1298_v1 = vsel %vm1293_vm8, %v1281_v41, %v948_v4 }
 0x1e8   : > { %v1370_v33 = vsel %vm1361_vm12, %v1353_v38, %v1212_v60  ;;  %v1315_v30 = vsel %vm1310_vm9, %v1298_v1, %v1012_v52 }
 0x1e9   : > { %3091 = vmatmul.msk.f32.vlgmr.msra.gmra.mxu2 %vm1383_vm13, %v1370_v33  ;;  %v1332_v19 = vsel %vm1327_vm10, %v1315_v30, %v1076_v14 }
 0x1ea   : > { %v1349_v39 = vsel %vm1344_vm11, %v1332_v19, %v1140_v12  ;;  %v690_v19 = vld [vmem:[#allocation2 + $0x90] sm:$0xff] }
 0x1ec   : > { %1079 = vrot.lane.b32.xlu2 %v689_v25, %s3251_s29 }
 0x1ed   : > { %1143 = vrot.lane.b32.xlu0 %v705_v26, %s3255_s8  ;;  %1073 = vrot.lane.b32.xlu1 %v3841_v40, %s3251_s29 }
 0x1ee   : > { %v4082_v31 = vpop.permute.xlu2 %899 }
 0x1ef   : > { %v1204_v2 = vpop.permute.xlu1 %1203  ;;  %v830_v5 = vpop.permute.xlu0 %829 }
 0x1f0   : > { %v1366_v4 = vsel %vm1361_vm12, %v1349_v39, %v1204_v2 }
 0x1f1   : > { %3087 = vmatmul.msk.f32.vlgmr.msra.gmra.mxu1 %vm1383_vm13, %v1366_v4 }
 0x1f4   : > { %1137 = vrot.lane.b32.xlu2 %v3745_v34, %s3255_s8 }
 0x1f5   : > { %1201 = vrot.lane.b32.xlu0 %v3820_v13, %s3254_s7  ;;  %1029 = vrot.lane.b32.xlu1 %v3999_v50, %s3252_s30 }
 0x1f6   : > { %v958_v40 = vpop.permute.xlu2 %957 }
 0x1f7   : > { %v880_v18 = vpop.permute.xlu1 %879  ;;  %v950_v52 = vpop.permute.xlu0 %949 }
 0x1f8   : > { %v1279_v28 = vsel %vm1276_vm7, %v3914_v57, %v880_v18  ;;  %v1299_v1 = vsel %vm1293_vm8, %v4048_v36, %v950_v52 }
 0x1f9   : > { %v1296_v46 = vsel %vm1293_vm8, %v1279_v28, %v944_v20  ;;  %v1269_v20 = vsel %vm1259_vm5, %v3869_v49, %v830_v5 }
 0x1fc   : > { %1093 = vrot.lane.b32.xlu2 %v4093_v6, %s3251_s29 }
 0x1fd   : > { %1157 = vrot.lane.b32.xlu0 %v3798_v29, %s3255_s8  ;;  %1087 = vrot.lane.b32.xlu1 %v598_v43, %s3251_s29 }
 0x1fe   : > { %v4100_v34 = vpop.permute.xlu2 %1077 }
 0x1ff   : > { %v836_v13 = vpop.permute.xlu1 %835  ;;  %v1008_v11 = vpop.permute.xlu0 %1007 }
 0x204   : > { %1151 = vrot.lane.b32.xlu2 %v3779_v24, %s3255_s8 }
 0x205   : > { %1221 = vrot.lane.b32.xlu0 %v4102_v35, %s3254_s7  ;;  %1207 = vrot.lane.b32.xlu1 %v721_v7, %s3254_s7 }
 0x206   : > { %v1136_v15 = vpop.permute.xlu2 %1135 }
 0x207   : > { %v894_v32 = vpop.permute.xlu1 %893  ;;  %v964_v61 = vpop.permute.xlu0 %963 }
 0x208   : > { %v1286_v12 = vsel %vm1276_vm7, %v1269_v20, %v894_v32 }
 0x209   : > { %v1303_v33 = vsel %vm1293_vm8, %v1286_v12, %v958_v40 }
 0x20c   : > { %1215 = vrot.lane.b32.xlu2 %v3907_v22, %s3254_s7 }
 0x20d   : > { %839 = vrot.lane.b32.xlu0 %v3999_v50, %s3249_s27  ;;  %825 = vrot.lane.b32.xlu1 %v4003_v51, %s3249_s27  ;;  %v1313_v51 = vsel %vm1310_vm9, %v1296_v46, %v1008_v11  ;;  %v706_v11 = vld [vmem:[#allocation2 + $0x91] sm:$0xff] }
 0x20e   : > { %v1092_v47 = vpop.permute.xlu2 %1091 }
 0x20f   : > { %v1014_v14 = vpop.permute.xlu1 %1013  ;;  %v1022_v54 = vpop.permute.xlu0 %1021 }
 0x210   : > { %v1320_v49 = vsel %vm1310_vm9, %v1303_v33, %v1022_v54  ;;  %v1316_v39 = vsel %vm1310_vm9, %v1299_v1, %v1014_v14  ;;  %v722_v14 = vld [vmem:[#allocation2 + $0x92] sm:$0xff] }
 0x211   : > { %v1333_v36 = vsel %vm1327_vm10, %v1316_v39, %v4100_v34  ;;  %v713_v34 = vld [vmem:[#allocation2 + $0x121] sm:$0xff] }
 0x214   : > { %833 = vrot.lane.b32.xlu2 %v4013_v0, %s3249_s27 }
 0x215   : > { %903 = vrot.lane.b32.xlu0 %v4093_v6, %s3250_s28  ;;  %889 = vrot.lane.b32.xlu1 %v689_v25, %s3250_s28 }
 0x216   : > { %v1150_v45 = vpop.permute.xlu2 %1149 }
 0x217   : > { %v1072_v16 = vpop.permute.xlu1 %1071  ;;  %v1142_v50 = vpop.permute.xlu0 %1141 }
 0x218   : > { %v1330_v48 = vsel %vm1327_vm10, %v1313_v51, %v1072_v16  ;;  %v1350_v40 = vsel %vm1344_vm11, %v1333_v36, %v1142_v50  ;;  %v729_v50 = vld [vmem:[#allocation2 + $0x122] sm:$0xff]  ;;  %v730_v51 = vld [vmem:[#allocation2 + $0x132] sm:$0xff] }
 0x219   : > { %v1347_v57 = vsel %vm1344_vm11, %v1330_v48, %v1136_v15 }
 0x21c   : > { %897 = vrot.lane.b32.xlu2 %v598_v43, %s3250_s28 }
 0x21d   : > { %967 = vrot.lane.b32.xlu0 %v3798_v29, %s3253_s6  ;;  %953 = vrot.lane.b32.xlu1 %v705_v26, %s3253_s6  ;;  %v1255_v29 = vsel %vm569_vm4, %v598_v43, %v3891_v21 }
 0x21e   : > { %v1214_v0 = vpop.permute.xlu2 %1213  ;;  %v1272_v60 = vsel %vm1259_vm5, %v1255_v29, %v836_v13 }
 0x21f   : > { %v1028_v27 = vpop.permute.xlu1 %1027  ;;  %v1200_v42 = vpop.permute.xlu0 %1199 }
 0x220   : > { %v1364_v38 = vsel %vm1361_vm12, %v1347_v57, %v1200_v42  ;;  %v698_v42 = vld [vmem:[#allocation2 + $0x130] sm:$0xff] }
 0x221   : > { %3085 = vmatmul.msk.f32.gmra.mxu0 %vm1383_vm13, %v1364_v38 }
 0x224   : > { %961 = vrot.lane.b32.xlu2 %v3779_v24, %s3253_s6  ;;  %v1289_v24 = vsel %vm1276_vm7, %v1272_v60, %v4082_v31  ;;  %v697_v31 = vld [vmem:[#allocation2 + $0x120] sm:$0xff] }
 0x225   : > { %1031 = vrot.lane.b32.xlu0 %v4102_v35, %s3252_s30  ;;  %1017 = vrot.lane.b32.xlu1 %v721_v7, %s3252_s30  ;;  %v1306_v26 = vsel %vm1293_vm8, %v1289_v24, %v964_v61 }
 0x226   : > { %v888_v58 = vpop.permute.xlu2 %887  ;;  %v1323_v2 = vsel %vm1310_vm9, %v1306_v26, %v1028_v27  ;;  %v714_v27 = vld [vmem:[#allocation2 + $0x131] sm:$0xff] }
 0x227   : > { %v1086_v56 = vpop.permute.xlu1 %1085  ;;  %v1156_v41 = vpop.permute.xlu0 %1155  ;;  %v1340_v5 = vsel %vm1327_vm10, %v1323_v2, %v1092_v47 }
 0x228   : > { %v1337_v25 = vsel %vm1327_vm10, %v1320_v49, %v1086_v56  ;;  %v1357_v18 = vsel %vm1344_vm11, %v1340_v5, %v1156_v41 }
 0x229   : > { %v1354_v21 = vsel %vm1344_vm11, %v1337_v25, %v1150_v45 }
 0x22a   : > { %v1371_v30 = vsel %vm1361_vm12, %v1354_v21, %v1214_v0 }
 0x22b   : > { %3092 = vmatmul.msk.f32.gmra.mxu2 %vm1383_vm13, %v1371_v30 }
 0x22c   : > { %1025 = vrot.lane.b32.xlu2 %v3907_v22, %s3252_s30 }
 0x22d   : > { %1081 = vrot.lane.b32.xlu1 %v690_v19, %s3251_s29  ;;  %1095 = vrot.lane.b32.xlu0 %v697_v31, %s3251_s29  ;;  %v1256_v19 = vsel %vm569_vm4, %v3916_v59, %v3930_v63 }
 0x22e   : > { %v946_v4 = vpop.permute.xlu2 %945 }
 0x22f   : > { %v1206_v52 = vpop.permute.xlu1 %1205  ;;  %v1220_v43 = vpop.permute.xlu0 %1219 }
 0x230   : > { %v1367_v13 = vsel %vm1361_vm12, %v1350_v40, %v1206_v52  ;;  %v1374_v22 = vsel %vm1361_vm12, %v1357_v18, %v1220_v43 }
 0x231   : > { %3088 = vmatmul.msk.f32.gmra.mxu1 %vm1383_vm13, %v1367_v13  ;;  %3095 = vmatmul.msk.f32.vlgmr.msra.gmra.mxu3 %vm1383_vm13, %v1374_v22 }
 0x234   : > { %1089 = vrot.lane.b32.xlu2 %v3916_v59, %s3251_s29 }
 0x235   : > { %1145 = vrot.lane.b32.xlu1 %v706_v11, %s3255_s8  ;;  %1159 = vrot.lane.b32.xlu0 %v713_v34, %s3255_s8 }
 0x236   : > { %v4173_v7 = vpop.permute.xlu2 %901 }
 0x237   : > { %v824_v15 = vpop.permute.xlu1 %823  ;;  %v832_v32 = vpop.permute.xlu0 %831 }
 0x238   : > { %v1266_v61 = vsel %vm1259_vm5, %v3849_v44, %v824_v15  ;;  %v1270_v26 = vsel %vm1259_vm5, %v3903_v55, %v832_v32 }
 0x239   : > { %v1283_v47 = vsel %vm1276_vm7, %v1266_v61, %v888_v58 }
 0x23c   : > { %1153 = vrot.lane.b32.xlu2 %v3793_v3, %s3255_s8 }
 0x23d   : > { %1209 = vrot.lane.b32.xlu1 %v722_v14, %s3254_s7  ;;  %841 = vrot.lane.b32.xlu0 %v4102_v35, %s3249_s27 }
 0x23e   : > { %v960_v54 = vpop.permute.xlu2 %959 }
 0x23f   : > { %v882_v45 = vpop.permute.xlu1 %881  ;;  %v1453_v28 = vpop.f32.mrf.mxu0 }
 0x240   : > { %1503 = vst.msk [vmem:[#allocation4] sm:$0xff] %vm1259_vm5, %v1453_v28  ;;  %v952_v16 = vpop.permute.xlu0 %951  ;;  %v1280_v60 = vsel %vm1276_vm7, %v3960_v8, %v882_v45 }
 0x241   : > { %v1297_v58 = vsel %vm1293_vm8, %v1280_v60, %v946_v4  ;;  %v1300_v52 = vsel %vm1293_vm8, %v1283_v47, %v952_v16 }
 0x244   : > { %1223 = vrot.lane.b32.xlu2 %v729_v50, %s3254_s7 }
 0x245   : > { %1217 = vrot.lane.b32.xlu1 %v3977_v37, %s3254_s7  ;;  %1033 = vrot.lane.b32.xlu0 %v729_v50, %s3252_s30 }
 0x246   : > { %v1080_v3 = vpop.permute.xlu2 %1079 }
 0x247   : > { %v838_v44 = vpop.permute.xlu1 %837 }
 0x248   : > { %v1010_v46 = vpop.permute.xlu0 %1009  ;;  %v1273_v36 = vsel %vm1259_vm5, %v1256_v19, %v838_v44 }
 0x249   : > { %v1314_v49 = vsel %vm1310_vm9, %v1297_v58, %v1010_v46  ;;  %v1290_v59 = vsel %vm1276_vm7, %v1273_v36, %v4173_v7 }
 0x24c   : > { %969 = vrot.lane.b32.xlu2 %v713_v34, %s3253_s6 }
 0x24d   : > { %905 = vrot.lane.b32.xlu1 %v697_v31, %s3250_s28  ;;  %1225 = vrot.lane.b32.xlu0 %v730_v51, %s3254_s7 }
 0x24e   : > { %v1138_v35 = vpop.permute.xlu2 %1137 }
 0x24f   : > { %v896_v48 = vpop.permute.xlu1 %895 }
 0x250   : > { %v966_v0 = vpop.permute.xlu0 %965  ;;  %v1287_v8 = vsel %vm1276_vm7, %v1270_v26, %v896_v48 }
 0x251   : > { %v1304_v39 = vsel %vm1293_vm8, %v1287_v8, %v960_v54  ;;  %v1307_v43 = vsel %vm1293_vm8, %v1290_v59, %v966_v0  ;;  %v1258_v59 = vsel %vm569_vm4, %v4093_v6, %v3900_v23 }
 0x254   : > { %1161 = vrot.lane.b32.xlu2 %v714_v27, %s3255_s8 }
 0x255   : > { %1097 = vrot.lane.b32.xlu1 %v698_v42, %s3251_s29 }
 0x256   : > { %v1094_v37 = vpop.permute.xlu2 %1093 }
 0x257   : > { %v1016_v57 = vpop.permute.xlu1 %1015 }
 0x258   : > { %v1024_v38 = vpop.permute.xlu0 %1023  ;;  %v1317_v13 = vsel %vm1310_vm9, %v1300_v52, %v1016_v57 }
 0x259   : > { %v1321_v55 = vsel %vm1310_vm9, %v1304_v39, %v1024_v38  ;;  %v1334_v11 = vsel %vm1327_vm10, %v1317_v13, %v1080_v3  ;;  %v1254_v39 = vsel %vm569_vm4, %v3987_v17, %v3925_v62 }
 0x25e   : > { %v1456_v20 = vpop.f32.mrf.mxu0  ;;  %v1152_v12 = vpop.permute.xlu2 %1151 }
 0x25f   : > { %1504 = vst.msk [vmem:[#allocation4 + $0x8] sm:$0xff] %vm1259_vm5, %v1456_v20  ;;  %v1074_v29 = vpop.permute.xlu1 %1073 }
 0x260   : > { %v1144_v33 = vpop.permute.xlu0 %1143  ;;  %v1331_v56 = vsel %vm1327_vm10, %v1314_v49, %v1074_v29  ;;  %v1250_v49 = vsel %vm569_vm4, %v3965_v10, %v3893_v53 }
 0x261   : > { %v1348_v21 = vsel %vm1344_vm11, %v1331_v56, %v1138_v35  ;;  %v1351_v34 = vsel %vm1344_vm11, %v1334_v11, %v1144_v33 }
 0x266   : > { %v1216_v41 = vpop.permute.xlu2 %1215 }
 0x267   : > { %v1030_v25 = vpop.permute.xlu1 %1029 }
 0x268   : > { %v1202_v24 = vpop.permute.xlu0 %1201  ;;  %v1324_v22 = vsel %vm1310_vm9, %v1307_v43, %v1030_v25 }
 0x269   : > { %v1365_v1 = vsel %vm1361_vm12, %v1348_v21, %v1202_v24  ;;  %v1341_v15 = vsel %vm1327_vm10, %v1324_v22, %v1094_v37 }
 0x26a   : > { %3086 = vmatmul.msk.f32.gmra.mxu0 %vm1383_vm13, %v1365_v1 }
 0x26c   : > { %v1477_v30 = vpop.f32.mrf.mxu2 }
 0x26d   : > { %1511 = vst.msk [vmem:[#allocation4 + $0x40] sm:$0xff] %vm1259_vm5, %v1477_v30 }
 0x26e   : > { %v1465_v2 = vpop.f32.mrf.mxu1  ;;  %v4210_v31 = vpop.permute.xlu2 %833 }
 0x26f   : > { %1507 = vst.msk [vmem:[#allocation4 + $0x20] sm:$0xff] %vm1259_vm5, %v1465_v2  ;;  %v1088_v5 = vpop.permute.xlu1 %1087  ;;  %v1271_v2 = vsel %vm1259_vm5, %v1254_v39, %v4210_v31 }
 0x270   : > { %v1338_v4 = vsel %vm1327_vm10, %v1321_v55, %v1088_v5  ;;  %v1158_v40 = vpop.permute.xlu0 %1157 }
 0x271   : > { %v1355_v18 = vsel %vm1344_vm11, %v1338_v4, %v1152_v12  ;;  %v1358_v7 = vsel %vm1344_vm11, %v1341_v15, %v1158_v40 }
 0x272   : > { %v1372_v63 = vsel %vm1361_vm12, %v1355_v18, %v1216_v41 }
 0x273   : > { %3093 = vmatmul.msk.f32.gmra.mxu2 %vm1383_vm13, %v1372_v63 }
 0x276   : > { %v898_v32 = vpop.permute.xlu2 %897 }
 0x277   : > { %v1208_v61 = vpop.permute.xlu1 %1207  ;;  %v1288_v36 = vsel %vm1276_vm7, %v1271_v2, %v898_v32 }
 0x278   : > { %v1222_v47 = vpop.permute.xlu0 %1221  ;;  %v1368_v14 = vsel %vm1361_vm12, %v1351_v34, %v1208_v61 }
 0x279   : > { %3089 = vmatmul.msk.f32.gmra.mxu1 %vm1383_vm13, %v1368_v14  ;;  %v1375_v54 = vsel %vm1361_vm12, %v1358_v7, %v1222_v47 }
 0x27a   : > { %3096 = vmatmul.msk.f32.gmra.mxu3 %vm1383_vm13, %v1375_v54 }
 0x27e   : > { %v962_v16 = vpop.permute.xlu2 %961 }
 0x27f   : > { %v826_v45 = vpop.permute.xlu1 %825  ;;  %v1305_v55 = vsel %vm1293_vm8, %v1288_v36, %v962_v16  ;;  %v4286_v16 = vld [vmem:[#allocation4] sm:$0xff] }
 0x280   : > { %v840_v28 = vpop.permute.xlu0 %839  ;;  %v1267_v25 = vsel %vm1259_vm5, %v1250_v49, %v826_v45 }
 0x281   : > { %v1274_v38 = vsel %vm1259_vm5, %v3957_v9, %v840_v28  ;;  %v4284_v28 = vld [vmem:[#allocation4 + $0x8] sm:$0xff] }
 0x286   : > { %v1026_v44 = vpop.permute.xlu2 %1025 }
 0x287   : > { %v890_v50 = vpop.permute.xlu1 %889  ;;  %v1322_v4 = vsel %vm1310_vm9, %v1305_v55, %v1026_v44 }
 0x288   : > { %v904_v3 = vpop.permute.xlu0 %903  ;;  %v1284_v24 = vsel %vm1276_vm7, %v1267_v25, %v890_v50  ;;  %v4315_v25 = vld [vmem:[#allocation4 + $0x40] sm:$0xff] }
 0x289   : > { %v1291_v20 = vsel %vm1276_vm7, %v1274_v38, %v904_v3  ;;  %v1539_v3 = vsel %vm1259_vm5, %v4284_v28, 0.0 }
 0x28e   : > { %v1090_v35 = vpop.permute.xlu2 %1089 }
 0x28f   : > { %v954_v46 = vpop.permute.xlu1 %953  ;;  %v1339_v18 = vsel %vm1327_vm10, %v1322_v4, %v1090_v35 }
 0x290   : > { %v968_v51 = vpop.permute.xlu0 %967  ;;  %v1301_v21 = vsel %vm1293_vm8, %v1284_v24, %v954_v46  ;;  %v1538_v46 = vsel %vm1259_vm5, %v4286_v16, 0.0 }
 0x291   : > { %v1308_v12 = vsel %vm1293_vm8, %v1291_v20, %v968_v51  ;;  %v1540_v35 = vadd.f32 %v1539_v3, %v1538_v46 }
 0x296   : > { %v1154_v42 = vpop.permute.xlu2 %1153 }
 0x297   : > { %v1018_v48 = vpop.permute.xlu1 %1017  ;;  %v1356_v52 = vsel %vm1344_vm11, %v1339_v18, %v1154_v42 }
 0x298   : > { %v1032_v0 = vpop.permute.xlu0 %1031  ;;  %v1318_v1 = vsel %vm1310_vm9, %v1301_v21, %v1018_v48  ;;  %v1553_v21 = vsel %vm1259_vm5, %v4315_v25, 0.0 }
 0x299   : > { %v1325_v29 = vsel %vm1310_vm9, %v1308_v12, %v1032_v0 }
 0x29e   : > { %v1459_v27 = vpop.f32.mrf.mxu0  ;;  %v1224_v56 = vpop.permute.xlu2 %1223 }
 0x29f   : > { %1505 = vst.msk [vmem:[#allocation4 + $0x10] sm:$0xff] %vm1259_vm5, %v1459_v27  ;;  %v1082_v37 = vpop.permute.xlu1 %1081 }
 0x2a0   : > { %v1096_v57 = vpop.permute.xlu0 %1095  ;;  %v1335_v26 = vsel %vm1327_vm10, %v1318_v1, %v1082_v37  ;;  %v4301_v37 = vld [vmem:[#allocation4 + $0x20] sm:$0xff] }
 0x2a1   : > { %v1342_v33 = vsel %vm1327_vm10, %v1325_v29, %v1096_v57  ;;  %v1545_v38 = vsel %vm1259_vm5, %v4301_v37, 0.0 }
 0x2a6   : > { %v970_v31 = vpop.permute.xlu2 %969  ;;  %v4288_v50 = vld [vmem:[#allocation4 + $0x10] sm:$0xff] }
 0x2a7   : > { %v1146_v60 = vpop.permute.xlu1 %1145  ;;  %v1541_v51 = vsel %vm1259_vm5, %v4288_v50, 0.0 }
 0x2a8   : > { %v1160_v58 = vpop.permute.xlu0 %1159  ;;  %v1352_v53 = vsel %vm1344_vm11, %v1335_v26, %v1146_v60  ;;  %v1542_v0 = vadd.f32 %v1541_v51, %v1540_v35 }
 0x2a9   : > { %v1359_v41 = vsel %vm1344_vm11, %v1342_v33, %v1160_v58 }
 0x2aa   : > { %v1376_v9 = vsel %vm1361_vm12, %v1359_v41, %v1224_v56 }
 0x2ab   : > { %3097 = vmatmul.msk.f32.gmra.mxu3 %vm1383_vm13, %v1376_v9 }
 0x2ae   : > { %v1468_v8 = vpop.f32.mrf.mxu1  ;;  %v1480_v30 = vpop.f32.mrf.mxu2 }
 0x2af   : > { %1508 = vst.msk [vmem:[#allocation4 + $0x28] sm:$0xff] %vm1259_vm5, %v1468_v8  ;;  %v1210_v10 = vpop.permute.xlu1 %1209  ;;  %v1162_v34 = vpop.permute.xlu2 %1161 }
 0x2b0   : > { %1512 = vst.msk [vmem:[#allocation4 + $0x48] sm:$0xff] %vm1259_vm5, %v1480_v30  ;;  %v1369_v19 = vsel %vm1361_vm12, %v1352_v53, %v1210_v10  ;;  %v842_v40 = vpop.permute.xlu0 %841 }
 0x2b1   : > { %3090 = vmatmul.msk.f32.gmra.mxu1 %vm1383_vm13, %v1369_v19  ;;  %v1275_v13 = vsel %vm1259_vm5, %v1258_v59, %v842_v40 }
 0x2b4   : > { %v1489_v5 = vpop.f32.mrf.mxu3 }
 0x2b5   : > { %1515 = vst.msk [vmem:[#allocation4 + $0x60] sm:$0xff] %vm1259_vm5, %v1489_v5  ;;  %v3256_v5 = vmov 128.0  }
 0x2b6   : > { %v1527_v20 = vld [vmem:[#allocation4 + $0x28] sm:$0xff]  ;;  %3210 = vrcp.f32 %v3256_v5 }
 0x2b7   : > { %v1218_v62 = vpop.permute.xlu1 %1217  ;;  %v1547_v60 = vsel %vm1259_vm5, %v1527_v20, 0.0  ;;  %v4320_v1 = vld [vmem:[#allocation4 + $0x48] sm:$0xff] }
 0x2b8   : > { %v1373_v17 = vsel %vm1361_vm12, %v1356_v52, %v1218_v62  ;;  %v1034_v63 = vpop.permute.xlu0 %1033  ;;  %v1555_v8 = vsel %vm1259_vm5, %v4320_v1, 0.0 }
 0x2b9   : > { %3094 = vmatmul.msk.f32.gmra.mxu2 %vm1383_vm13, %v1373_v17 }
 0x2bc   : > { %v4332_v36 = vld [vmem:[#allocation4 + $0x60] sm:$0xff]  ;;  %v3211_v62 = vpop.eup %3210 }
 0x2bd   : > { %v1561_v4 = vsel %vm1259_vm5, %v4332_v36, 0.0  ;;  %vm1581_vm14 = vweird.f32 %v3211_v62 }
 0x2bf   : > { %v906_v43 = vpop.permute.xlu1 %905 }
 0x2c0   : > { %v1292_v22 = vsel %vm1276_vm7, %v1275_v13, %v906_v43  ;;  %v1226_v61 = vpop.permute.xlu0 %1225 }
 0x2c1   : > { %v1309_v11 = vsel %vm1293_vm8, %v1292_v22, %v970_v31 }
 0x2c2   : > { %v1326_v32 = vsel %vm1310_vm9, %v1309_v11, %v1034_v63  ;;  %v1577_v63 = vmul.f32 128.0, %v3211_v62 }
 0x2c7   : > { %v1098_v15 = vpop.permute.xlu1 %1097 }
 0x2c8   : > { %v1343_v7 = vsel %vm1327_vm10, %v1326_v32, %v1098_v15 }
 0x2c9   : > { %v1360_v47 = vsel %vm1344_vm11, %v1343_v7, %v1162_v34  ;;  %v1578_v34 = vsub.f32 1.0, %v1577_v63 }
 0x2ca   : > { %v1377_v14 = vsel %vm1361_vm12, %v1360_v47, %v1226_v61 }
 0x2cb   : > { %3098 = vmatmul.msk.f32.gmra.mxu3 %vm1383_vm13, %v1377_v14  ;;  %v1579_v61 = vmul.f32 %v3211_v62, %v1578_v34 }
 0x2cd   : > { %v1580_v14 = vadd.f32 %v3211_v62, %v1579_v61 }
 0x2e7   : > { %v1462_v23 = vpop.f32.mrf.mxu0 }
 0x2e8   : > { %1506 = vst.msk [vmem:[#allocation4 + $0x18] sm:$0xff] %vm1259_vm5, %v1462_v23 }
 0x2ef   : > { %v4292_v44 = vld [vmem:[#allocation4 + $0x18] sm:$0xff] }
 0x2f0   : > { %v1543_v48 = vsel %vm1259_vm5, %v4292_v44, 0.0 }
 0x2f1   : > { %v1544_v57 = vadd.f32 %v1543_v48, %v1542_v0 }
 0x2f3   : > { %v1546_v12 = vadd.f32 %v1545_v38, %v1544_v57 }
 0x2f5   : > { %v1548_v49 = vadd.f32 %v1547_v60, %v1546_v12 }
 0x2f6   : > { %v1471_v6 = vpop.f32.mrf.mxu1  ;;  %v1483_v54 = vpop.f32.mrf.mxu2 }
 0x2f7   : > { %1509 = vst.msk [vmem:[#allocation4 + $0x30] sm:$0xff] %vm1259_vm5, %v1471_v6 }
 0x2f8   : > { %1513 = vst.msk [vmem:[#allocation4 + $0x50] sm:$0xff] %vm1259_vm5, %v1483_v54  ;;  %v4349_v54 = vsel %vm1581_vm14, %v3211_v62, %v1580_v14 }
 0x2fd   : > { %v1492_v45 = vpop.f32.mrf.mxu3 }
 0x2fe   : > { %1516 = vst.msk [vmem:[#allocation4 + $0x68] sm:$0xff] %vm1259_vm5, %v1492_v45  ;;  %v4306_v29 = vld [vmem:[#allocation4 + $0x30] sm:$0xff] }
 0x2ff   : > { %v1549_v33 = vsel %vm1259_vm5, %v4306_v29, 0.0  ;;  %v4324_v30 = vld [vmem:[#allocation4 + $0x50] sm:$0xff] }
 0x300   : > { %v1550_v41 = vadd.f32 %v1549_v33, %v1548_v49  ;;  %v1557_v19 = vsel %vm1259_vm5, %v4324_v30, 0.0 }
 0x305   : > { %v4336_v40 = vld [vmem:[#allocation4 + $0x68] sm:$0xff] }
 0x306   : > { %v1563_v17 = vsel %vm1259_vm5, %v4336_v40, 0.0 }
 0x32e   : > { %v1495_v27 = vpop.f32.mrf.mxu3  ;;  %v1474_v42 = vpop.f32.mrf.mxu1 }
 0x32f   : > { %1517 = vst.msk [vmem:[#allocation4 + $0x70] sm:$0xff] %vm1259_vm5, %v1495_v27 }
 0x330   : > { %1510 = vst.msk [vmem:[#allocation4 + $0x38] sm:$0xff] %vm1259_vm5, %v1474_v42 }
 0x336   : > { %v4341_v31 = vld [vmem:[#allocation4 + $0x70] sm:$0xff] }
 0x337   : > { %v4311_v58 = vld [vmem:[#allocation4 + $0x38] sm:$0xff]  ;;  %v1565_v43 = vsel %vm1259_vm5, %v4341_v31, 0.0 }
 0x338   : > { %v1551_v56 = vsel %vm1259_vm5, %v4311_v58, 0.0 }
 0x339   : > { %v1552_v9 = vadd.f32 %v1551_v56, %v1550_v41 }
 0x33b   : > { %v1554_v26 = vadd.f32 %v1553_v21, %v1552_v9 }
 0x33c   : > { %v1486_v24 = vpop.f32.mrf.mxu2 }
 0x33d   : > { %1514 = vst.msk [vmem:[#allocation4 + $0x58] sm:$0xff] %vm1259_vm5, %v1486_v24  ;;  %v1556_v10 = vadd.f32 %v1555_v8, %v1554_v26 }
 0x33f   : > { %v1558_v2 = vadd.f32 %v1557_v19, %v1556_v10 }
 0x344   : > { %v4326_v53 = vld [vmem:[#allocation4 + $0x58] sm:$0xff] }
 0x345   : > { %v1559_v39 = vsel %vm1259_vm5, %v4326_v53, 0.0 }
 0x346   : > { %v1560_v55 = vadd.f32 %v1559_v39, %v1558_v2 }
 0x348   : > { %v1562_v18 = vadd.f32 %v1561_v4, %v1560_v55 }
 0x34a   : > { %v1564_v59 = vadd.f32 %v1563_v17, %v1562_v18 }
 0x34c   : > { %v1566_v22 = vadd.f32 %v1565_v43, %v1564_v59 }
 0x34e   : > { %v1498_v52 = vpop.f32.mrf.mxu3 }
 0x34f   : > { %1518 = vst.msk [vmem:[#allocation4 + $0x78] sm:$0xff] %vm1259_vm5, %v1498_v52 }
 0x356   : > { %v4345_v13 = vld [vmem:[#allocation4 + $0x78] sm:$0xff] }
 0x357   : > { %v1567_v11 = vsel %vm1259_vm5, %v4345_v13, 0.0 }
 0x358   : > { %v1568_v15 = vadd.f32 %v1567_v11, %v1566_v22 }
 0x35a   : > { %v1569_v32 = vrot.slane %v1568_v15, 4 }
 0x35c   : > { %v1570_v7 = vadd.f32 %v1569_v32, %v1568_v15 }
 0x35e   : > { %v1571_v47 = vrot.slane %v1570_v7, 2 }
 0x360   : > { %v1572_v23 = vadd.f32 %v1571_v47, %v1570_v7 }
 0x362   : > { %v1573_v6 = vrot.slane %v1572_v23, 1 }
 0x364   : > { %v1574_v45 = vadd.f32 %v1573_v6, %v1572_v23 }
 0x366   : > { %v4352_v3 = vmul.f32 %v4349_v54, %v1574_v45 }
 0x368   : > { %v1584_v46 = vsub.f32 %v4286_v16, %v4352_v3  ;;  %v1585_v51 = vsub.f32 %v4284_v28, %v4352_v3  ;;  %v1586_v35 = vsub.f32 %v4288_v50, %v4352_v3  ;;  %v1587_v48 = vsub.f32 %v4292_v44, %v4352_v3 }
 0x369   : > { %v1588_v42 = vsub.f32 %v4301_v37, %v4352_v3  ;;  %v1589_v38 = vsub.f32 %v1527_v20, %v4352_v3  ;;  %v1590_v50 = vsub.f32 %v4306_v29, %v4352_v3  ;;  %v1591_v56 = vsub.f32 %v4311_v58, %v4352_v3 }
 0x36a   : > { %v1600_v0 = vmul.f32 %v1584_v46, %v1584_v46  ;;  %v1601_v27 = vmul.f32 %v1585_v51, %v1585_v51  ;;  %v1602_v57 = vmul.f32 %v1586_v35, %v1586_v35  ;;  %v1603_v12 = vmul.f32 %v1587_v48, %v1587_v48 }
 0x36b   : > { %v1604_v33 = vmul.f32 %v1588_v42, %v1588_v42  ;;  %v1605_v37 = vmul.f32 %v1589_v38, %v1589_v38  ;;  %v1592_v9 = vsub.f32 %v4315_v25, %v4352_v3  ;;  %v1606_v24 = vmul.f32 %v1590_v50, %v1590_v50 }
 0x36c   : > { %v1616_v16 = vsel %vm1259_vm5, %v1600_v0, 0.0  ;;  %v1617_v60 = vsel %vm1259_vm5, %v1601_v27, 0.0  ;;  %v1619_v44 = vsel %vm1259_vm5, %v1602_v57, 0.0  ;;  %v1621_v41 = vsel %vm1259_vm5, %v1603_v12, 0.0 }
 0x36d   : > { %v1618_v28 = vadd.f32 %v1617_v60, %v1616_v16  ;;  %v1623_v21 = vsel %vm1259_vm5, %v1604_v33, 0.0  ;;  %v1593_v29 = vsub.f32 %v4320_v1, %v4352_v3  ;;  %v1607_v8 = vmul.f32 %v1591_v56, %v1591_v56  ;;  %v1655_v33 = vld [vmem:[%s5213_s3] sm:$0x1] }
 0x36e   : > { %v1625_v10 = vsel %vm1259_vm5, %v1605_v37, 0.0  ;;  %v1594_v58 = vsub.f32 %v4324_v30, %v4352_v3  ;;  %v1608_v39 = vmul.f32 %v1592_v9, %v1592_v9  ;;  %v1627_v2 = vsel %vm1259_vm5, %v1606_v24, 0.0 }
 0x36f   : > { %v1620_v49 = vadd.f32 %v1619_v44, %v1618_v28  ;;  %v1595_v25 = vsub.f32 %v4326_v53, %v4352_v3  ;;  %v1609_v5 = vmul.f32 %v1593_v29, %v1593_v29  ;;  %v1629_v4 = vsel %vm1259_vm5, %v1607_v8, 0.0 }
 0x370   : > { %v1596_v1 = vsub.f32 %v4332_v36, %v4352_v3  ;;  %v1610_v52 = vmul.f32 %v1594_v58, %v1594_v58  ;;  %v1631_v62 = vsel %vm1259_vm5, %v1608_v39, 0.0  ;;  %v1597_v30 = vsub.f32 %v4336_v40, %v4352_v3 }
 0x371   : > { %v1622_v20 = vadd.f32 %v1621_v41, %v1620_v49  ;;  %v1611_v59 = vmul.f32 %v1595_v25, %v1595_v25  ;;  %v1633_v63 = vsel %vm1259_vm5, %v1609_v5, 0.0  ;;  %v1598_v53 = vsub.f32 %v4341_v31, %v4352_v3 }
 0x372   : > { %v1612_v22 = vmul.f32 %v1596_v1, %v1596_v1  ;;  %v1635_v11 = vsel %vm1259_vm5, %v1610_v52, 0.0  ;;  %v1599_v36 = vsub.f32 %v4345_v13, %v4352_v3  ;;  %v1613_v15 = vmul.f32 %v1597_v30, %v1597_v30 }
 0x373   : > { %v1624_v26 = vadd.f32 %v1623_v21, %v1622_v20  ;;  %v1637_v32 = vsel %vm1259_vm5, %v1611_v59, 0.0  ;;  %v1614_v7 = vmul.f32 %v1598_v53, %v1598_v53 }
 0x374   : > { %v1639_v40 = vsel %vm1259_vm5, %v1612_v22, 0.0  ;;  %v1615_v14 = vmul.f32 %v1599_v36, %v1599_v36  ;;  %v1641_v23 = vsel %vm1259_vm5, %v1613_v15, 0.0 }
 0x375   : > { %v1626_v19 = vadd.f32 %v1625_v10, %v1624_v26  ;;  %v1643_v31 = vsel %vm1259_vm5, %v1614_v7, 0.0 }
 0x376   : > { %v1645_v46 = vsel %vm1259_vm5, %v1615_v14, 0.0 }
 0x377   : > { %v1628_v55 = vadd.f32 %v1627_v2, %v1626_v19 }
 0x379   : > { %v1630_v18 = vadd.f32 %v1629_v4, %v1628_v55 }
 0x37b   : > { %v1632_v17 = vadd.f32 %v1631_v62, %v1630_v18 }
 0x37d   : > { %v1634_v43 = vadd.f32 %v1633_v63, %v1632_v17 }
 0x37f   : > { %v1636_v34 = vadd.f32 %v1635_v11, %v1634_v43 }
 0x381   : > { %v1638_v61 = vadd.f32 %v1637_v32, %v1636_v34 }
 0x383   : > { %v1640_v47 = vadd.f32 %v1639_v40, %v1638_v61 }
 0x385   : > { %v1642_v6 = vadd.f32 %v1641_v23, %v1640_v47 }
 0x387   : > { %v1644_v45 = vadd.f32 %v1643_v31, %v1642_v6 }
 0x389   : > { %v1646_v51 = vadd.f32 %v1645_v46, %v1644_v45 }
 0x38b   : > { %v1647_v35 = vrot.slane %v1646_v51, 4 }
 0x38d   : > { %v1648_v13 = vadd.f32 %v1647_v35, %v1646_v51 }
 0x38f   : > { %v1649_v48 = vrot.slane %v1648_v13, 2 }
 0x391   : > { %v1650_v0 = vadd.f32 %v1649_v48, %v1648_v13 }
 0x393   : > { %v1651_v27 = vrot.slane %v1650_v0, 1 }
 0x395   : > { %v1652_v42 = vadd.f32 %v1651_v27, %v1650_v0 }
 0x397   : > { %v1654_v57 = vmul.f32 %v1652_v42, %v4349_v54  ;;  %v1668_v54 = vld [vmem:[%s5213_s3 + $0x1] sm:$0x1] }
 0x399   : > { %v1656_v38 = vadd.f32 1e-05, %v1654_v57 }
 0x39b   : > { %3212 = vrsqrt.f32 %v1656_v38  ;;  %vm1663_vm0 = vweird.f32 %v1656_v38 }
 0x3a1   : > { %v3213_v12 = vpop.eup %3212 }
 0x3a2   : > { %v1658_v16 = vmul.f32 %v3213_v12, %v1656_v38  ;;  %vm1664_vm15 = vweird.f32 %v3213_v12 }
 0x3a3   : > { %vm1665_vm1 = vmor %vm1663_vm0, %vm1664_vm15 }
 0x3a4   : > { %v1659_v60 = vmul.f32 %v3213_v12, %v1658_v16 }
 0x3a6   : > { %v1660_v28 = vmul.f32 0.5, %v1659_v60 }
 0x3a8   : > { %v1661_v50 = vsub.f32 1.5, %v1660_v28 }
 0x3aa   : > { %v1662_v44 = vmul.f32 %v3213_v12, %v1661_v50 }
 0x3ac   : > { %v1666_v49 = vsel %vm1665_vm1, %v3213_v12, %v1662_v44 }
 0x3ad   : > { %v1667_v56 = vmul.f32 %v1666_v49, %v1655_v33 }
 0x3af   : > { %v1669_v37 = vmul.f32 %v1667_v56, %v4352_v3  ;;  %1672 = vst.msk [vmem:[#allocation6] sm:$0x1] %vm1671_vm2, %v1667_v56 }
 0x3b1   : > { %v1670_v41 = vsub.f32 %v1668_v54, %v1669_v37 }
 0x3b3   : > { %1673 = vst.msk [vmem:[#allocation6 + $0x1] sm:$0x1] %vm1671_vm2, %v1670_v41 }
 0x3b4 PF: > { %p3099_p6 = scmp.ne.s32.totalorder %s3236_s18, 1 }
 0x3b5   : > { %s3257_s27 = smov (!%p3099_p6), 8   ;;  %s3258_s28 = smov (!%p3099_p6), 16  }
 0x3b6   : > { %1677 = sbr.rel (%p3099_p6) target bundleno = 1657 (0x679), region = 56  ;;  %s3259_s29 = smov (!%p3099_p6), 32  }
 0x3b7   : > { %s3260_s30 = smov (!%p3099_p6), 56   ;;  %s3261_s6 = smov (!%p3099_p6), 24  }
 0x3b8   : > { %s3262_s7 = smov (!%p3099_p6), 40   ;;  %s3263_s8 = smov (!%p3099_p6), 48  }
 0x3b9   : > { %s3264_s9 = smov (!%p3099_p6), 64  }
 0x3bb   : > { %v1790_v20 = vld [vmem:[#allocation3 + $0xa1] sm:$0xff]  ;;  %v1683_v24 = vld [vmem:[#allocation4 + $0x18] sm:$0xff]  ;;  %v4412_v21 = vld [vmem:[#allocation6] ss:$0 sm:$0xff]  ;;  %vm1749_vm3 = vcmask 64512   ;;  %vm2439_vm4 = vcmask 130048  }
 0x3bc   : > { %v1782_v9 = vld [vmem:[#allocation3 + $0x1] sm:$0xff]  ;;  %1943 = vrot.lane.b32.xlu2 %v1790_v20, %s3257_s27  ;;  %v1701_v8 = vmul.f32 %v4412_v21, %v1683_v24  ;;  %v1682_v39 = vld [vmem:[#allocation4 + $0x10] sm:$0xff]  ;;  %v1691_v61 = vld [vmem:[#allocation4 + $0x58] sm:$0xff]  ;;  %vm2456_vm5 = vcmask 195584   ;;  %vm2473_vm6 = vcmask 261120   ;;  %vm2507_vm7 = vcmask 392192  }
 0x3bd   : > { %1927 = vrot.lane.b32.xlu0 %v1782_v9, %s3257_s27  ;;  %v4414_v26 = vld [vmem:[#allocation6 + $0x1] ss:$0 sm:$0xff]  ;;  %v1681_v3 = vld [vmem:[#allocation4 + $0x8] sm:$0xff]  ;;  %v1700_v25 = vmul.f32 %v4412_v21, %v1682_v39  ;;  %v1690_v4 = vld [vmem:[#allocation4 + $0x50] sm:$0xff]  ;;  %v1709_v51 = vmul.f32 %v4412_v21, %v1691_v61  ;;  %vm2490_vm8 = vcmask 326656   ;;  %vm2524_vm9 = vcmask 457728  }
 0x3be   : > { %v1680_v29 = vld [vmem:[#allocation4] sm:$0xff]  ;;  %v1699_v10 = vmul.f32 %v4412_v21, %v1681_v3  ;;  %v1685_v2 = vld [vmem:[#allocation4 + $0x28] sm:$0xff]  ;;  %v1686_v18 = vld [vmem:[#allocation4 + $0x30] sm:$0xff]  ;;  %v1719_v1 = vadd.f32 %v4414_v26, %v1701_v8  ;;  %v1708_v17 = vmul.f32 %v4412_v21, %v1690_v4  ;;  %vm2541_vm10 = vcmask 523264  }
 0x3bf   : > { %v1698_v19 = vmul.f32 %v4412_v21, %v1680_v29  ;;  %v1684_v58 = vld [vmem:[#allocation4 + $0x20] sm:$0xff]  ;;  %v1703_v5 = vmul.f32 %v4412_v21, %v1685_v2  ;;  %v1718_v59 = vadd.f32 %v4414_v26, %v1700_v25  ;;  %v1704_v43 = vmul.f32 %v4412_v21, %v1686_v18  ;;  %v1693_v22 = vld [vmem:[#allocation4 + $0x68] sm:$0xff]  ;;  %v1694_v40 = vld [vmem:[#allocation4 + $0x70] sm:$0xff] }
 0x3c0   : > { %v1702_v55 = vmul.f32 %v4412_v21, %v1684_v58  ;;  %v1717_v52 = vadd.f32 %v4414_v26, %v1699_v10  ;;  %v1688_v53 = vld [vmem:[#allocation4 + $0x40] sm:$0xff]  ;;  %v1689_v11 = vld [vmem:[#allocation4 + $0x48] sm:$0xff]  ;;  %v1735_v34 = vmax.f32 %v1719_v1, 0.0  ;;  %v1726_v32 = vadd.f32 %v4414_v26, %v1708_v17 }
 0x3c1   : > { %v1716_v62 = vadd.f32 %v4414_v26, %v1698_v19  ;;  %v1721_v63 = vadd.f32 %v4414_v26, %v1703_v5  ;;  %v1692_v7 = vld [vmem:[#allocation4 + $0x60] sm:$0xff]  ;;  %v1722_v14 = vadd.f32 %v4414_v26, %v1704_v43  ;;  %v1734_v23 = vmax.f32 %v1718_v59, 0.0 }
 0x3c2   : > { %v1720_v30 = vadd.f32 %v4414_v26, %v1702_v55  ;;  %v1733_v36 = vmax.f32 %v1717_v52, 0.0  ;;  %1753 = vst.msk [vmem:[#allocation3 + $0x41] sm:$0xff] %vm1749_vm3, %v1735_v34  ;;  %v1706_v6 = vmul.f32 %v4412_v21, %v1688_v53  ;;  %v1711_v31 = vmul.f32 %v4412_v21, %v1693_v22  ;;  %v1798_v25 = vld [vmem:[#allocation3 + $0x2] sm:$0xff] }
 0x3c3   : > { %v1732_v15 = vmax.f32 %v1716_v62, 0.0  ;;  %v1707_v45 = vmul.f32 %v4412_v21, %v1689_v11  ;;  %v1737_v46 = vmax.f32 %v1721_v63, 0.0  ;;  %v1710_v35 = vmul.f32 %v4412_v21, %v1692_v7  ;;  %1752 = vst.msk [vmem:[#allocation3 + $0x31] sm:$0xff] %vm1749_vm3, %v1734_v23  ;;  %v1806_v17 = vld [vmem:[#allocation3 + $0xa2] sm:$0xff] }
 0x3c4   : > { %v1736_v47 = vmax.f32 %v1720_v30, 0.0  ;;  %1751 = vst.msk [vmem:[#allocation3 + $0x21] sm:$0xff] %vm1749_vm3, %v1733_v36  ;;  %v1712_v13 = vmul.f32 %v4412_v21, %v1694_v40  ;;  %v1742_v48 = vmax.f32 %v1726_v32, 0.0  ;;  %v1724_v0 = vadd.f32 %v4414_v26, %v1706_v6 }
 0x3c5   : > { %1750 = vst.msk [vmem:[#allocation3 + $0x11] sm:$0xff] %vm1749_vm3, %v1732_v15  ;;  %v1729_v27 = vadd.f32 %v4414_v26, %v1711_v31  ;;  %v1725_v42 = vadd.f32 %v4414_v26, %v1707_v45  ;;  %v1738_v57 = vmax.f32 %v1722_v14, 0.0  ;;  %v1727_v38 = vadd.f32 %v4414_v26, %v1709_v51 }
 0x3c6   : > { %1754 = vst.msk [vmem:[#allocation3 + $0x51] sm:$0xff] %vm1749_vm3, %v1736_v47  ;;  %v1740_v12 = vmax.f32 %v1724_v0, 0.0  ;;  %v1728_v16 = vadd.f32 %v4414_v26, %v1710_v35  ;;  %v1730_v28 = vadd.f32 %v4414_v26, %v1712_v13  ;;  %vm2567_vm11 = vcmask 588800  }
 0x3c7   : > { %1755 = vst.msk [vmem:[#allocation3 + $0x61] sm:$0xff] %vm1749_vm3, %v1737_v46  ;;  %v1745_v60 = vmax.f32 %v1729_v27, 0.0  ;;  %v1741_v50 = vmax.f32 %v1725_v42, 0.0  ;;  %v1743_v44 = vmax.f32 %v1727_v38, 0.0  ;;  %vm2850_vm0 = vcmask 57344  }
 0x3c8   : > { %1760 = vst.msk [vmem:[#allocation3 + $0xd1] sm:$0xff] %vm1749_vm3, %v1742_v48  ;;  %v1744_v56 = vmax.f32 %v1728_v16, 0.0  ;;  %v1746_v37 = vmax.f32 %v1730_v28, 0.0  ;;  %v2565_v16 = vld [vmem:[%s5212_s2 + $0x38] sm:$0xff] }
 0x3c9   : > { %v4451_v33 = vld [vmem:[#allocation3 + $0x41] sm:$0xff]  ;;  %1756 = vst.msk [vmem:[#allocation3 + $0x71] sm:$0xff] %vm1749_vm3, %v1738_v57 }
 0x3ca   : > { %1935 = vrot.lane.b32.xlu2 %v4451_v33, %s3257_s27  ;;  %1758 = vst.msk [vmem:[#allocation3 + $0xb1] sm:$0xff] %vm1749_vm3, %v1740_v12  ;;  %v4469_v20 = vld [vmem:[#allocation3 + $0x31] sm:$0xff]  ;;  %v4509_v55 = vld [vmem:[#allocation3 + $0x42] sm:$0xff] }
 0x3cb   : > { %v4456_v49 = vld [vmem:[#allocation3 + $0x21] sm:$0xff]  ;;  %1763 = vst.msk [vmem:[#allocation3 + $0x101] sm:$0xff] %vm1749_vm3, %v1745_v60  ;;  %v4515_v4 = vld [vmem:[#allocation3 + $0x32] sm:$0xff] }
 0x3cc   : > { %1931 = vrot.lane.b32.xlu1 %v4456_v49, %s3257_s27  ;;  %v1783_v54 = vld [vmem:[#allocation3 + $0x11] sm:$0xff]  ;;  %1759 = vst.msk [vmem:[#allocation3 + $0xc1] sm:$0xff] %vm1749_vm3, %v1741_v50  ;;  %v1800_v5 = vld [vmem:[#allocation3 + $0x22] sm:$0xff] }
 0x3cd   : > { %1929 = vrot.lane.b32.xlu0 %v1783_v54, %s3257_s27  ;;  %1761 = vst.msk [vmem:[#allocation3 + $0xe1] sm:$0xff] %vm1749_vm3, %v1743_v44  ;;  %v4466_v41 = vld [vmem:[#allocation3 + $0x51] sm:$0xff]  ;;  %v1863_v62 = vld [vmem:[#allocation3 + $0x20] sm:$0xff] }
 0x3ce   : > { %1762 = vst.msk [vmem:[#allocation3 + $0xf1] sm:$0xff] %vm1749_vm3, %v1744_v56  ;;  %v4471_v9 = vld [vmem:[#allocation3 + $0x61] sm:$0xff]  ;;  %v1799_v58 = vld [vmem:[#allocation3 + $0x12] sm:$0xff] }
 0x3cf   : > { %1764 = vst.msk [vmem:[#allocation3 + $0x111] sm:$0xff] %vm1749_vm3, %v1746_v37  ;;  %v4479_v24 = vld [vmem:[#allocation3 + $0xd1] sm:$0xff]  ;;  %v1867_v63 = vld [vmem:[#allocation3 + $0x60] sm:$0xff] }
 0x3d0   : > { %v4481_v3 = vld [vmem:[#allocation3 + $0x71] sm:$0xff]  ;;  %v4556_v34 = vld [vmem:[#allocation3 + $0x62] sm:$0xff] }
 0x3d1   : > { %v1791_v29 = vld [vmem:[#allocation3 + $0xb1] sm:$0xff]  ;;  %v2566_v12 = vld [vmem:[%s5212_s2 + $0x40] sm:$0xff] }
 0x3d2   : > { %1937 = vrot.lane.b32.xlu2 %v4466_v41, %s3257_s27  ;;  %v4488_v8 = vld [vmem:[#allocation3 + $0x101] sm:$0xff]  ;;  %v4517_v18 = vld [vmem:[#allocation3 + $0x52] sm:$0xff]  ;;  %2623 = vmatpush.msra.mxu0 %v2566_v12 }
 0x3d3   : > { %v4490_v10 = vld [vmem:[#allocation3 + $0xc1] sm:$0xff]  ;;  %v1814_v1 = vld [vmem:[#allocation3 + $0x10] sm:$0xff]  ;;  %3138 = vmatpush.msra.mxu1 %v2566_v12  ;;  %3139 = vmatpush.msra.mxu2 %v2566_v12 }
 0x3d4   : > { %1933 = vrot.lane.b32.xlu1 %v4469_v20, %s3257_s27  ;;  %v4492_v19 = vld [vmem:[#allocation3 + $0xe1] sm:$0xff]  ;;  %v4528_v52 = vld [vmem:[#allocation3 + $0x50] sm:$0xff]  ;;  %3140 = vmatpush.msra.mxu3 %v2566_v12 }
 0x3d5   : > { %1939 = vrot.lane.b32.xlu0 %v4471_v9, %s3257_s27  ;;  %v4500_v39 = vld [vmem:[#allocation3 + $0xf1] sm:$0xff]  ;;  %v1871_v36 = vld [vmem:[#allocation3 + $0xc0] sm:$0xff]  ;;  %2624 = vmatpush.msra.mxu0 %v2565_v16 }
 0x3d6   : > { %v4502_v2 = vld [vmem:[#allocation3 + $0x111] sm:$0xff]  ;;  %v4578_v23 = vld [vmem:[#allocation3 + $0xe2] sm:$0xff]  ;;  %3141 = vmatpush.msra.mxu1 %v2565_v16  ;;  %3142 = vmatpush.msra.mxu2 %v2565_v16 }
 0x3d7   : > { %v1822_v30 = vld [vmem:[#allocation3 + $0xb0] sm:$0xff]  ;;  %v4580_v6 = vld [vmem:[#allocation3 + $0xc2] sm:$0xff]  ;;  %3143 = vmatpush.msra.mxu3 %v2565_v16 }
 0x3d8   : > { %v1864_v53 = vld [vmem:[#allocation3 + $0x30] sm:$0xff]  ;;  %v2562_v37 = vld [vmem:[%s5212_s2 + $0x20] sm:$0xff] }
 0x3d9   : > { %v1854_v22 = vld [vmem:[#allocation3 + $0xb2] sm:$0xff] }
 0x3da   : > { %1949 = vrot.lane.b32.xlu2 %v4479_v24, %s3257_s27  ;;  %v4598_v48 = vld [vmem:[#allocation3 + $0x70] sm:$0xff] }
 0x3db   : > { %v4617_v60 = vld [vmem:[#allocation3 + $0xf0] sm:$0xff] }
 0x3dc   : > { %1941 = vrot.lane.b32.xlu1 %v4481_v3, %s3257_s27  ;;  %v2564_v50 = vld [vmem:[%s5212_s2 + $0x30] sm:$0xff] }
 0x3dd   : > { %1945 = vrot.lane.b32.xlu0 %v1791_v29, %s3257_s27  ;;  %2625 = vmatpush.msra.mxu0 %v2564_v50 }
 0x3de   : > { %3144 = vmatpush.msra.mxu1 %v2564_v50  ;;  %3145 = vmatpush.msra.mxu2 %v2564_v50 }
 0x3df   : > { %3146 = vmatpush.msra.mxu3 %v2564_v50 }
 0x3e2   : > { %1955 = vrot.lane.b32.xlu2 %v4488_v8, %s3257_s27 }
 0x3e4   : > { %1947 = vrot.lane.b32.xlu1 %v4490_v10, %s3257_s27 }
 0x3e5   : > { %1951 = vrot.lane.b32.xlu0 %v4492_v19, %s3257_s27 }
 0x3ea   : > { %1993 = vrot.lane.b32.xlu2 %v1799_v58, %s3258_s28 }
 0x3ec   : > { %1953 = vrot.lane.b32.xlu1 %v4500_v39, %s3257_s27 }
 0x3ed   : > { %1957 = vrot.lane.b32.xlu0 %v4502_v2, %s3257_s27 }
 0x3f2   : > { %1999 = vrot.lane.b32.xlu2 %v4509_v55, %s3258_s28 }
 0x3f4   : > { %1991 = vrot.lane.b32.xlu1 %v1798_v25, %s3258_s28 }
 0x3f5   : > { %1995 = vrot.lane.b32.xlu0 %v1800_v5, %s3258_s28 }
 0x3fa   : > { %2119 = vrot.lane.b32.xlu2 %v1783_v54, %s3259_s29  ;;  %v2563_v54 = vld [vmem:[%s5212_s2 + $0x28] sm:$0xff] }
 0x3fb   : > { %2626 = vmatpush.msra.mxu0 %v2563_v54  ;;  %3147 = vmatpush.msra.mxu1 %v2563_v54 }
 0x3fc   : > { %1997 = vrot.lane.b32.xlu1 %v4515_v4, %s3258_s28  ;;  %3148 = vmatpush.msra.mxu2 %v2563_v54 }
 0x3fd   : > { %2001 = vrot.lane.b32.xlu0 %v4517_v18, %s3258_s28  ;;  %2627 = vmatpush.msra.mxu0 %v2562_v37 }
 0x3fe   : > { %3150 = vmatpush.msra.mxu1 %v2562_v37  ;;  %3151 = vmatpush.msra.mxu2 %v2562_v37 }
 0x3ff   : > { %3149 = vmatpush.msra.mxu3 %v2563_v54 }
 0x401   : > { %3152 = vmatpush.msra.mxu3 %v2562_v37  ;;  %v1687_v37 = vld [vmem:[#allocation4 + $0x38] sm:$0xff] }
 0x402   : > { %2311 = vrot.lane.b32.xlu2 %v4456_v49, %s3260_s30 }
 0x404   : > { %2055 = vrot.lane.b32.xlu1 %v1814_v1, %s3261_s6 }
 0x405   : > { %2183 = vrot.lane.b32.xlu0 %v1799_v58, %s3262_s7  ;;  %v2560_v58 = vld [vmem:[%s5212_s2 + $0x10] sm:$0xff] }
 0x40a   : > { %2063 = vrot.lane.b32.xlu2 %v4528_v52, %s3261_s6 }
 0x40c   : > { %2247 = vrot.lane.b32.xlu1 %v1863_v62, %s3263_s8 }
 0x40d   : > { %2375 = vrot.lane.b32.xlu0 %v1800_v5, %s3264_s9 }
 0x412   : > { %2127 = vrot.lane.b32.xlu2 %v4466_v41, %s3259_s29 }
 0x414   : > { %2057 = vrot.lane.b32.xlu1 %v1863_v62, %s3261_s6 }
 0x415   : > { %2007 = vrot.lane.b32.xlu0 %v1806_v17, %s3258_s28 }
 0x416   : > { %v4540_v59 = vpop.permute.xlu2 %1943 }
 0x41a   : > { %2191 = vrot.lane.b32.xlu2 %v4517_v18, %s3262_s7 }
 0x41c   : > { %2121 = vrot.lane.b32.xlu1 %v4456_v49, %s3259_s29 }
 0x41d   : > { %2071 = vrot.lane.b32.xlu0 %v1822_v30, %s3261_s6 }
 0x422   : > { %2255 = vrot.lane.b32.xlu2 %v1867_v63, %s3263_s8 }
 0x424   : > { %2185 = vrot.lane.b32.xlu1 %v1800_v5, %s3262_s7  ;;  %v4548_v43 = vpop.permute.xlu2 %1935 }
 0x425   : > { %2135 = vrot.lane.b32.xlu0 %v1791_v29, %s3259_s29 }
 0x42a   : > { %2319 = vrot.lane.b32.xlu2 %v4471_v9, %s3260_s30 }
 0x42c   : > { %2249 = vrot.lane.b32.xlu1 %v1864_v53, %s3263_s8  ;;  %v4554_v11 = vpop.permute.xlu2 %1937 }
 0x42d   : > { %2199 = vrot.lane.b32.xlu0 %v1854_v22, %s3262_s7 }
 0x42f   : > { %v4563_v15 = vpop.permute.xlu0 %1927 }
 0x432   : > { %2383 = vrot.lane.b32.xlu2 %v4556_v34, %s3264_s9 }
 0x434   : > { %2313 = vrot.lane.b32.xlu1 %v4469_v20, %s3260_s30  ;;  %v4565_v32 = vpop.permute.xlu2 %1949 }
 0x435   : > { %2263 = vrot.lane.b32.xlu0 %v1871_v36, %s3263_s8 }
 0x43a   : > { %2059 = vrot.lane.b32.xlu2 %v1864_v53, %s3261_s6 }
 0x43c   : > { %2377 = vrot.lane.b32.xlu1 %v4515_v4, %s3264_s9  ;;  %v4572_v61 = vpop.permute.xlu2 %1955 }
 0x43d   : > { %2327 = vrot.lane.b32.xlu0 %v4490_v10, %s3260_s30 }
 0x43e   : > { %v1932_v7 = vpop.permute.xlu1 %1931 }
 0x43f   : > { %v4575_v40 = vsel %vm1749_vm3, %v1863_v62, %v1932_v7  ;;  %v1930_v47 = vpop.permute.xlu0 %1929  ;;  %v2428_v7 = vsel %vm1749_vm3, %v4528_v52, %v4554_v11 }
 0x440   : > { %v2424_v14 = vsel %vm1749_vm3, %v1814_v1, %v1930_v47  ;;  %v4667_v1 = vld [vmem:[#allocation3 + $0xf2] sm:$0xff] }
 0x442   : > { %2015 = vrot.lane.b32.xlu2 %v4578_v23, %s3258_s28 }
 0x444   : > { %2391 = vrot.lane.b32.xlu1 %v4580_v6, %s3264_s9  ;;  %v1994_v31 = vpop.permute.xlu2 %1993 }
 0x445   : > { %2065 = vrot.lane.b32.xlu0 %v1867_v63, %s3261_s6  ;;  %v4588_v46 = vsel %vm2439_vm4, %v2424_v14, %v1994_v31  ;;  %v4699_v31 = vld [vmem:[#allocation3 + $0x72] sm:$0xff] }
 0x446   : > { %v1934_v45 = vpop.permute.xlu1 %1933 }
 0x447   : > { %v4591_v51 = vsel %vm1749_vm3, %v1864_v53, %v1934_v45  ;;  %v1940_v35 = vpop.permute.xlu0 %1939  ;;  %v4681_v53 = vld [vmem:[#allocation3 + $0xd0] sm:$0xff]  ;;  %v1766_v45 = vld [vmem:[#allocation3] sm:$0xff] }
 0x448   : > { %v4594_v13 = vsel %vm1749_vm3, %v1867_v63, %v1940_v35  ;;  %v4703_v35 = vld [vmem:[#allocation3 + $0x100] sm:$0xff] }
 0x44a   : > { %2073 = vrot.lane.b32.xlu2 %v1871_v36, %s3261_s6 }
 0x44c   : > { %2009 = vrot.lane.b32.xlu1 %v1854_v22, %s3258_s28  ;;  %v4602_v0 = vpop.permute.xlu2 %1999 }
 0x44d   : > { %2123 = vrot.lane.b32.xlu0 %v4469_v20, %s3259_s29  ;;  %v2561_v20 = vld [vmem:[%s5212_s2 + $0x18] sm:$0xff] }
 0x44e   : > { %v1942_v27 = vpop.permute.xlu1 %1941  ;;  %2628 = vmatpush.msra.mxu0 %v2561_v20  ;;  %3153 = vmatpush.msra.mxu1 %v2561_v20 }
 0x44f   : > { %v4606_v42 = vsel %vm1749_vm3, %v4598_v48, %v1942_v27  ;;  %v1946_v57 = vpop.permute.xlu0 %1945  ;;  %3154 = vmatpush.msra.mxu2 %v2561_v20  ;;  %3155 = vmatpush.msra.mxu3 %v2561_v20 }
 0x450   : > { %v4609_v38 = vsel %vm1749_vm3, %v1822_v30, %v1946_v57  ;;  %2629 = vmatpush.msra.mxu0 %v2560_v58  ;;  %3156 = vmatpush.msra.mxu1 %v2560_v58 }
 0x451   : > { %3157 = vmatpush.msra.mxu2 %v2560_v58  ;;  %3158 = vmatpush.msra.mxu3 %v2560_v58 }
 0x452   : > { %2193 = vrot.lane.b32.xlu2 %v4556_v34, %s3262_s7 }
 0x454   : > { %2129 = vrot.lane.b32.xlu1 %v4471_v9, %s3259_s29  ;;  %v4625_v28 = vpop.permute.xlu2 %2119  ;;  %v4644_v9 = vld [vmem:[#allocation3 + $0x40] sm:$0xff] }
 0x455   : > { %2079 = vrot.lane.b32.xlu0 %v4617_v60, %s3261_s6 }
 0x456   : > { %v1948_v44 = vpop.permute.xlu1 %1947 }
 0x457   : > { %v4631_v49 = vsel %vm1749_vm3, %v1871_v36, %v1948_v44  ;;  %v4633_v56 = vpop.permute.xlu0 %1951 }
 0x45a   : > { %2251 = vrot.lane.b32.xlu2 %v4644_v9, %s3263_s8 }
 0x45c   : > { %2187 = vrot.lane.b32.xlu1 %v4515_v4, %s3262_s7  ;;  %v4652_v29 = vpop.permute.xlu2 %2311  ;;  %v2559_v4 = vld [vmem:[%s5212_s2 + $0x8] sm:$0xff] }
 0x45d   : > { %2137 = vrot.lane.b32.xlu0 %v4490_v10, %s3259_s29  ;;  %v2558_v10 = vld [vmem:[%s5212_s2] sm:$0xff]  ;;  %2630 = vmatpush.msra.mxu0 %v2559_v4 }
 0x45e   : > { %v4657_v25 = vpop.permute.xlu1 %1953  ;;  %3159 = vmatpush.msra.mxu1 %v2559_v4  ;;  %3160 = vmatpush.msra.mxu2 %v2559_v4 }
 0x45f   : > { %v4659_v5 = vpop.permute.xlu0 %1957  ;;  %2631 = vmatpush.msra.mxu0 %v2558_v10  ;;  %3161 = vmatpush.msra.mxu3 %v2559_v4 }
 0x460   : > { %3162 = vmatpush.msra.mxu1 %v2558_v10  ;;  %3163 = vmatpush.msra.mxu2 %v2558_v10 }
 0x461   : > { %3164 = vmatpush.msra.mxu3 %v2558_v10 }
 0x462   : > { %2207 = vrot.lane.b32.xlu2 %v4667_v1, %s3262_s7 }
 0x464   : > { %2143 = vrot.lane.b32.xlu1 %v4500_v39, %s3259_s29  ;;  %v4675_v62 = vpop.permute.xlu2 %2063 }
 0x465   : > { %2257 = vrot.lane.b32.xlu0 %v4598_v48, %s3263_s8 }
 0x466   : > { %v1992_v17 = vpop.permute.xlu1 %1991 }
 0x467   : > { %v1996_v30 = vpop.permute.xlu0 %1995 }
 0x468   : > { %v4679_v63 = vsel %vm2439_vm4, %v4575_v40, %v1996_v30 }
 0x46a   : > { %2265 = vrot.lane.b32.xlu2 %v4681_v53, %s3263_s8 }
 0x46c   : > { %2201 = vrot.lane.b32.xlu1 %v4580_v6, %s3262_s7  ;;  %v2128_v22 = vpop.permute.xlu2 %2127 }
 0x46d   : > { %2315 = vrot.lane.b32.xlu0 %v4451_v33, %s3260_s30 }
 0x46e   : > { %v1998_v36 = vpop.permute.xlu1 %1997 }
 0x46f   : > { %v4694_v40 = vsel %vm2439_vm4, %v4591_v51, %v1998_v36  ;;  %v2002_v47 = vpop.permute.xlu0 %2001  ;;  %v2423_v51 = vsel %vm1749_vm3, %v1766_v45, %v4563_v15  ;;  %v2427_v36 = vsel %vm1749_vm3, %v4644_v9, %v4548_v43 }
 0x470   : > { %v4697_v14 = vsel %vm2439_vm4, %v2428_v7, %v2002_v47  ;;  %v2440_v57 = vsel %vm2439_vm4, %v2423_v51, %v1992_v17  ;;  %v4729_v17 = vld [vmem:[#allocation3 + $0xd2] sm:$0xff]  ;;  %v2444_v45 = vsel %vm2439_vm4, %v2427_v36, %v4602_v0 }
 0x471   : > { %v2461_v51 = vsel %vm2456_vm5, %v2444_v45, %v4675_v62 }
 0x472   : > { %2385 = vrot.lane.b32.xlu2 %v4699_v31, %s3264_s9 }
 0x474   : > { %2321 = vrot.lane.b32.xlu1 %v4481_v3, %s3260_s30  ;;  %v2192_v11 = vpop.permute.xlu2 %2191 }
 0x475   : > { %2271 = vrot.lane.b32.xlu0 %v4703_v35, %s3263_s8 }
 0x476   : > { %v2056_v27 = vpop.permute.xlu1 %2055 }
 0x477   : > { %v2184_v12 = vpop.permute.xlu0 %2183  ;;  %v2457_v16 = vsel %vm2456_vm5, %v2440_v57, %v2056_v27  ;;  %v4745_v27 = vld [vmem:[#allocation3 + $0x102] sm:$0xff]  ;;  %v2478_v57 = vsel %vm2473_vm6, %v2461_v51, %v2128_v22 }
 0x478   : > { %v2474_v50 = vsel %vm2473_vm6, %v2457_v16, %v4625_v28  ;;  %v2495_v43 = vsel %vm2490_vm8, %v2478_v57, %v2192_v11 }
 0x479   : > { %v2491_v44 = vsel %vm2490_vm8, %v2474_v50, %v2184_v12 }
 0x47a   : > { %2003 = vrot.lane.b32.xlu2 %v4556_v34, %s3258_s28  ;;  %v1705_v34 = vmul.f32 %v4412_v21, %v1687_v37 }
 0x47c   : > { %2379 = vrot.lane.b32.xlu1 %v4509_v55, %s3264_s9  ;;  %v2256_v15 = vpop.permute.xlu2 %2255  ;;  %v1723_v10 = vadd.f32 %v4414_v26, %v1705_v34 }
 0x47d   : > { %2329 = vrot.lane.b32.xlu0 %v4479_v24, %s3260_s30 }
 0x47e   : > { %v2248_v54 = vpop.permute.xlu1 %2247  ;;  %v1739_v30 = vmax.f32 %v1723_v10, 0.0 }
 0x47f   : > { %v2508_v28 = vsel %vm2507_vm7, %v2491_v44, %v2248_v54  ;;  %v2376_v20 = vpop.permute.xlu0 %2375  ;;  %v4769_v44 = vld [vmem:[#allocation3 + $0xe0] sm:$0xff] }
 0x480   : > { %v2525_v58 = vsel %vm2524_vm9, %v2508_v28, %v4652_v29  ;;  %1757 = vst.msk [vmem:[#allocation3 + $0x81] sm:$0xff] %vm1749_vm3, %v1739_v30 }
 0x481   : > { %v2542_v4 = vsel %vm2541_vm10, %v2525_v58, %v2376_v20 }
 0x482   : > { %3100 = vmatmul.msk.f32.vlgmr.msra.gmra.mxu0 %vm2567_vm11, %v2542_v4  ;;  %2061 = vrot.lane.b32.xlu2 %v4644_v9, %s3261_s6  ;;  %v2512_v9 = vsel %vm2507_vm7, %v2495_v43, %v2256_v15 }
 0x484   : > { %2335 = vrot.lane.b32.xlu1 %v4488_v8, %s3260_s30  ;;  %v2320_v29 = vpop.permute.xlu2 %2319 }
 0x485   : > { %2393 = vrot.lane.b32.xlu0 %v4729_v17, %s3264_s9  ;;  %v2529_v12 = vsel %vm2524_vm9, %v2512_v9, %v2320_v29 }
 0x486   : > { %v2058_v7 = vpop.permute.xlu1 %2057 }
 0x487   : > { %v2008_v47 = vpop.permute.xlu0 %2007  ;;  %v2458_v20 = vsel %vm2456_vm5, %v4588_v46, %v2058_v7  ;;  %v1869_v34 = vld [vmem:[#allocation3 + $0x80] sm:$0xff] }
 0x48a   : > { %2017 = vrot.lane.b32.xlu2 %v4667_v1, %s3258_s28 }
 0x48c   : > { %2399 = vrot.lane.b32.xlu1 %v4745_v27, %s3264_s9  ;;  %v2384_v0 = vpop.permute.xlu2 %2383 }
 0x48d   : > { %2067 = vrot.lane.b32.xlu0 %v4598_v48, %s3261_s6  ;;  %v2546_v16 = vsel %vm2541_vm10, %v2529_v12, %v2384_v0  ;;  %v1901_v0 = vld [vmem:[#allocation3 + $0x82] sm:$0xff] }
 0x48e   : > { %v2122_v62 = vpop.permute.xlu1 %2121  ;;  %3104 = vmatmul.msk.f32.vlgmr.msra.gmra.mxu1 %vm2567_vm11, %v2546_v16  ;;  %v4823_v16 = vld [vmem:[#allocation3 + $0x110] sm:$0xff] }
 0x48f   : > { %v2072_v22 = vpop.permute.xlu0 %2071  ;;  %v2475_v58 = vsel %vm2473_vm6, %v2458_v20, %v2122_v62  ;;  %v1885_v62 = vld [vmem:[#allocation3 + $0x81] sm:$0xff] }
 0x492   : > { %2075 = vrot.lane.b32.xlu2 %v4681_v53, %s3261_s6 }
 0x494   : > { %2011 = vrot.lane.b32.xlu1 %v4580_v6, %s3258_s28  ;;  %v2060_v11 = vpop.permute.xlu2 %2059  ;;  %v2435_v6 = vsel %vm1749_vm3, %v4769_v44, %v4633_v56 }
 0x495   : > { %2125 = vrot.lane.b32.xlu0 %v4451_v33, %s3259_s29  ;;  %v4767_v48 = vsel %vm2456_vm5, %v4679_v63, %v2060_v11 }
 0x496   : > { %v2186_v50 = vpop.permute.xlu1 %2185 }
 0x497   : > { %v2136_v15 = vpop.permute.xlu0 %2135 }
 0x49a   : > { %2195 = vrot.lane.b32.xlu2 %v4699_v31, %s3262_s7 }
 0x49c   : > { %2131 = vrot.lane.b32.xlu1 %v4481_v3, %s3259_s29  ;;  %v2016_v33 = vpop.permute.xlu2 %2015 }
 0x49d   : > { %2081 = vrot.lane.b32.xlu0 %v4703_v35, %s3261_s6  ;;  %v4781_v63 = vsel %vm2439_vm4, %v2435_v6, %v2016_v33 }
 0x49e   : > { %v2250_v54 = vpop.permute.xlu1 %2249 }
 0x49f   : > { %v2200_v37 = vpop.permute.xlu0 %2199 }
 0x4a2   : > { %2253 = vrot.lane.b32.xlu2 %v4528_v52, %s3263_s8  ;;  %v2492_v52 = vsel %vm2490_vm8, %v2475_v58, %v2186_v50 }
 0x4a4   : > { %2189 = vrot.lane.b32.xlu1 %v4509_v55, %s3262_s7  ;;  %v2074_v3 = vpop.permute.xlu2 %2073  ;;  %v1774_v55 = vld [vmem:[#allocation3 + $0xa0] sm:$0xff] }
 0x4a5   : > { %2139 = vrot.lane.b32.xlu0 %v4479_v24, %s3259_s29  ;;  %v2509_v24 = vsel %vm2507_vm7, %v2492_v52, %v2250_v54  ;;  %v2431_v29 = vsel %vm1749_vm3, %v1774_v55, %v4540_v59 }
 0x4a6   : > { %v2314_v56 = vpop.permute.xlu1 %2313 }
 0x4a7   : > { %v2264_v28 = vpop.permute.xlu0 %2263  ;;  %v2526_v46 = vsel %vm2524_vm9, %v2509_v24, %v2314_v56  ;;  %v4851_v56 = vld [vmem:[#allocation3 + $0x112] sm:$0xff] }
 0x4aa   : > { %2209 = vrot.lane.b32.xlu2 %v4745_v27, %s3262_s7 }
 0x4ac   : > { %2145 = vrot.lane.b32.xlu1 %v4488_v8, %s3259_s29  ;;  %v4799_v4 = vpop.permute.xlu2 %2193  ;;  %v2448_v8 = vsel %vm2439_vm4, %v2431_v29, %v2008_v47 }
 0x4ad   : > { %2259 = vrot.lane.b32.xlu0 %v1869_v34, %s3263_s8  ;;  %v2465_v7 = vsel %vm2456_vm5, %v2448_v8, %v2072_v22 }
 0x4ae   : > { %v2378_v10 = vpop.permute.xlu1 %2377  ;;  %v2482_v45 = vsel %vm2473_vm6, %v2465_v7, %v2136_v15 }
 0x4af   : > { %v2328_v30 = vpop.permute.xlu0 %2327  ;;  %v2543_v36 = vsel %vm2541_vm10, %v2526_v46, %v2378_v10  ;;  %v2499_v51 = vsel %vm2490_vm8, %v2482_v45, %v2200_v37  ;;  %v1695_v37 = vld [vmem:[#allocation4 + $0x78] sm:$0xff]  ;;  %v1870_v46 = vld [vmem:[#allocation3 + $0x90] sm:$0xff] }
 0x4b0   : > { %3101 = vmatmul.msk.f32.gmra.mxu0 %vm2567_vm11, %v2543_v36  ;;  %v2516_v57 = vsel %vm2507_vm7, %v2499_v51, %v2264_v28  ;;  %v1886_v45 = vld [vmem:[#allocation3 + $0x91] sm:$0xff] }
 0x4b1   : > { %v2533_v47 = vsel %vm2524_vm9, %v2516_v57, %v2328_v30 }
 0x4b2   : > { %2267 = vrot.lane.b32.xlu2 %v4769_v44, %s3263_s8 }
 0x4b4   : > { %2203 = vrot.lane.b32.xlu1 %v4729_v17, %s3262_s7  ;;  %v4817_v59 = vpop.permute.xlu2 %2251 }
 0x4b5   : > { %2317 = vrot.lane.b32.xlu0 %v4466_v41, %s3260_s30 }
 0x4b6   : > { %v2392_v43 = vpop.permute.xlu1 %2391 }
 0x4b7   : > { %v2066_v9 = vpop.permute.xlu0 %2065  ;;  %v2550_v12 = vsel %vm2541_vm10, %v2533_v47, %v2392_v43 }
 0x4b8   : > { %3108 = vmatmul.msk.f32.vlgmr.msra.gmra.mxu2 %vm2567_vm11, %v2550_v12 }
 0x4ba   : > { %2387 = vrot.lane.b32.xlu2 %v1901_v0, %s3264_s9 }
 0x4bc   : > { %2323 = vrot.lane.b32.xlu1 %v1885_v62, %s3260_s30  ;;  %v4828_v41 = vpop.permute.xlu2 %2207 }
 0x4bd   : > { %2273 = vrot.lane.b32.xlu0 %v4823_v16, %s3263_s8 }
 0x4be   : > { %v2010_v22 = vpop.permute.xlu1 %2009 }
 0x4bf   : > { %v2449_v11 = vsel %vm2439_vm4, %v4609_v38, %v2010_v22  ;;  %v2124_v50 = vpop.permute.xlu0 %2123 }
 0x4c0   : > { %v4833_v15 = vsel %vm2456_vm5, %v2449_v11, %v2074_v3  ;;  %v1713_v3 = vmul.f32 %v4412_v21, %v1695_v37 }
 0x4c2   : > { %2005 = vrot.lane.b32.xlu2 %v4699_v31, %s3258_s28  ;;  %v1731_v28 = vadd.f32 %v4414_v26, %v1713_v3 }
 0x4c4   : > { %2381 = vrot.lane.b32.xlu1 %v4517_v18, %s3264_s9  ;;  %v4841_v6 = vpop.permute.xlu2 %2265  ;;  %v1747_v20 = vmax.f32 %v1731_v28, 0.0 }
 0x4c5   : > { %2331 = vrot.lane.b32.xlu0 %v4492_v19, %s3260_s30 }
 0x4c6   : > { %v2130_v33 = vpop.permute.xlu1 %2129  ;;  %1765 = vst.msk [vmem:[#allocation3 + $0x121] sm:$0xff] %vm1749_vm3, %v1747_v20 }
 0x4c7   : > { %v4843_v54 = vpop.permute.xlu0 %2079 }
 0x4c8   : > { %v2469_v11 = vsel %vm2456_vm5, %v4781_v63, %v4843_v54 }
 0x4ca   : > { %2069 = vrot.lane.b32.xlu2 %v1869_v34, %s3261_s6 }
 0x4cc   : > { %2337 = vrot.lane.b32.xlu1 %v4502_v2, %s3260_s30  ;;  %v2386_v38 = vpop.permute.xlu2 %2385 }
 0x4cd   : > { %2395 = vrot.lane.b32.xlu0 %v4578_v23, %s3264_s9 }
 0x4ce   : > { %v2188_v31 = vpop.permute.xlu1 %2187 }
 0x4cf   : > { %v2138_v18 = vpop.permute.xlu0 %2137 }
 0x4d0   : > { %v2483_v12 = vsel %vm2473_vm6, %v4833_v15, %v2138_v18 }
 0x4d2   : > { %2133 = vrot.lane.b32.xlu2 %v1885_v62, %s3259_s29 }
 0x4d4   : > { %2401 = vrot.lane.b32.xlu1 %v4851_v56, %s3264_s9  ;;  %v2004_v34 = vpop.permute.xlu2 %2003 }
 0x4d5   : > { %2013 = vrot.lane.b32.xlu0 %v4729_v17, %s3258_s28  ;;  %v4862_v21 = vsel %vm2439_vm4, %v4594_v13, %v2004_v34  ;;  %v2462_v13 = vsel %vm2456_vm5, %v4697_v14, %v2066_v9  ;;  %v1902_v9 = vld [vmem:[#allocation3 + $0x92] sm:$0xff] }
 0x4d6   : > { %v2144_v58 = vpop.permute.xlu1 %2143  ;;  %v2479_v10 = vsel %vm2473_vm6, %v2462_v13, %v2130_v33  ;;  %v1877_v33 = vld [vmem:[#allocation3 + $0x120] sm:$0xff] }
 0x4d7   : > { %v2258_v52 = vpop.permute.xlu0 %2257  ;;  %v2486_v15 = vsel %vm2473_vm6, %v2469_v11, %v2144_v58  ;;  %v1878_v58 = vld [vmem:[#allocation3 + $0x130] sm:$0xff] }
 0x4da   : > { %2197 = vrot.lane.b32.xlu2 %v1901_v0, %s3262_s7 }
 0x4dc   : > { %2019 = vrot.lane.b32.xlu1 %v4745_v27, %s3258_s28  ;;  %v2062_v26 = vpop.permute.xlu2 %2061  ;;  %v2436_v27 = vsel %vm1749_vm3, %v4617_v60, %v4657_v25  ;;  %v2476_v25 = vsel %vm2473_vm6, %v4767_v48, %v2124_v50 }
 0x4dd   : > { %2077 = vrot.lane.b32.xlu0 %v4769_v44, %s3261_s6  ;;  %v4871_v17 = vsel %vm2456_vm5, %v4694_v40, %v2062_v26  ;;  %v2496_v40 = vsel %vm2490_vm8, %v2479_v10, %v4799_v4 }
 0x4de   : > { %v2202_v55 = vpop.permute.xlu1 %2201  ;;  %v2513_v14 = vsel %vm2507_vm7, %v2496_v40, %v2258_v52 }
 0x4df   : > { %v2316_v24 = vpop.permute.xlu0 %2315 }
 0x4e2   : > { %2261 = vrot.lane.b32.xlu2 %v1870_v46, %s3263_s8  ;;  %v1894_v46 = vld [vmem:[#allocation3 + $0x131] sm:$0xff] }
 0x4e4   : > { %2083 = vrot.lane.b32.xlu1 %v4823_v16, %s3261_s6  ;;  %v2018_v44 = vpop.permute.xlu2 %2017 }
 0x4e5   : > { %2141 = vrot.lane.b32.xlu0 %v4492_v19, %s3259_s29  ;;  %v4888_v36 = vsel %vm2439_vm4, %v2436_v27, %v2018_v44  ;;  %v2493_v19 = vsel %vm2490_vm8, %v2476_v25, %v2188_v31  ;;  %v1910_v27 = vld [vmem:[#allocation3 + $0x132] sm:$0xff] }
 0x4e6   : > { %v2322_v30 = vpop.permute.xlu1 %2321  ;;  %v2510_v4 = vsel %vm2507_vm7, %v2493_v19, %v4817_v59 }
 0x4e7   : > { %v2530_v29 = vsel %vm2524_vm9, %v2513_v14, %v2322_v30  ;;  %v2272_v8 = vpop.permute.xlu0 %2271  ;;  %v2527_v57 = vsel %vm2524_vm9, %v2510_v4, %v2316_v24 }
 0x4e8   : > { %v2547_v7 = vsel %vm2541_vm10, %v2530_v29, %v2386_v38 }
 0x4e9   : > { %3105 = vmatmul.msk.f32.gmra.mxu1 %vm2567_vm11, %v2547_v7 }
 0x4ea   : > { %2325 = vrot.lane.b32.xlu2 %v1886_v45, %s3260_s30 }
 0x4ec   : > { %2147 = vrot.lane.b32.xlu1 %v4502_v2, %s3259_s29  ;;  %v2076_v51 = vpop.permute.xlu2 %2075  ;;  %v2500_v2 = vsel %vm2490_vm8, %v2483_v12, %v2202_v55 }
 0x4ed   : > { %2205 = vrot.lane.b32.xlu0 %v4578_v23, %s3262_s7  ;;  %v2517_v59 = vsel %vm2507_vm7, %v2500_v2, %v4841_v6 }
 0x4ee   : > { %v2380_v47 = vpop.permute.xlu1 %2379 }
 0x4ef   : > { %v2330_v48 = vpop.permute.xlu0 %2329  ;;  %v2544_v43 = vsel %vm2541_vm10, %v2527_v57, %v2380_v47 }
 0x4f0   : > { %3102 = vmatmul.msk.f32.gmra.mxu0 %vm2567_vm11, %v2544_v43  ;;  %v2534_v62 = vsel %vm2524_vm9, %v2517_v59, %v2330_v48 }
 0x4f2   : > { %2389 = vrot.lane.b32.xlu2 %v1902_v9, %s3264_s9 }
 0x4f4   : > { %2211 = vrot.lane.b32.xlu1 %v4851_v56, %s3262_s7  ;;  %v2196_v23 = vpop.permute.xlu2 %2195 }
 0x4f5   : > { %2269 = vrot.lane.b32.xlu0 %v4617_v60, %s3263_s8  ;;  %v2503_v60 = vsel %vm2490_vm8, %v2486_v15, %v4828_v41  ;;  %v1909_v41 = vld [vmem:[#allocation3 + $0x122] sm:$0xff] }
 0x4f6   : > { %v2336_v0 = vpop.permute.xlu1 %2335  ;;  %v2520_v6 = vsel %vm2507_vm7, %v2503_v60, %v2272_v8 }
 0x4f7   : > { %v2394_v22 = vpop.permute.xlu0 %2393  ;;  %v2537_v54 = vsel %vm2524_vm9, %v2520_v6, %v2336_v0 }
 0x4f8   : > { %v2551_v50 = vsel %vm2541_vm10, %v2534_v62, %v2394_v22 }
 0x4f9   : > { %3109 = vmatmul.msk.f32.gmra.mxu2 %vm2567_vm11, %v2551_v50 }
 0x4fa   : > { %2397 = vrot.lane.b32.xlu2 %v4667_v1, %s3264_s9  ;;  %v1893_v1 = vld [vmem:[#allocation3 + $0x121] sm:$0xff] }
 0x4fc   : > { %2275 = vrot.lane.b32.xlu1 %v1877_v33, %s3263_s8  ;;  %v2254_v63 = vpop.permute.xlu2 %2253 }
 0x4fd   : > { %2333 = vrot.lane.b32.xlu0 %v4500_v39, %s3260_s30 }
 0x4fe   : > { %v2400_v38 = vpop.permute.xlu1 %2399 }
 0x4ff   : > { %v2068_v31 = vpop.permute.xlu0 %2067  ;;  %v2633_v37 = vpop.f32.mrf.mxu0  ;;  %v2554_v18 = vsel %vm2541_vm10, %v2537_v54, %v2400_v38 }
 0x500   : > { %2682 = vst.msk [vmem:[#allocation5] sm:$0xff] %vm1749_vm3, %v2633_v37  ;;  %3112 = vmatmul.msk.f32.vlgmr.msra.gmra.mxu3 %vm2567_vm11, %v2554_v18  ;;  %v2463_v8 = vsel %vm2456_vm5, %v4862_v21, %v2068_v31 }
 0x502   : > { %2085 = vrot.lane.b32.xlu2 %v1877_v33, %s3261_s6 }
 0x504   : > { %2339 = vrot.lane.b32.xlu1 %v1893_v1, %s3260_s30  ;;  %v4938_v39 = vpop.permute.xlu2 %2209 }
 0x505   : > { %2403 = vrot.lane.b32.xlu0 %v1909_v41, %s3264_s9 }
 0x506   : > { %v2012_v3 = vpop.permute.xlu1 %2011 }
 0x507   : > { %v2450_v28 = vsel %vm2439_vm4, %v4631_v49, %v2012_v3  ;;  %v2126_v20 = vpop.permute.xlu0 %2125 }
 0x508   : > { %v2467_v34 = vsel %vm2456_vm5, %v2450_v28, %v2076_v51  ;;  %v2477_v43 = vsel %vm2473_vm6, %v4871_v17, %v2126_v20 }
 0x50a   : > { %2277 = vrot.lane.b32.xlu2 %v1878_v58, %s3263_s8 }
 0x50b   : > { %v2645_v52 = vpop.f32.mrf.mxu1 }
 0x50c   : > { %2021 = vrot.lane.b32.xlu1 %v4851_v56, %s3258_s28  ;;  %2686 = vst.msk [vmem:[#allocation5 + $0x20] sm:$0xff] %vm1749_vm3, %v2645_v52  ;;  %v2268_v26 = vpop.permute.xlu2 %2267 }
 0x50d   : > { %2149 = vrot.lane.b32.xlu0 %v1893_v1, %s3259_s29 }
 0x50e   : > { %v2132_v55 = vpop.permute.xlu1 %2131 }
 0x50f   : > { %v2082_v24 = vpop.permute.xlu0 %2081  ;;  %v2480_v7 = vsel %vm2473_vm6, %v2463_v8, %v2132_v55 }
 0x510   : > { %v2497_v45 = vsel %vm2490_vm8, %v2480_v7, %v2196_v23  ;;  %v2470_v6 = vsel %vm2456_vm5, %v4888_v36, %v2082_v24 }
 0x514   : > { %2213 = vrot.lane.b32.xlu1 %v1909_v41, %s3262_s7  ;;  %v2388_v49 = vpop.permute.xlu2 %2387 }
 0x515   : > { %2341 = vrot.lane.b32.xlu0 %v1894_v46, %s3260_s30 }
 0x516   : > { %v2190_v13 = vpop.permute.xlu1 %2189 }
 0x517   : > { %v2140_v10 = vpop.permute.xlu0 %2139  ;;  %v2494_v21 = vsel %vm2490_vm8, %v2477_v43, %v2190_v13 }
 0x518   : > { %v2511_v9 = vsel %vm2507_vm7, %v2494_v21, %v2254_v63  ;;  %v2484_v62 = vsel %vm2473_vm6, %v2467_v34, %v2140_v10 }
 0x51c   : > { %2405 = vrot.lane.b32.xlu1 %v1910_v27, %s3264_s9  ;;  %v2006_v56 = vpop.permute.xlu2 %2005 }
 0x51d   : > { %v2447_v36 = vsel %vm2439_vm4, %v4606_v42, %v2006_v56 }
 0x51e   : > { %v2146_v40 = vpop.permute.xlu1 %2145 }
 0x51f   : > { %v2260_v44 = vpop.permute.xlu0 %2259  ;;  %v2487_v54 = vsel %vm2473_vm6, %v2470_v6, %v2146_v40  ;;  %v2434_v40 = vsel %vm1749_vm3, %v4681_v53, %v4565_v32  ;;  %v2437_v32 = vsel %vm1749_vm3, %v4703_v35, %v4572_v61 }
 0x520   : > { %v2514_v4 = vsel %vm2507_vm7, %v2497_v45, %v2260_v44  ;;  %v2504_v38 = vsel %vm2490_vm8, %v2487_v54, %v4938_v39 }
 0x524   : > { %v2070_v14 = vpop.permute.xlu2 %2069 }
 0x525   : > { %v2464_v28 = vsel %vm2456_vm5, %v2447_v36, %v2070_v14 }
 0x526   : > { %v2204_v30 = vpop.permute.xlu1 %2203 }
 0x527   : > { %v2318_v29 = vpop.permute.xlu0 %2317  ;;  %v2501_v22 = vsel %vm2490_vm8, %v2484_v62, %v2204_v30 }
 0x528   : > { %v2528_v2 = vsel %vm2524_vm9, %v2511_v9, %v2318_v29  ;;  %v2518_v50 = vsel %vm2507_vm7, %v2501_v22, %v2268_v26 }
 0x52c   : > { %v2134_v19 = vpop.permute.xlu2 %2133 }
 0x52d   : > { %v2636_v25 = vpop.f32.mrf.mxu0  ;;  %v2481_v20 = vsel %vm2473_vm6, %v2464_v28, %v2134_v19 }
 0x52e   : > { %2683 = vst.msk [vmem:[#allocation5 + $0x8] sm:$0xff] %vm1749_vm3, %v2636_v25  ;;  %v2324_v51 = vpop.permute.xlu1 %2323 }
 0x52f   : > { %v2531_v57 = vsel %vm2524_vm9, %v2514_v4, %v2324_v51  ;;  %v2274_v47 = vpop.permute.xlu0 %2273 }
 0x530   : > { %v2548_v48 = vsel %vm2541_vm10, %v2531_v57, %v2388_v49  ;;  %v2521_v31 = vsel %vm2507_vm7, %v2504_v38, %v2274_v47 }
 0x531   : > { %3106 = vmatmul.msk.f32.gmra.mxu1 %vm2567_vm11, %v2548_v48 }
 0x534   : > { %v2198_v12 = vpop.permute.xlu2 %2197 }
 0x535   : > { %v2498_v39 = vsel %vm2490_vm8, %v2481_v20, %v2198_v12 }
 0x536   : > { %v2382_v23 = vpop.permute.xlu1 %2381 }
 0x537   : > { %v2332_v59 = vpop.permute.xlu0 %2331  ;;  %v2545_v0 = vsel %vm2541_vm10, %v2528_v2, %v2382_v23 }
 0x538   : > { %3103 = vmatmul.msk.f32.gmra.mxu0 %vm2567_vm11, %v2545_v0  ;;  %v2535_v33 = vsel %vm2524_vm9, %v2518_v50, %v2332_v59  ;;  %v2438_v59 = vsel %vm1749_vm3, %v4823_v16, %v4659_v5 }
 0x53b   : > { %v2657_v17 = vpop.f32.mrf.mxu2 }
 0x53c   : > { %2690 = vst.msk [vmem:[#allocation5 + $0x40] sm:$0xff] %vm1749_vm3, %v2657_v17  ;;  %v2262_v11 = vpop.permute.xlu2 %2261 }
 0x53d   : > { %v2515_v34 = vsel %vm2507_vm7, %v2498_v39, %v2262_v11 }
 0x53e   : > { %v2338_v15 = vpop.permute.xlu1 %2337 }
 0x53f   : > { %v2396_v60 = vpop.permute.xlu0 %2395  ;;  %v2538_v18 = vsel %vm2524_vm9, %v2521_v31, %v2338_v15 }
 0x540   : > { %v2552_v63 = vsel %vm2541_vm10, %v2535_v33, %v2396_v60 }
 0x541   : > { %3110 = vmatmul.msk.f32.gmra.mxu2 %vm2567_vm11, %v2552_v63 }
 0x544   : > { %v2326_v37 = vpop.permute.xlu2 %2325 }
 0x545   : > { %v2532_v58 = vsel %vm2524_vm9, %v2515_v34, %v2326_v37 }
 0x546   : > { %v2402_v1 = vpop.permute.xlu1 %2401 }
 0x547   : > { %v2014_v41 = vpop.permute.xlu0 %2013  ;;  %v2555_v3 = vsel %vm2541_vm10, %v2538_v18, %v2402_v1  ;;  %v5034_v1 = vld [vmem:[#allocation5 + $0x8] sm:$0xff] }
 0x548   : > { %3113 = vmatmul.msk.f32.gmra.mxu3 %vm2567_vm11, %v2555_v3  ;;  %v2451_v44 = vsel %vm2439_vm4, %v2434_v40, %v2014_v41  ;;  %v5036_v41 = vld [vmem:[#allocation5] sm:$0xff]  ;;  %v2718_v36 = vsel %vm1749_vm3, %v5034_v1, 0.0 }
 0x549   : > { %v2717_v20 = vsel %vm1749_vm3, %v5036_v41, 0.0 }
 0x54a   : > { %v2719_v34 = vadd.f32 %v2718_v36, %v2717_v20 }
 0x54c   : > { %v2390_v52 = vpop.permute.xlu2 %2389 }
 0x54d   : > { %v2549_v55 = vsel %vm2541_vm10, %v2532_v58, %v2390_v52 }
 0x54e   : > { %v2020_v26 = vpop.permute.xlu1 %2019  ;;  %3107 = vmatmul.msk.f32.gmra.mxu1 %vm2567_vm11, %v2549_v55 }
 0x54f   : > { %v2078_v24 = vpop.permute.xlu0 %2077  ;;  %v2454_v51 = vsel %vm2439_vm4, %v2437_v32, %v2020_v26  ;;  %v5050_v26 = vld [vmem:[#allocation5 + $0x20] sm:$0xff] }
 0x550   : > { %v2468_v14 = vsel %vm2456_vm5, %v2451_v44, %v2078_v24 }
 0x554   : > { %v2398_v45 = vpop.permute.xlu2 %2397 }
 0x556   : > { %v2084_v42 = vpop.permute.xlu1 %2083 }
 0x557   : > { %v2142_v46 = vpop.permute.xlu0 %2141  ;;  %v2471_v57 = vsel %vm2456_vm5, %v2454_v51, %v2084_v42  ;;  %v2724_v42 = vsel %vm1749_vm3, %v5050_v26, 0.0 }
 0x558   : > { %v2485_v30 = vsel %vm2473_vm6, %v2468_v14, %v2142_v46 }
 0x55c   : > { %v2086_v23 = vpop.permute.xlu2 %2085 }
 0x55e   : > { %v2148_v49 = vpop.permute.xlu1 %2147 }
 0x55f   : > { %v2206_v13 = vpop.permute.xlu0 %2205  ;;  %v2488_v47 = vsel %vm2473_vm6, %v2471_v57, %v2148_v49 }
 0x560   : > { %v2502_v8 = vsel %vm2490_vm8, %v2485_v30, %v2206_v13 }
 0x564   : > { %v2278_v33 = vpop.permute.xlu2 %2277 }
 0x566   : > { %v2212_v10 = vpop.permute.xlu1 %2211  ;;  %v2648_v27 = vpop.f32.mrf.mxu1 }
 0x567   : > { %2687 = vst.msk [vmem:[#allocation5 + $0x28] sm:$0xff] %vm1749_vm3, %v2648_v27  ;;  %v2270_v56 = vpop.permute.xlu0 %2269  ;;  %v2505_v48 = vsel %vm2490_vm8, %v2488_v47, %v2212_v10 }
 0x568   : > { %v2519_v25 = vsel %vm2507_vm7, %v2502_v8, %v2270_v56 }
 0x56d   : > { %v2639_v29 = vpop.f32.mrf.mxu0 }
 0x56e   : > { %2684 = vst.msk [vmem:[#allocation5 + $0x10] sm:$0xff] %vm1749_vm3, %v2639_v29  ;;  %v2276_v7 = vpop.permute.xlu1 %2275  ;;  %v2706_v46 = vld [vmem:[#allocation5 + $0x28] sm:$0xff]  ;;  %v5065_v29 = vld [vmem:[#allocation5 + $0x40] sm:$0xff] }
 0x56f   : > { %v2334_v19 = vpop.permute.xlu0 %2333  ;;  %v2522_v43 = vsel %vm2507_vm7, %v2505_v48, %v2276_v7  ;;  %v2726_v13 = vsel %vm1749_vm3, %v2706_v46, 0.0  ;;  %v2732_v7 = vsel %vm1749_vm3, %v5065_v29, 0.0  ;;  %v3265_v48 = vmov 128.0  }
 0x570   : > { %v2536_v4 = vsel %vm2524_vm9, %v2519_v25, %v2334_v19  ;;  %3216 = vrcp.f32 %v3265_v48 }
 0x571   : > { %v2553_v53 = vsel %vm2541_vm10, %v2536_v4, %v2398_v45 }
 0x572   : > { %3111 = vmatmul.msk.f32.gmra.mxu2 %vm2567_vm11, %v2553_v53 }
 0x575   : > { %v5038_v3 = vld [vmem:[#allocation5 + $0x10] sm:$0xff] }
 0x576   : > { %v2340_v21 = vpop.permute.xlu1 %2339  ;;  %v2720_v39 = vsel %vm1749_vm3, %v5038_v3, 0.0 }
 0x577   : > { %v2539_v9 = vsel %vm2524_vm9, %v2522_v43, %v2340_v21  ;;  %v2404_v12 = vpop.permute.xlu0 %2403  ;;  %v2721_v52 = vadd.f32 %v2720_v39, %v2719_v34 }
 0x578   : > { %v2556_v61 = vsel %vm2541_vm10, %v2539_v9, %v2404_v12 }
 0x579   : > { %3114 = vmatmul.msk.f32.gmra.mxu3 %vm2567_vm11, %v2556_v61  ;;  %v3217_v61 = vpop.eup %3216 }
 0x57a   : > { %vm2760_vm12 = vweird.f32 %v3217_v61 }
 0x57c   : > { %v2660_v35 = vpop.f32.mrf.mxu2 }
 0x57d   : > { %2691 = vst.msk [vmem:[#allocation5 + $0x48] sm:$0xff] %vm1749_vm3, %v2660_v35 }
 0x57e   : > { %v2022_v2 = vpop.permute.xlu1 %2021 }
 0x57f   : > { %v2455_v0 = vsel %vm2439_vm4, %v2438_v59, %v2022_v2  ;;  %v2150_v62 = vpop.permute.xlu0 %2149 }
 0x580   : > { %v2472_v17 = vsel %vm2456_vm5, %v2455_v0, %v2086_v23 }
 0x581   : > { %v2489_v50 = vsel %vm2473_vm6, %v2472_v17, %v2150_v62  ;;  %v2756_v62 = vmul.f32 128.0, %v3217_v61 }
 0x583   : > { %v2669_v22 = vpop.f32.mrf.mxu3 }
 0x584   : > { %2694 = vst.msk [vmem:[#allocation5 + $0x60] sm:$0xff] %vm1749_vm3, %v2669_v22  ;;  %v5069_v45 = vld [vmem:[#allocation5 + $0x48] sm:$0xff] }
 0x585   : > { %v2734_v19 = vsel %vm1749_vm3, %v5069_v45, 0.0 }
 0x586   : > { %v2214_v11 = vpop.permute.xlu1 %2213 }
 0x587   : > { %v2506_v15 = vsel %vm2490_vm8, %v2489_v50, %v2214_v11  ;;  %v2342_v6 = vpop.permute.xlu0 %2341 }
 0x588   : > { %v2523_v60 = vsel %vm2507_vm7, %v2506_v15, %v2278_v33  ;;  %v2757_v15 = vsub.f32 1.0, %v2756_v62 }
 0x589   : > { %v2540_v63 = vsel %vm2524_vm9, %v2523_v60, %v2342_v6 }
 0x58a   : > { %v2758_v6 = vmul.f32 %v3217_v61, %v2757_v15 }
 0x58b   : > { %v5081_v43 = vld [vmem:[#allocation5 + $0x60] sm:$0xff] }
 0x58c   : > { %v2740_v12 = vsel %vm1749_vm3, %v5081_v43, 0.0 }
 0x58e   : > { %v2406_v5 = vpop.permute.xlu1 %2405 }
 0x58f   : > { %v2557_v16 = vsel %vm2541_vm10, %v2540_v63, %v2406_v5 }
 0x590   : > { %3115 = vmatmul.msk.f32.gmra.mxu3 %vm2567_vm11, %v2557_v16  ;;  %v2759_v16 = vadd.f32 %v3217_v61, %v2758_v6 }
 0x5ae   : > { %v2651_v54 = vpop.f32.mrf.mxu1 }
 0x5af   : > { %2688 = vst.msk [vmem:[#allocation5 + $0x30] sm:$0xff] %vm1749_vm3, %v2651_v54 }
 0x5b5   : > { %v2642_v38 = vpop.f32.mrf.mxu0 }
 0x5b6   : > { %2685 = vst.msk [vmem:[#allocation5 + $0x18] sm:$0xff] %vm1749_vm3, %v2642_v38  ;;  %v5056_v27 = vld [vmem:[#allocation5 + $0x30] sm:$0xff] }
 0x5b7   : > { %v2728_v44 = vsel %vm1749_vm3, %v5056_v27, 0.0 }
 0x5bd   : > { %v5042_v28 = vld [vmem:[#allocation5 + $0x18] sm:$0xff] }
 0x5be   : > { %v2722_v58 = vsel %vm1749_vm3, %v5042_v28, 0.0 }
 0x5bf   : > { %v2723_v55 = vadd.f32 %v2722_v58, %v2721_v52 }
 0x5c1   : > { %v2725_v49 = vadd.f32 %v2724_v42, %v2723_v55 }
 0x5c3   : > { %v2727_v40 = vadd.f32 %v2726_v13, %v2725_v49 }
 0x5c4   : > { %v2663_v31 = vpop.f32.mrf.mxu2 }
 0x5c5   : > { %2692 = vst.msk [vmem:[#allocation5 + $0x50] sm:$0xff] %vm1749_vm3, %v2663_v31  ;;  %v2729_v30 = vadd.f32 %v2728_v44, %v2727_v40  ;;  %v5098_v31 = vsel %vm2760_vm12, %v3217_v61, %v2759_v16 }
 0x5cb   : > { %v2672_v37 = vpop.f32.mrf.mxu3  ;;  %v2654_v18 = vpop.f32.mrf.mxu1 }
 0x5cc   : > { %2695 = vst.msk [vmem:[#allocation5 + $0x68] sm:$0xff] %vm1749_vm3, %v2672_v37  ;;  %v5073_v4 = vld [vmem:[#allocation5 + $0x50] sm:$0xff] }
 0x5cd   : > { %2689 = vst.msk [vmem:[#allocation5 + $0x38] sm:$0xff] %vm1749_vm3, %v2654_v18  ;;  %v2736_v51 = vsel %vm1749_vm3, %v5073_v4, 0.0 }
 0x5d3   : > { %v5086_v35 = vld [vmem:[#allocation5 + $0x68] sm:$0xff] }
 0x5d4   : > { %v5058_v56 = vld [vmem:[#allocation5 + $0x38] sm:$0xff]  ;;  %v2742_v59 = vsel %vm1749_vm3, %v5086_v35, 0.0 }
 0x5d5   : > { %v2730_v14 = vsel %vm1749_vm3, %v5058_v56, 0.0 }
 0x5d6   : > { %v2731_v8 = vadd.f32 %v2730_v14, %v2729_v30 }
 0x5d8   : > { %v2733_v25 = vadd.f32 %v2732_v7, %v2731_v8 }
 0x5da   : > { %v2735_v53 = vadd.f32 %v2734_v19, %v2733_v25 }
 0x5dc   : > { %v2737_v47 = vadd.f32 %v2736_v51, %v2735_v53 }
 0x5f5   : > { %v2666_v24 = vpop.f32.mrf.mxu2 }
 0x5f6   : > { %2693 = vst.msk [vmem:[#allocation5 + $0x58] sm:$0xff] %vm1749_vm3, %v2666_v24 }
 0x5fc   : > { %v2675_v10 = vpop.f32.mrf.mxu3 }
 0x5fd   : > { %2696 = vst.msk [vmem:[#allocation5 + $0x70] sm:$0xff] %vm1749_vm3, %v2675_v10  ;;  %v5075_v32 = vld [vmem:[#allocation5 + $0x58] sm:$0xff] }
 0x5fe   : > { %v2738_v57 = vsel %vm1749_vm3, %v5075_v32, 0.0 }
 0x5ff   : > { %v2739_v21 = vadd.f32 %v2738_v57, %v2737_v47 }
 0x601   : > { %v2741_v2 = vadd.f32 %v2740_v12, %v2739_v21 }
 0x603   : > { %v2743_v22 = vadd.f32 %v2742_v59, %v2741_v2 }
 0x604   : > { %v5088_v23 = vld [vmem:[#allocation5 + $0x70] sm:$0xff] }
 0x605   : > { %v2744_v0 = vsel %vm1749_vm3, %v5088_v23, 0.0 }
 0x606   : > { %v2745_v17 = vadd.f32 %v2744_v0, %v2743_v22 }
 0x613   : > { %v2678_v9 = vpop.f32.mrf.mxu3 }
 0x614   : > { %2697 = vst.msk [vmem:[#allocation5 + $0x78] sm:$0xff] %vm1749_vm3, %v2678_v9 }
 0x61b   : > { %v5094_v11 = vld [vmem:[#allocation5 + $0x78] sm:$0xff] }
 0x61c   : > { %v2746_v50 = vsel %vm1749_vm3, %v5094_v11, 0.0 }
 0x61d   : > { %v2747_v33 = vadd.f32 %v2746_v50, %v2745_v17 }
 0x61f   : > { %v2748_v60 = vrot.slane %v2747_v33, 4 }
 0x621   : > { %v2749_v63 = vadd.f32 %v2748_v60, %v2747_v33 }
 0x623   : > { %v2750_v5 = vrot.slane %v2749_v63, 2 }
 0x625   : > { %v2751_v54 = vadd.f32 %v2750_v5, %v2749_v63 }
 0x627   : > { %v2752_v38 = vrot.slane %v2751_v54, 1 }
 0x629   : > { %v2753_v37 = vadd.f32 %v2752_v38, %v2751_v54 }
 0x62b   : > { %v5101_v18 = vmul.f32 %v5098_v31, %v2753_v37 }
 0x62d   : > { %v2763_v36 = vsub.f32 %v5036_v41, %v5101_v18  ;;  %v2764_v20 = vsub.f32 %v5034_v1, %v5101_v18  ;;  %v2765_v39 = vsub.f32 %v5038_v3, %v5101_v18  ;;  %v2766_v34 = vsub.f32 %v5042_v28, %v5101_v18 }
 0x62e   : > { %v2767_v55 = vsub.f32 %v5050_v26, %v5101_v18  ;;  %v2768_v42 = vsub.f32 %v2706_v46, %v5101_v18  ;;  %v2769_v3 = vsub.f32 %v5056_v27, %v5101_v18  ;;  %v2770_v44 = vsub.f32 %v5058_v56, %v5101_v18 }
 0x62f   : > { %v2779_v58 = vmul.f32 %v2763_v36, %v2763_v36  ;;  %v2780_v52 = vmul.f32 %v2764_v20, %v2764_v20  ;;  %v2781_v24 = vmul.f32 %v2765_v39, %v2765_v39  ;;  %v2782_v49 = vmul.f32 %v2766_v34, %v2766_v34 }
 0x630   : > { %v2783_v10 = vmul.f32 %v2767_v55, %v2767_v55  ;;  %v2784_v26 = vmul.f32 %v2768_v42, %v2768_v42  ;;  %v2771_v30 = vsub.f32 %v5065_v29, %v5101_v18  ;;  %v2785_v8 = vmul.f32 %v2769_v3, %v2769_v3 }
 0x631   : > { %v2795_v41 = vsel %vm1749_vm3, %v2779_v58, 0.0  ;;  %v2796_v13 = vsel %vm1749_vm3, %v2780_v52, 0.0  ;;  %v2798_v28 = vsel %vm1749_vm3, %v2781_v24, 0.0  ;;  %v2800_v14 = vsel %vm1749_vm3, %v2782_v49, 0.0 }
 0x632   : > { %v2797_v1 = vadd.f32 %v2796_v13, %v2795_v41  ;;  %v2802_v7 = vsel %vm1749_vm3, %v2783_v10, 0.0  ;;  %v2772_v27 = vsub.f32 %v5069_v45, %v5101_v18  ;;  %v2786_v19 = vmul.f32 %v2770_v44, %v2770_v44  ;;  %v2834_v10 = vld [vmem:[%s5214_s4] sm:$0x1] }
 0x633   : > { %v2804_v53 = vsel %vm1749_vm3, %v2784_v26, 0.0  ;;  %v2773_v56 = vsub.f32 %v5073_v4, %v5101_v18  ;;  %v2787_v57 = vmul.f32 %v2771_v30, %v2771_v30  ;;  %v2806_v47 = vsel %vm1749_vm3, %v2785_v8, 0.0 }
 0x634   : > { %v2799_v40 = vadd.f32 %v2798_v28, %v2797_v1  ;;  %v2774_v29 = vsub.f32 %v5075_v32, %v5101_v18  ;;  %v2788_v21 = vmul.f32 %v2772_v27, %v2772_v27  ;;  %v2808_v9 = vsel %vm1749_vm3, %v2786_v19, 0.0 }
 0x635   : > { %v2775_v45 = vsub.f32 %v5081_v43, %v5101_v18  ;;  %v2789_v61 = vmul.f32 %v2773_v56, %v2773_v56  ;;  %v2810_v2 = vsel %vm1749_vm3, %v2787_v57, 0.0  ;;  %v2776_v4 = vsub.f32 %v5086_v35, %v5101_v18 }
 0x636   : > { %v2801_v46 = vadd.f32 %v2800_v14, %v2799_v40  ;;  %v2790_v0 = vmul.f32 %v2774_v29, %v2774_v29  ;;  %v2812_v62 = vsel %vm1749_vm3, %v2788_v21, 0.0  ;;  %v2777_v32 = vsub.f32 %v5088_v23, %v5101_v18 }
 0x637   : > { %v2791_v17 = vmul.f32 %v2775_v45, %v2775_v45  ;;  %v2814_v50 = vsel %vm1749_vm3, %v2789_v61, 0.0  ;;  %v2778_v43 = vsub.f32 %v5094_v11, %v5101_v18  ;;  %v2792_v33 = vmul.f32 %v2776_v4, %v2776_v4 }
 0x638   : > { %v2803_v25 = vadd.f32 %v2802_v7, %v2801_v46  ;;  %v2816_v60 = vsel %vm1749_vm3, %v2790_v0, 0.0  ;;  %v2793_v63 = vmul.f32 %v2777_v32, %v2777_v32 }
 0x639   : > { %v2818_v35 = vsel %vm1749_vm3, %v2791_v17, 0.0  ;;  %v2794_v16 = vmul.f32 %v2778_v43, %v2778_v43  ;;  %v2820_v54 = vsel %vm1749_vm3, %v2792_v33, 0.0 }
 0x63a   : > { %v2805_v51 = vadd.f32 %v2804_v53, %v2803_v25  ;;  %v2822_v23 = vsel %vm1749_vm3, %v2793_v63, 0.0 }
 0x63b   : > { %v2824_v36 = vsel %vm1749_vm3, %v2794_v16, 0.0 }
 0x63c   : > { %v2807_v48 = vadd.f32 %v2806_v47, %v2805_v51 }
 0x63e   : > { %v2809_v12 = vadd.f32 %v2808_v9, %v2807_v48 }
 0x640   : > { %v2811_v59 = vadd.f32 %v2810_v2, %v2809_v12 }
 0x642   : > { %v2813_v22 = vadd.f32 %v2812_v62, %v2811_v59 }
 0x644   : > { %v2815_v15 = vadd.f32 %v2814_v50, %v2813_v22 }
 0x646   : > { %v2817_v6 = vadd.f32 %v2816_v60, %v2815_v15 }
 0x648   : > { %v2819_v5 = vadd.f32 %v2818_v35, %v2817_v6 }
 0x64a   : > { %v2821_v38 = vadd.f32 %v2820_v54, %v2819_v5 }
 0x64c   : > { %v2823_v37 = vadd.f32 %v2822_v23, %v2821_v38 }
 0x64e   : > { %v2825_v20 = vadd.f32 %v2824_v36, %v2823_v37 }
 0x650   : > { %v2826_v39 = vrot.slane %v2825_v20, 4 }
 0x652   : > { %v2827_v11 = vadd.f32 %v2826_v39, %v2825_v20 }
 0x654   : > { %v2828_v34 = vrot.slane %v2827_v11, 2 }
 0x656   : > { %v2829_v58 = vadd.f32 %v2828_v34, %v2827_v11 }
 0x658   : > { %v2830_v52 = vrot.slane %v2829_v58, 1 }
 0x65a   : > { %v2831_v55 = vadd.f32 %v2830_v52, %v2829_v58 }
 0x65c   : > { %v2833_v24 = vmul.f32 %v2831_v55, %v5098_v31  ;;  %v2847_v31 = vld [vmem:[%s5214_s4 + $0x1] sm:$0x1] }
 0x65e   : > { %v2835_v42 = vadd.f32 1e-05, %v2833_v24 }
 0x660   : > { %3218 = vrsqrt.f32 %v2835_v42  ;;  %vm2842_vm14 = vweird.f32 %v2835_v42 }
 0x666   : > { %v3219_v49 = vpop.eup %3218 }
 0x667   : > { %v2837_v41 = vmul.f32 %v3219_v49, %v2835_v42  ;;  %vm2843_vm13 = vweird.f32 %v3219_v49 }
 0x668   : > { %vm2844_vm15 = vmor %vm2842_vm14, %vm2843_vm13 }
 0x669   : > { %v2838_v13 = vmul.f32 %v3219_v49, %v2837_v41 }
 0x66b   : > { %v2839_v1 = vmul.f32 0.5, %v2838_v13 }
 0x66d   : > { %v2840_v3 = vsub.f32 1.5, %v2839_v1 }
 0x66f   : > { %v2841_v28 = vmul.f32 %v3219_v49, %v2840_v3 }
 0x671   : > { %v2845_v40 = vsel %vm2844_vm15, %v3219_v49, %v2841_v28 }
 0x672   : > { %v2846_v44 = vmul.f32 %v2845_v40, %v2834_v10 }
 0x674   : > { %v2848_v26 = vmul.f32 %v2846_v44, %v5101_v18  ;;  %2851 = vst.msk [vmem:[#allocation7] sm:$0x1] %vm2850_vm0, %v2846_v44 }
 0x676   : > { %v2849_v14 = vsub.f32 %v2847_v31, %v2848_v26 }
 0x678   : > { %2852 = vst.msk [vmem:[#allocation7 + $0x1] sm:$0x1] %vm2850_vm0, %v2849_v14 }
 0x679 PF: > { %p3116_p7 = scmp.ne.s32.totalorder %s3236_s18, 2 }
 0x67b   : > { %2856 = sbr.rel (%p3116_p7) target bundleno = 1839 (0x72f), region = 64 }
 0x680   : > { %v2867_v46 = vld [vmem:[#allocation5 + $0x40] sm:$0xff]  ;;  %v2868_v19 = vld [vmem:[#allocation5 + $0x48] sm:$0xff]  ;;  %v2869_v9 = vld [vmem:[#allocation5 + $0x50] sm:$0xff]  ;;  %vm2959_vm1 = vcmask 523264  }
 0x681   : > { %v5159_v30 = vld [vmem:[#allocation7] ss:$0 sm:$0xff]  ;;  %v5161_v8 = vld [vmem:[#allocation7 + $0x1] ss:$0 sm:$0xff]  ;;  %v2860_v53 = vld [vmem:[#allocation5 + $0x8] sm:$0xff] }
 0x682   : > { %v2859_v7 = vld [vmem:[#allocation5] sm:$0xff]  ;;  %v2885_v25 = vmul.f32 %v5159_v30, %v2867_v46  ;;  %v2886_v56 = vmul.f32 %v5159_v30, %v2868_v19  ;;  %v2878_v57 = vmul.f32 %v5159_v30, %v2860_v53  ;;  %v2861_v12 = vld [vmem:[#allocation5 + $0x10] sm:$0xff]  ;;  %v2887_v2 = vmul.f32 %v5159_v30, %v2869_v9  ;;  %v2870_v62 = vld [vmem:[#allocation5 + $0x58] sm:$0xff] }
 0x683   : > { %v2877_v27 = vmul.f32 %v5159_v30, %v2859_v7  ;;  %v2879_v59 = vmul.f32 %v5159_v30, %v2861_v12  ;;  %v2862_v22 = vld [vmem:[#allocation5 + $0x18] sm:$0xff]  ;;  %v2888_v50 = vmul.f32 %v5159_v30, %v2870_v62  ;;  %v2871_v60 = vld [vmem:[#allocation5 + $0x60] sm:$0xff]  ;;  %v2872_v23 = vld [vmem:[#allocation5 + $0x68] sm:$0xff] }
 0x684   : > { %v2903_v18 = vadd.f32 %v5161_v8, %v2885_v25  ;;  %v2904_v29 = vadd.f32 %v5161_v8, %v2886_v56  ;;  %v2896_v21 = vadd.f32 %v5161_v8, %v2878_v57  ;;  %v2905_v4 = vadd.f32 %v5161_v8, %v2887_v2  ;;  %v2863_v6 = vld [vmem:[#allocation5 + $0x20] sm:$0xff]  ;;  %v2864_v37 = vld [vmem:[#allocation5 + $0x28] sm:$0xff]  ;;  %v2873_v52 = vld [vmem:[#allocation5 + $0x70] sm:$0xff] }
 0x685   : > { %v2895_v51 = vadd.f32 %v5161_v8, %v2877_v27  ;;  %v2897_v0 = vadd.f32 %v5161_v8, %v2879_v59  ;;  %v2880_v15 = vmul.f32 %v5159_v30, %v2862_v22  ;;  %v2906_v43 = vadd.f32 %v5161_v8, %v2888_v50  ;;  %v2865_v55 = vld [vmem:[#allocation5 + $0x30] sm:$0xff]  ;;  %v2874_v3 = vld [vmem:[#allocation5 + $0x78] sm:$0xff] }
 0x686   : > { %v2919_v47 = vmax.f32 %v2903_v18, 0.0  ;;  %v2920_v45 = vmax.f32 %v2904_v29, 0.0  ;;  %v2912_v61 = vmax.f32 %v2896_v21, 0.0  ;;  %v2921_v32 = vmax.f32 %v2905_v4, 0.0  ;;  %v2866_v10 = vld [vmem:[#allocation5 + $0x38] sm:$0xff] }
 0x687   : > { %v2911_v48 = vmax.f32 %v2895_v51, 0.0  ;;  %v2913_v17 = vmax.f32 %v2897_v0, 0.0  ;;  %v2898_v33 = vadd.f32 %v5161_v8, %v2880_v15  ;;  %v2922_v63 = vmax.f32 %v2906_v43, 0.0 }
 0x688   : > { %2961 = vxpose.xlu1.b32.start [1/8] (short) (narrow) %v2919_v47, 8  ;;  %v2889_v5 = vmul.f32 %v5159_v30, %v2871_v60  ;;  %v2881_v16 = vmul.f32 %v5159_v30, %v2863_v6  ;;  %v2890_v39 = vmul.f32 %v5159_v30, %v2872_v23  ;;  %v2882_v11 = vmul.f32 %v5159_v30, %v2864_v37 }
 0x689   : > { %2927 = vxpose.xlu0.b32.start [1/8] (short) (narrow) %v2911_v48, 8  ;;  %v2914_v35 = vmax.f32 %v2898_v33, 0.0  ;;  %v2891_v49 = vmul.f32 %v5159_v30, %v2873_v52  ;;  %v2883_v41 = vmul.f32 %v5159_v30, %v2865_v55  ;;  %v2892_v44 = vmul.f32 %v5159_v30, %v2874_v3 }
 0x68a   : > { %v2907_v54 = vadd.f32 %v5161_v8, %v2889_v5  ;;  %v2899_v38 = vadd.f32 %v5161_v8, %v2881_v16  ;;  %v2908_v34 = vadd.f32 %v5161_v8, %v2890_v39  ;;  %v2900_v58 = vadd.f32 %v5161_v8, %v2882_v11 }
 0x68b   : > { %v2909_v13 = vadd.f32 %v5161_v8, %v2891_v49  ;;  %v2901_v1 = vadd.f32 %v5161_v8, %v2883_v41  ;;  %v2884_v31 = vmul.f32 %v5159_v30, %v2866_v10  ;;  %v2910_v26 = vadd.f32 %v5161_v8, %v2892_v44 }
 0x68c   : > { %v2923_v36 = vmax.f32 %v2907_v54, 0.0  ;;  %v2915_v20 = vmax.f32 %v2899_v38, 0.0  ;;  %v2924_v24 = vmax.f32 %v2908_v34, 0.0  ;;  %v2916_v42 = vmax.f32 %v2900_v58, 0.0 }
 0x68d   : > { %v2925_v28 = vmax.f32 %v2909_v13, 0.0  ;;  %v2917_v40 = vmax.f32 %v2901_v1, 0.0  ;;  %v2902_v14 = vadd.f32 %v5161_v8, %v2884_v31  ;;  %v2926_v46 = vmax.f32 %v2910_v26, 0.0 }
 0x68f   : > { %v2918_v7 = vmax.f32 %v2902_v14, 0.0 }
 0x690   : > { %2962 = vxpose.xlu1.b32.cont [2/8] (short) (narrow) %v2920_v45, 8 }
 0x691   : > { %2928 = vxpose.xlu0.b32.cont [2/8] (short) (narrow) %v2912_v61, 8 }
 0x698   : > { %2963 = vxpose.xlu1.b32.cont [3/8] (short) (narrow) %v2921_v32, 8 }
 0x699   : > { %2929 = vxpose.xlu0.b32.cont [3/8] (short) (narrow) %v2913_v17, 8 }
 0x6a0   : > { %2964 = vxpose.xlu1.b32.cont [4/8] (short) (narrow) %v2922_v63, 8 }
 0x6a1   : > { %2930 = vxpose.xlu0.b32.cont [4/8] (short) (narrow) %v2914_v35, 8 }
 0x6a8   : > { %2965 = vxpose.xlu1.b32.cont [5/8] (short) (narrow) %v2923_v36, 8 }
 0x6a9   : > { %2931 = vxpose.xlu0.b32.cont [5/8] (short) (narrow) %v2915_v20, 8 }
 0x6b0   : > { %2966 = vxpose.xlu1.b32.cont [6/8] (short) (narrow) %v2924_v24, 8 }
 0x6b1   : > { %2932 = vxpose.xlu0.b32.cont [6/8] (short) (narrow) %v2916_v42, 8 }
 0x6b8   : > { %2967 = vxpose.xlu1.b32.cont [7/8] (short) (narrow) %v2925_v28, 8 }
 0x6b9   : > { %2933 = vxpose.xlu0.b32.cont [7/8] (short) (narrow) %v2917_v40, 8 }
 0x6c0   : > { %2968 = vxpose.xlu1.b32.end [8/8] (short) (narrow) %v2926_v46, 8 }
 0x6c1   : > { %2934 = vxpose.xlu0.b32.end [8/8] (short) (narrow) %v2918_v7, 8 }
 0x72c   : > { %v2977_v25 = vpop.trf.xlu1 }
 0x72d   : > { %v2943_v27 = vpop.trf.xlu0  ;;  %3117 = vst.msk [vmem:[%s5215_s5 + $0x8] sm:$0xff] %vm2959_vm1, %v2977_v25 }
 0x72e   : > { %2960 = vst.msk [vmem:[%s5215_s5] sm:$0xff] %vm2959_vm1, %v2943_v27 }
 0x72f PF: > { %s15_s20 = sadd.s32 1, %s3244_s20   ;;  %s5216_s18 = smov %s3240_s19 }
 0x730   : > { %p12_p8 = scmp.ge.s32.totalorder %s15_s20, 5   ;;  %s5217_s19 = smov %s5219_s21 }
 0x732   :  { %14 = sbr.rel (!%p12_p8) target bundleno = 2 (0x2), region = 103 }

</bundles_post_ra>
